<compile_context>
chip_gen: v6e
topology: v6e:2x2x1
jax: 0.10.0
libtpu: 0.0.40
codegen_flags: <defaults>
</compile_context>

<pallas_src>
import math

import jax
import jax.numpy as jnp
from jax.experimental import pallas as pl
from jax.experimental.pallas import tpu as pltpu

# ---- hyperparameters (globals, as in the PyTorch script; shrunk to small) ----
d_model = 32
d_k = 8
d_v = 8
n_heads = 4
d_ff = 64
n_layers = 2
src_vocab_size = 16
tgt_vocab_size = 16

LN_EPS = 1e-5          # PyTorch nn.LayerNorm default
NEG_INF = -1e9         # masked_fill value in the reference

HQ = n_heads * d_k     # fused Q/K width
HV = n_heads * d_v     # fused V width


# ----------------------------------------------------------------------------
# In-kernel helpers (traced Python, inlined into the kernels)
# ----------------------------------------------------------------------------
def _layer_norm(x, gamma, beta):
    mean = jnp.mean(x, axis=-1, keepdims=True)
    var = jnp.mean((x - mean) ** 2, axis=-1, keepdims=True)
    return (x - mean) * jax.lax.rsqrt(var + LN_EPS) * gamma + beta


def _sdpa_out_proj(q_s, k_s, v_s, bias, wo, bo, residual, gamma, beta):
    """Scaled-dot-product attention over heads + output projection + residual
    + LayerNorm.  Per-head context is accumulated *through* Wo (static row
    slices) so no lane-axis concat of the contexts is needed.

    q_s:(Sq,HQ) k_s:(Sk,HQ) v_s:(Sk,HV) bias:(Sq,Sk) -> ((Sq,D), (Sq,H*Sk))
    """
    scale = 1.0 / math.sqrt(d_k)
    out = bo                      # (1, d_model), broadcasts over rows
    attn_parts = []
    for h in range(n_heads):      # static unroll over heads
        qh = q_s[:, h * d_k:(h + 1) * d_k]            # (Sq, d_k)
        kh = k_s[:, h * d_k:(h + 1) * d_k]            # (Sk, d_k)
        vh = v_s[:, h * d_v:(h + 1) * d_v]            # (Sk, d_v)

        scores = jnp.dot(qh, kh.T, preferred_element_type=jnp.float32) * scale + bias
        m = jnp.max(scores, axis=-1, keepdims=True)
        e = jnp.exp(scores - m)
        attn_h = e / jnp.sum(e, axis=-1, keepdims=True)   # (Sq, Sk)
        attn_parts.append(attn_h)

        ctx_h = jnp.dot(attn_h, vh, preferred_element_type=jnp.float32)     # (Sq, d_v)
        out = out + jnp.dot(ctx_h, wo[h * d_v:(h + 1) * d_v, :],
                            preferred_element_type=jnp.float32)             # (Sq, D)

    z = _layer_norm(out + residual, gamma, beta)
    attn_flat = jnp.concatenate(attn_parts, axis=-1)       # (Sq, n_heads*Sk), one store
    return z, attn_flat


def _ffn_block(x, w1, b1, w2, b2, gamma, beta):
    h = jnp.maximum(jnp.dot(x, w1, preferred_element_type=jnp.float32) + b1, 0.0)
    y = jnp.dot(h, w2, preferred_element_type=jnp.float32) + b2
    return _layer_norm(y + x, gamma, beta)


# ----------------------------------------------------------------------------
# Kernels (one grid step == one batch element)
# ----------------------------------------------------------------------------
def encoder_layer_kernel(x_ref, bias_ref,
                         wqkv_ref, bqkv_ref, wo_ref, bo_ref, g1_ref, be1_ref,
                         w1_ref, b1_ref, w2_ref, b2_ref, g2_ref, be2_ref,
                         out_ref, attn_ref):
    x = x_ref[0]                                            # (S, D)
    # fused Q|K|V projection: one (S,D)@(D,3*HQ) matmul
    qkv = jnp.dot(x, wqkv_ref[...], preferred_element_type=jnp.float32) + bqkv_ref[...]
    q_s = qkv[:, :HQ]
    k_s = qkv[:, HQ:2 * HQ]
    v_s = qkv[:, 2 * HQ:2 * HQ + HV]

    x, attn_flat = _sdpa_out_proj(q_s, k_s, v_s, bias_ref[0],
                                  wo_ref[...], bo_ref[...], x, g1_ref[...], be1_ref[...])
    out_ref[0] = _ffn_block(x, w1_ref[...], b1_ref[...], w2_ref[...], b2_ref[...],
                            g2_ref[...], be2_ref[...])
    attn_ref[0] = attn_flat


def decoder_layer_kernel(dec_ref, enc_ref, sbias_ref, ebias_ref,
                         sa_wqkv_ref, sa_bqkv_ref, sa_wo_ref, sa_bo_ref, sa_g_ref, sa_b_ref,
                         ea_wq_ref, ea_bq_ref, ea_wkv_ref, ea_bkv_ref,
                         ea_wo_ref, ea_bo_ref, ea_g_ref, ea_b_ref,
                         ff_w1_ref, ff_b1_ref, ff_w2_ref, ff_b2_ref, ff_g_ref, ff_b_ref,
                         out_ref, self_attn_ref, enc_attn_ref):
    x = dec_ref[0]                                          # (Sq, D)
    enc = enc_ref[0]                                        # (Sk, D)

    # --- masked self-attention (fused Q|K|V projection) ---
    qkv = jnp.dot(x, sa_wqkv_ref[...], preferred_element_type=jnp.float32) + sa_bqkv_ref[...]
    q_s = qkv[:, :HQ]
    k_s = qkv[:, HQ:2 * HQ]
    v_s = qkv[:, 2 * HQ:2 * HQ + HV]
    x, self_attn = _sdpa_out_proj(q_s, k_s, v_s, sbias_ref[0],
                                  sa_wo_ref[...], sa_bo_ref[...], x,
                                  sa_g_ref[...], sa_b_ref[...])

    # --- encoder-decoder attention (fused K|V projection of enc outputs) ---
    q_s = jnp.dot(x, ea_wq_ref[...], preferred_element_type=jnp.float32) + ea_bq_ref[...]
    kv = jnp.dot(enc, ea_wkv_ref[...], preferred_element_type=jnp.float32) + ea_bkv_ref[...]
    k_s = kv[:, :HQ]
    v_s = kv[:, HQ:HQ + HV]
    x, enc_attn = _sdpa_out_proj(q_s, k_s, v_s, ebias_ref[0],
                                 ea_wo_ref[...], ea_bo_ref[...], x,
                                 ea_g_ref[...], ea_b_ref[...])

    # --- position-wise FFN ---
    out_ref[0] = _ffn_block(x, ff_w1_ref[...], ff_b1_ref[...], ff_w2_ref[...], ff_b2_ref[...],
                            ff_g_ref[...], ff_b_ref[...])
    self_attn_ref[0] = self_attn
    enc_attn_ref[0] = enc_attn


def projection_kernel(x_ref, w_ref, out_ref):
    out_ref[0] = jnp.dot(x_ref[0], w_ref[...], preferred_element_type=jnp.float32)


# ----------------------------------------------------------------------------
# pallas_call wrappers
# ----------------------------------------------------------------------------
def _full_spec(shape):
    """Whole-array (no tiling) BlockSpec for weights/biases."""
    ndim = len(shape)
    return pl.BlockSpec(shape, lambda b, _n=ndim: (0,) * _n)


_PARALLEL = pltpu.CompilerParams(dimension_semantics=("parallel",))


def encoder_layer(x, bias, lp):
    """x:(B,S,D)  bias:(B,S,S) additive mask bias. Returns (out, attn(B,H,S,S))."""
    B, S, D = x.shape
    pa, pf = lp["attn"], lp["ffn"]
    wqkv = jnp.concatenate([pa["wq"], pa["wk"], pa["wv"]], axis=1)   # (D, 2*HQ+HV)
    bqkv = jnp.concatenate([pa["bq"], pa["bk"], pa["bv"]], axis=1)

    args = (x, bias,
            wqkv, bqkv, pa["wo"], pa["bo"], pa["gamma"], pa["beta"],
            pf["w1"], pf["b1"], pf["w2"], pf["b2"], pf["gamma"], pf["beta"])
    in_specs = [pl.BlockSpec((1, S, D), lambda b: (b, 0, 0)),
                pl.BlockSpec((1, S, S), lambda b: (b, 0, 0))] + \
               [_full_spec(a.shape) for a in args[2:]]
    out_shape = (jax.ShapeDtypeStruct((B, S, D), jnp.float32),
                 jax.ShapeDtypeStruct((B, S, n_heads * S), jnp.float32))
    out_specs = (pl.BlockSpec((1, S, D), lambda b: (b, 0, 0)),
                 pl.BlockSpec((1, S, n_heads * S), lambda b: (b, 0, 0)))

    out, attn_flat = pl.pallas_call(
        encoder_layer_kernel, out_shape=out_shape, grid=(B,),
        in_specs=in_specs, out_specs=out_specs,
        compiler_params=_PARALLEL,
    )(*args)
    attn = attn_flat.reshape(B, S, n_heads, S).transpose(0, 2, 1, 3)
    return out, attn


def decoder_layer(dec_x, enc_x, self_bias, enc_bias, lp):
    """Fused decoder layer.  Returns (out, self_attn, enc_attn)."""
    B, Lq, D = dec_x.shape
    Lk = enc_x.shape[1]
    psa, pea, pf = lp["self_attn"], lp["enc_attn"], lp["ffn"]
    sa_wqkv = jnp.concatenate([psa["wq"], psa["wk"], psa["wv"]], axis=1)
    sa_bqkv = jnp.concatenate([psa["bq"], psa["bk"], psa["bv"]], axis=1)
    ea_wkv = jnp.concatenate([pea["wk"], pea["wv"]], axis=1)
    ea_bkv = jnp.concatenate([pea["bk"], pea["bv"]], axis=1)

    args = (dec_x, enc_x, self_bias, enc_bias,
            sa_wqkv, sa_bqkv, psa["wo"], psa["bo"], psa["gamma"], psa["beta"],
            pea["wq"], pea["bq"], ea_wkv, ea_bkv,
            pea["wo"], pea["bo"], pea["gamma"], pea["beta"],
            pf["w1"], pf["b1"], pf["w2"], pf["b2"], pf["gamma"], pf["beta"])
    in_specs = [pl.BlockSpec((1, Lq, D), lambda b: (b, 0, 0)),
                pl.BlockSpec((1, Lk, D), lambda b: (b, 0, 0)),
                pl.BlockSpec((1, Lq, Lq), lambda b: (b, 0, 0)),
                pl.BlockSpec((1, Lq, Lk), lambda b: (b, 0, 0))] + \
               [_full_spec(a.shape) for a in args[4:]]
    out_shape = (jax.ShapeDtypeStruct((B, Lq, D), jnp.float32),
                 jax.ShapeDtypeStruct((B, Lq, n_heads * Lq), jnp.float32),
                 jax.ShapeDtypeStruct((B, Lq, n_heads * Lk), jnp.float32))
    out_specs = (pl.BlockSpec((1, Lq, D), lambda b: (b, 0, 0)),
                 pl.BlockSpec((1, Lq, n_heads * Lq), lambda b: (b, 0, 0)),
                 pl.BlockSpec((1, Lq, n_heads * Lk), lambda b: (b, 0, 0)))

    out, sattn_flat, eattn_flat = pl.pallas_call(
        decoder_layer_kernel, out_shape=out_shape, grid=(B,),
        in_specs=in_specs, out_specs=out_specs,
        compiler_params=_PARALLEL,
    )(*args)
    self_attn = sattn_flat.reshape(B, Lq, n_heads, Lq).transpose(0, 2, 1, 3)
    enc_attn = eattn_flat.reshape(B, Lq, n_heads, Lk).transpose(0, 2, 1, 3)
    return out, self_attn, enc_attn


def project(x, w):
    """Final logits projection (no bias), x:(B,S,D) @ w:(D,V)."""
    B, S, D = x.shape
    V = w.shape[1]
    return pl.pallas_call(
        projection_kernel,
        out_shape=jax.ShapeDtypeStruct((B, S, V), jnp.float32),
        grid=(B,),
        in_specs=[pl.BlockSpec((1, S, D), lambda b: (b, 0, 0)), _full_spec(w.shape)],
        out_specs=pl.BlockSpec((1, S, V), lambda b: (b, 0, 0)),
        compiler_params=_PARALLEL,
    )(x, w)


# ----------------------------------------------------------------------------
# Masks / positional encoding / full forward
# ----------------------------------------------------------------------------
def get_attn_pad_mask(seq_q, seq_k):
    B, Lq = seq_q.shape
    Lk = seq_k.shape[1]
    return jnp.broadcast_to((seq_k == 0)[:, None, :], (B, Lq, Lk))


def get_attn_subsequent_mask(seq):
    B, L = seq.shape
    causal = jnp.triu(jnp.ones((L, L), jnp.bool_), k=1)
    return jnp.broadcast_to(causal, (B, L, L))


def mask_to_bias(mask):
    return jnp.where(mask, jnp.float32(NEG_INF), jnp.float32(0.0))


def positional_encoding_table(max_len, dm):
    pos = jnp.arange(max_len, dtype=jnp.float32)[:, None]
    div = jnp.exp(jnp.arange(0, dm, 2, dtype=jnp.float32) * (-math.log(10000.0) / dm))
    pe = jnp.zeros((max_len, dm), jnp.float32)
    pe = pe.at[:, 0::2].set(jnp.sin(pos * div))
    pe = pe.at[:, 1::2].set(jnp.cos(pos * div))
    return pe


def transformer_forward(params, enc_inputs, dec_inputs):
    pe = params["pe"]
    enc_x = jnp.take(params["src_emb"], enc_inputs, axis=0) + pe[None, :enc_inputs.shape[1], :]
    dec_x = jnp.take(params["tgt_emb"], dec_inputs, axis=0) + pe[None, :dec_inputs.shape[1], :]

    enc_self_bias = mask_to_bias(get_attn_pad_mask(enc_inputs, enc_inputs))
    dec_self_bias = mask_to_bias(get_attn_pad_mask(dec_inputs, dec_inputs)
                                 | get_attn_subsequent_mask(dec_inputs))
    dec_enc_bias = mask_to_bias(get_attn_pad_mask(dec_inputs, enc_inputs))

    enc_self_attns = []
    for lp in params["enc_layers"]:
        enc_x, a = encoder_layer(enc_x, enc_self_bias, lp)
        enc_self_attns.append(a)

    dec_self_attns, dec_enc_attns = [], []
    x = dec_x
    for lp in params["dec_layers"]:
        x, a1, a2 = decoder_layer(x, enc_x, dec_self_bias, dec_enc_bias, lp)
        dec_self_attns.append(a1)
        dec_enc_attns.append(a2)

    logits = project(x, params["proj_w"])                 # (B, Ltgt, V)
    return (logits.reshape(-1, tgt_vocab_size),
            tuple(enc_self_attns), tuple(dec_self_attns), tuple(dec_enc_attns))


# ----------------------------------------------------------------------------
# Parameter init (deterministic, synthetic)
# ----------------------------------------------------------------------------
def init_mha_params(key):
    ks = jax.random.split(key, 8)
    s, sb = 0.05, 0.02
    return {
        "wq": s * jax.random.normal(ks[0], (d_model, HQ), jnp.float32),
        "bq": sb * jax.random.normal(ks[1], (1, HQ), jnp.float32),
        "wk": s * jax.random.normal(ks[2], (d_model, HQ), jnp.float32),
        "bk": sb * jax.random.normal(ks[3], (1, HQ), jnp.float32),
        "wv": s * jax.random.normal(ks[4], (d_model, HV), jnp.float32),
        "bv": sb * jax.random.normal(ks[5], (1, HV), jnp.float32),
        "wo": s * jax.random.normal(ks[6], (HV, d_model), jnp.float32),
        "bo": sb * jax.random.normal(ks[7], (1, d_model), jnp.float32),
        "gamma": jnp.ones((1, d_model), jnp.float32),
        "beta": jnp.zeros((1, d_model), jnp.float32),
    }


def init_ffn_params(key):
    ks = jax.random.split(key, 4)
    s, sb = 0.05, 0.02
    return {
        "w1": s * jax.random.normal(ks[0], (d_model, d_ff), jnp.float32),
        "b1": sb * jax.random.normal(ks[1], (1, d_ff), jnp.float32),
        "w2": s * jax.random.normal(ks[2], (d_ff, d_model), jnp.float32),
        "b2": sb * jax.random.normal(ks[3], (1, d_model), jnp.float32),
        "gamma": jnp.ones((1, d_model), jnp.float32),
        "beta": jnp.zeros((1, d_model), jnp.float32),
    }


def init_transformer_params(key, max_len=64):
    keys = jax.random.split(key, 3 + 2 * n_layers)
    params = {
        "src_emb": 0.3 * jax.random.normal(keys[0], (src_vocab_size, d_model), jnp.float32),
        "tgt_emb": 0.3 * jax.random.normal(keys[1], (tgt_vocab_size, d_model), jnp.float32),
        "proj_w": 0.05 * jax.random.normal(keys[2], (d_model, tgt_vocab_size), jnp.float32),
        "pe": positional_encoding_table(max_len, d_model),
        "enc_layers": [],
        "dec_layers": [],
    }
    idx = 3
    for _ in range(n_layers):
        k1, k2 = jax.random.split(keys[idx]); idx += 1
        params["enc_layers"].append({"attn": init_mha_params(k1), "ffn": init_ffn_params(k2)})
    for _ in range(n_layers):
        k1, k2, k3 = jax.random.split(keys[idx], 3); idx += 1
        params["dec_layers"].append({"self_attn": init_mha_params(k1),
                                     "enc_attn": init_mha_params(k2),
                                     "ffn": init_ffn_params(k3)})
    return params


# ----------------------------------------------------------------------------
# Pure-JAX reference (mirrors the PyTorch module) for correctness check
# ----------------------------------------------------------------------------
def _ln_ref(x, gamma, beta):
    mean = jnp.mean(x, axis=-1, keepdims=True)
    var = jnp.mean((x - mean) ** 2, axis=-1, keepdims=True)
    return (x - mean) * jax.lax.rsqrt(var + LN_EPS) * gamma + beta


def mha_ref(Q, K, V, mask, p):
    B, Lq, _ = Q.shape
    Lk = K.shape[1]
    q_s = (Q @ p["wq"] + p["bq"]).reshape(B, Lq, n_heads, d_k).transpose(0, 2, 1, 3)
    k_s = (K @ p["wk"] + p["bk"]).reshape(B, Lk, n_heads, d_k).transpose(0, 2, 1, 3)
    v_s = (V @ p["wv"] + p["bv"]).reshape(B, Lk, n_heads, d_v).transpose(0, 2, 1, 3)
    scores = jnp.einsum("bhqd,bhkd->bhqk", q_s, k_s) / math.sqrt(d_k)
    scores = jnp.where(mask[:, None, :, :], NEG_INF, scores)
    attn = jax.nn.softmax(scores, axis=-1)
    ctx = jnp.einsum("bhqk,bhkd->bhqd", attn, v_s).transpose(0, 2, 1, 3).reshape(B, Lq, HV)
    out = ctx @ p["wo"] + p["bo"]
    return _ln_ref(out + Q, p["gamma"], p["beta"]), attn


def ffn_ref(x, p):
    h = jnp.maximum(x @ p["w1"] + p["b1"], 0.0)
    y = h @ p["w2"] + p["b2"]
    return _ln_ref(y + x, p["gamma"], p["beta"])


def transformer_ref(params, enc_inputs, dec_inputs):
    pe = params["pe"]
    enc_x = jnp.take(params["src_emb"], enc_inputs, axis=0) + pe[None, :enc_inputs.shape[1], :]
    dec_x = jnp.take(params["tgt_emb"], dec_inputs, axis=0) + pe[None, :dec_inputs.shape[1], :]
    enc_self_mask = get_attn_pad_mask(enc_inputs, enc_inputs)
    dec_self_mask = get_attn_pad_mask(dec_inputs, dec_inputs) | get_attn_subsequent_mask(dec_inputs)
    dec_enc_mask = get_attn_pad_mask(dec_inputs, enc_inputs)

    e_attns = []
    for lp in params["enc_layers"]:
        enc_x, a = mha_ref(enc_x, enc_x, enc_x, enc_self_mask, lp["attn"])
        enc_x = ffn_ref(enc_x, lp["ffn"])
        e_attns.append(a)

    ds_attns, de_attns = [], []
    x = dec_x
    for lp in params["dec_layers"]:
        x, a1 = mha_ref(x, x, x, dec_self_mask, lp["self_attn"])
        x, a2 = mha_ref(x, enc_x, enc_x, dec_enc_mask, lp["enc_attn"])
        x = ffn_ref(x, lp["ffn"])
        ds_attns.append(a1)
        de_attns.append(a2)

    logits = x @ params["proj_w"]
    return (logits.reshape(-1, tgt_vocab_size),
            tuple(e_attns), tuple(ds_attns), tuple(de_attns))


# ----------------------------------------------------------------------------
if __name__ == "__main__":
    key = jax.random.PRNGKey(0)
    params = init_transformer_params(key)

    # deterministic token ids, 0 == PAD (trailing padding so no row is fully masked)
    enc_inputs = jnp.array([[1, 2, 3, 4, 5, 6, 0, 0],
                            [4, 3, 2, 1, 7, 0, 0, 0]], dtype=jnp.int32)
    dec_inputs = jnp.array([[1, 5, 6, 7, 2, 3, 0, 0],
                            [1, 2, 3, 4, 0, 0, 0, 0]], dtype=jnp.int32)

    fwd = jax.jit(transformer_forward)
    logits, e_attns, ds_attns, de_attns = fwd(params, enc_inputs, dec_inputs)
    jax.block_until_ready((logits, e_attns, ds_attns, de_attns))

    r_logits, r_e, r_ds, r_de = transformer_ref(params, enc_inputs, dec_inputs)

    def _check(a, b, tol=2e-3):
        assert a.shape == b.shape, (a.shape, b.shape)
        assert float(jnp.max(jnp.abs(a - b))) < tol

    _check(logits, r_logits)
    for a, b in zip(e_attns, r_e):
        _check(a, b)
    for a, b in zip(ds_attns, r_ds):
        _check(a, b)
    for a, b in zip(de_attns, r_de):
        _check(a, b)

    print("KERNEL_OK")
</pallas_src>

<mosaic_0001>
module attributes {stable_mosaic.version = 11 : i64} {
  func.func @encoder_layer_kernel(%arg0: i32, %arg1: memref<1x8x32xf32, #tpu.memory_space<vmem>>, %arg2: memref<1x8x8xf32, #tpu.memory_space<vmem>>, %arg3: memref<32x96xf32, #tpu.memory_space<vmem>>, %arg4: memref<1x96xf32, #tpu.memory_space<vmem>>, %arg5: memref<32x32xf32, #tpu.memory_space<vmem>>, %arg6: memref<1x32xf32, #tpu.memory_space<vmem>>, %arg7: memref<1x32xf32, #tpu.memory_space<vmem>>, %arg8: memref<1x32xf32, #tpu.memory_space<vmem>>, %arg9: memref<32x64xf32, #tpu.memory_space<vmem>>, %arg10: memref<1x64xf32, #tpu.memory_space<vmem>>, %arg11: memref<64x32xf32, #tpu.memory_space<vmem>>, %arg12: memref<1x32xf32, #tpu.memory_space<vmem>>, %arg13: memref<1x32xf32, #tpu.memory_space<vmem>>, %arg14: memref<1x32xf32, #tpu.memory_space<vmem>>, %arg15: memref<1x8x32xf32, #tpu.memory_space<vmem>>, %arg16: memref<1x8x32xf32, #tpu.memory_space<vmem>>) attributes {dimension_semantics = [#tpu.dimension_semantics<parallel>], iteration_bounds = array<i64: 2>, scalar_prefetch = 0 : i64, scratch_operands = 0 : i64, tpu.core_type = #tpu.core_type<tc>, window_params = [{transform_indices = @transform_0, window_bounds = array<i64: 1, 8, 32>}, {transform_indices = @transform_1, window_bounds = array<i64: 1, 8, 8>}, {pipeline_mode = #tpu.pipeline_mode<synchronous>, transform_indices = @transform_2, window_bounds = array<i64: 32, 96>}, {pipeline_mode = #tpu.pipeline_mode<synchronous>, transform_indices = @transform_3, window_bounds = array<i64: 1, 96>}, {pipeline_mode = #tpu.pipeline_mode<synchronous>, transform_indices = @transform_4, window_bounds = array<i64: 32, 32>}, {pipeline_mode = #tpu.pipeline_mode<synchronous>, transform_indices = @transform_5, window_bounds = array<i64: 1, 32>}, {pipeline_mode = #tpu.pipeline_mode<synchronous>, transform_indices = @transform_6, window_bounds = array<i64: 1, 32>}, {pipeline_mode = #tpu.pipeline_mode<synchronous>, transform_indices = @transform_7, window_bounds = array<i64: 1, 32>}, {pipeline_mode = #tpu.pipeline_mode<synchronous>, transform_indices = @transform_8, window_bounds = array<i64: 32, 64>}, {pipeline_mode = #tpu.pipeline_mode<synchronous>, transform_indices = @transform_9, window_bounds = array<i64: 1, 64>}, {pipeline_mode = #tpu.pipeline_mode<synchronous>, transform_indices = @transform_10, window_bounds = array<i64: 64, 32>}, {pipeline_mode = #tpu.pipeline_mode<synchronous>, transform_indices = @transform_11, window_bounds = array<i64: 1, 32>}, {pipeline_mode = #tpu.pipeline_mode<synchronous>, transform_indices = @transform_12, window_bounds = array<i64: 1, 32>}, {pipeline_mode = #tpu.pipeline_mode<synchronous>, transform_indices = @transform_13, window_bounds = array<i64: 1, 32>}, {transform_indices = @transform_14, window_bounds = array<i64: 1, 8, 32>}, {transform_indices = @transform_15, window_bounds = array<i64: 1, 8, 32>}]} {
    %c0 = arith.constant 0 : index
    %c0_0 = arith.constant 0 : index
    %c0_1 = arith.constant 0 : index
    %0 = vector.load %arg1[%c0, %c0_0, %c0_1] : memref<1x8x32xf32, #tpu.memory_space<vmem>>, vector<1x8x32xf32>
    %1 = vector.shape_cast %0 : vector<1x8x32xf32> to vector<8x32xf32>
    %c0_2 = arith.constant 0 : index
    %c0_3 = arith.constant 0 : index
    %2 = vector.load %arg3[%c0_2, %c0_3] : memref<32x96xf32, #tpu.memory_space<vmem>>, vector<32x96xf32>
    %cst = arith.constant dense<0.000000e+00> : vector<8x96xf32>
    %3 = tpu.matmul %1, %2, %cst {dimension_numbers = #tpu.dot_dimension_numbers<[1], [0], [0], [1], [0, 0, 1, 1], [], []>} : vector<8x32xf32>, vector<32x96xf32>, vector<8x96xf32> -> vector<8x96xf32>
    %c0_4 = arith.constant 0 : index
    %c0_5 = arith.constant 0 : index
    %4 = vector.load %arg4[%c0_4, %c0_5] : memref<1x96xf32, #tpu.memory_space<vmem>>, vector<1x96xf32>
    %5 = vector.broadcast %4 : vector<1x96xf32> to vector<8x96xf32>
    %6 = arith.addf %3, %5 : vector<8x96xf32>
    %7 = vector.extract_strided_slice %6 {offsets = [0, 0], sizes = [8, 32], strides = [1, 1]} : vector<8x96xf32> to vector<8x32xf32>
    %8 = vector.extract_strided_slice %6 {offsets = [0, 32], sizes = [8, 32], strides = [1, 1]} : vector<8x96xf32> to vector<8x32xf32>
    %9 = vector.extract_strided_slice %6 {offsets = [0, 64], sizes = [8, 32], strides = [1, 1]} : vector<8x96xf32> to vector<8x32xf32>
    %c0_6 = arith.constant 0 : index
    %c0_7 = arith.constant 0 : index
    %c0_8 = arith.constant 0 : index
    %10 = vector.load %arg2[%c0_6, %c0_7, %c0_8] : memref<1x8x8xf32, #tpu.memory_space<vmem>>, vector<1x8x8xf32>
    %11 = vector.shape_cast %10 : vector<1x8x8xf32> to vector<8x8xf32>
    %c0_9 = arith.constant 0 : index
    %c0_10 = arith.constant 0 : index
    %12 = vector.load %arg5[%c0_9, %c0_10] : memref<32x32xf32, #tpu.memory_space<vmem>>, vector<32x32xf32>
    %c0_11 = arith.constant 0 : index
    %c0_12 = arith.constant 0 : index
    %13 = vector.load %arg6[%c0_11, %c0_12] : memref<1x32xf32, #tpu.memory_space<vmem>>, vector<1x32xf32>
    %c0_13 = arith.constant 0 : index
    %c0_14 = arith.constant 0 : index
    %14 = vector.load %arg7[%c0_13, %c0_14] : memref<1x32xf32, #tpu.memory_space<vmem>>, vector<1x32xf32>
    %c0_15 = arith.constant 0 : index
    %c0_16 = arith.constant 0 : index
    %15 = vector.load %arg8[%c0_15, %c0_16] : memref<1x32xf32, #tpu.memory_space<vmem>>, vector<1x32xf32>
    %16 = vector.extract_strided_slice %7 {offsets = [0, 0], sizes = [8, 8], strides = [1, 1]} : vector<8x32xf32> to vector<8x8xf32>
    %17 = vector.extract_strided_slice %8 {offsets = [0, 0], sizes = [8, 8], strides = [1, 1]} : vector<8x32xf32> to vector<8x8xf32>
    %18 = vector.extract_strided_slice %9 {offsets = [0, 0], sizes = [8, 8], strides = [1, 1]} : vector<8x32xf32> to vector<8x8xf32>
    %19 = tpu.transpose %17, [1, 0] : vector<8x8xf32> -> vector<8x8xf32>
    %cst_17 = arith.constant dense<0.000000e+00> : vector<8x8xf32>
    %20 = tpu.matmul %16, %19, %cst_17 {dimension_numbers = #tpu.dot_dimension_numbers<[1], [0], [0], [1], [0, 0, 1, 1], [], []>} : vector<8x8xf32>, vector<8x8xf32>, vector<8x8xf32> -> vector<8x8xf32>
    %cst_18 = arith.constant 0.353553385 : f32
    %21 = vector.broadcast %cst_18 : f32 to vector<8x8xf32>
    %22 = arith.mulf %20, %21 : vector<8x8xf32>
    %23 = arith.addf %22, %11 : vector<8x8xf32>
    %cst_19 = arith.constant dense<0xFF800000> : vector<8xf32>
    %24 = vector.multi_reduction <maximumf>, %23, %cst_19 [1] : vector<8x8xf32> to vector<8xf32>
    %25 = vector.shape_cast %24 : vector<8xf32> to vector<8x1xf32>
    %26 = vector.broadcast %25 : vector<8x1xf32> to vector<8x8xf32>
    %27 = arith.subf %23, %26 : vector<8x8xf32>
    %28 = math.exp %27 : vector<8x8xf32>
    %cst_20 = arith.constant dense<0.000000e+00> : vector<8xf32>
    %29 = vector.multi_reduction <add>, %28, %cst_20 [1] : vector<8x8xf32> to vector<8xf32>
    %30 = vector.shape_cast %29 : vector<8xf32> to vector<8x1xf32>
    %31 = vector.broadcast %30 : vector<8x1xf32> to vector<8x8xf32>
    %32 = arith.divf %28, %31 : vector<8x8xf32>
    %cst_21 = arith.constant dense<0.000000e+00> : vector<8x8xf32>
    %33 = tpu.matmul %32, %18, %cst_21 {dimension_numbers = #tpu.dot_dimension_numbers<[1], [0], [0], [1], [0, 0, 1, 1], [], []>} : vector<8x8xf32>, vector<8x8xf32>, vector<8x8xf32> -> vector<8x8xf32>
    %34 = vector.extract_strided_slice %12 {offsets = [0, 0], sizes = [8, 32], strides = [1, 1]} : vector<32x32xf32> to vector<8x32xf32>
    %cst_22 = arith.constant dense<0.000000e+00> : vector<8x32xf32>
    %35 = tpu.matmul %33, %34, %cst_22 {dimension_numbers = #tpu.dot_dimension_numbers<[1], [0], [0], [1], [0, 0, 1, 1], [], []>} : vector<8x8xf32>, vector<8x32xf32>, vector<8x32xf32> -> vector<8x32xf32>
    %36 = vector.broadcast %13 : vector<1x32xf32> to vector<8x32xf32>
    %37 = arith.addf %36, %35 : vector<8x32xf32>
    %38 = vector.extract_strided_slice %7 {offsets = [0, 8], sizes = [8, 8], strides = [1, 1]} : vector<8x32xf32> to vector<8x8xf32>
    %39 = vector.extract_strided_slice %8 {offsets = [0, 8], sizes = [8, 8], strides = [1, 1]} : vector<8x32xf32> to vector<8x8xf32>
    %40 = vector.extract_strided_slice %9 {offsets = [0, 8], sizes = [8, 8], strides = [1, 1]} : vector<8x32xf32> to vector<8x8xf32>
    %41 = tpu.transpose %39, [1, 0] : vector<8x8xf32> -> vector<8x8xf32>
    %cst_23 = arith.constant dense<0.000000e+00> : vector<8x8xf32>
    %42 = tpu.matmul %38, %41, %cst_23 {dimension_numbers = #tpu.dot_dimension_numbers<[1], [0], [0], [1], [0, 0, 1, 1], [], []>} : vector<8x8xf32>, vector<8x8xf32>, vector<8x8xf32> -> vector<8x8xf32>
    %cst_24 = arith.constant 0.353553385 : f32
    %43 = vector.broadcast %cst_24 : f32 to vector<8x8xf32>
    %44 = arith.mulf %42, %43 : vector<8x8xf32>
    %45 = arith.addf %44, %11 : vector<8x8xf32>
    %cst_25 = arith.constant dense<0xFF800000> : vector<8xf32>
    %46 = vector.multi_reduction <maximumf>, %45, %cst_25 [1] : vector<8x8xf32> to vector<8xf32>
    %47 = vector.shape_cast %46 : vector<8xf32> to vector<8x1xf32>
    %48 = vector.broadcast %47 : vector<8x1xf32> to vector<8x8xf32>
    %49 = arith.subf %45, %48 : vector<8x8xf32>
    %50 = math.exp %49 : vector<8x8xf32>
    %cst_26 = arith.constant dense<0.000000e+00> : vector<8xf32>
    %51 = vector.multi_reduction <add>, %50, %cst_26 [1] : vector<8x8xf32> to vector<8xf32>
    %52 = vector.shape_cast %51 : vector<8xf32> to vector<8x1xf32>
    %53 = vector.broadcast %52 : vector<8x1xf32> to vector<8x8xf32>
    %54 = arith.divf %50, %53 : vector<8x8xf32>
    %cst_27 = arith.constant dense<0.000000e+00> : vector<8x8xf32>
    %55 = tpu.matmul %54, %40, %cst_27 {dimension_numbers = #tpu.dot_dimension_numbers<[1], [0], [0], [1], [0, 0, 1, 1], [], []>} : vector<8x8xf32>, vector<8x8xf32>, vector<8x8xf32> -> vector<8x8xf32>
    %56 = vector.extract_strided_slice %12 {offsets = [8, 0], sizes = [8, 32], strides = [1, 1]} : vector<32x32xf32> to vector<8x32xf32>
    %cst_28 = arith.constant dense<0.000000e+00> : vector<8x32xf32>
    %57 = tpu.matmul %55, %56, %cst_28 {dimension_numbers = #tpu.dot_dimension_numbers<[1], [0], [0], [1], [0, 0, 1, 1], [], []>} : vector<8x8xf32>, vector<8x32xf32>, vector<8x32xf32> -> vector<8x32xf32>
    %58 = arith.addf %37, %57 : vector<8x32xf32>
    %59 = vector.extract_strided_slice %7 {offsets = [0, 16], sizes = [8, 8], strides = [1, 1]} : vector<8x32xf32> to vector<8x8xf32>
    %60 = vector.extract_strided_slice %8 {offsets = [0, 16], sizes = [8, 8], strides = [1, 1]} : vector<8x32xf32> to vector<8x8xf32>
    %61 = vector.extract_strided_slice %9 {offsets = [0, 16], sizes = [8, 8], strides = [1, 1]} : vector<8x32xf32> to vector<8x8xf32>
    %62 = tpu.transpose %60, [1, 0] : vector<8x8xf32> -> vector<8x8xf32>
    %cst_29 = arith.constant dense<0.000000e+00> : vector<8x8xf32>
    %63 = tpu.matmul %59, %62, %cst_29 {dimension_numbers = #tpu.dot_dimension_numbers<[1], [0], [0], [1], [0, 0, 1, 1], [], []>} : vector<8x8xf32>, vector<8x8xf32>, vector<8x8xf32> -> vector<8x8xf32>
    %cst_30 = arith.constant 0.353553385 : f32
    %64 = vector.broadcast %cst_30 : f32 to vector<8x8xf32>
    %65 = arith.mulf %63, %64 : vector<8x8xf32>
    %66 = arith.addf %65, %11 : vector<8x8xf32>
    %cst_31 = arith.constant dense<0xFF800000> : vector<8xf32>
    %67 = vector.multi_reduction <maximumf>, %66, %cst_31 [1] : vector<8x8xf32> to vector<8xf32>
    %68 = vector.shape_cast %67 : vector<8xf32> to vector<8x1xf32>
    %69 = vector.broadcast %68 : vector<8x1xf32> to vector<8x8xf32>
    %70 = arith.subf %66, %69 : vector<8x8xf32>
    %71 = math.exp %70 : vector<8x8xf32>
    %cst_32 = arith.constant dense<0.000000e+00> : vector<8xf32>
    %72 = vector.multi_reduction <add>, %71, %cst_32 [1] : vector<8x8xf32> to vector<8xf32>
    %73 = vector.shape_cast %72 : vector<8xf32> to vector<8x1xf32>
    %74 = vector.broadcast %73 : vector<8x1xf32> to vector<8x8xf32>
    %75 = arith.divf %71, %74 : vector<8x8xf32>
    %cst_33 = arith.constant dense<0.000000e+00> : vector<8x8xf32>
    %76 = tpu.matmul %75, %61, %cst_33 {dimension_numbers = #tpu.dot_dimension_numbers<[1], [0], [0], [1], [0, 0, 1, 1], [], []>} : vector<8x8xf32>, vector<8x8xf32>, vector<8x8xf32> -> vector<8x8xf32>
    %77 = vector.extract_strided_slice %12 {offsets = [16, 0], sizes = [8, 32], strides = [1, 1]} : vector<32x32xf32> to vector<8x32xf32>
    %cst_34 = arith.constant dense<0.000000e+00> : vector<8x32xf32>
    %78 = tpu.matmul %76, %77, %cst_34 {dimension_numbers = #tpu.dot_dimension_numbers<[1], [0], [0], [1], [0, 0, 1, 1], [], []>} : vector<8x8xf32>, vector<8x32xf32>, vector<8x32xf32> -> vector<8x32xf32>
    %79 = arith.addf %58, %78 : vector<8x32xf32>
    %80 = vector.extract_strided_slice %7 {offsets = [0, 24], sizes = [8, 8], strides = [1, 1]} : vector<8x32xf32> to vector<8x8xf32>
    %81 = vector.extract_strided_slice %8 {offsets = [0, 24], sizes = [8, 8], strides = [1, 1]} : vector<8x32xf32> to vector<8x8xf32>
    %82 = vector.extract_strided_slice %9 {offsets = [0, 24], sizes = [8, 8], strides = [1, 1]} : vector<8x32xf32> to vector<8x8xf32>
    %83 = tpu.transpose %81, [1, 0] : vector<8x8xf32> -> vector<8x8xf32>
    %cst_35 = arith.constant dense<0.000000e+00> : vector<8x8xf32>
    %84 = tpu.matmul %80, %83, %cst_35 {dimension_numbers = #tpu.dot_dimension_numbers<[1], [0], [0], [1], [0, 0, 1, 1], [], []>} : vector<8x8xf32>, vector<8x8xf32>, vector<8x8xf32> -> vector<8x8xf32>
    %cst_36 = arith.constant 0.353553385 : f32
    %85 = vector.broadcast %cst_36 : f32 to vector<8x8xf32>
    %86 = arith.mulf %84, %85 : vector<8x8xf32>
    %87 = arith.addf %86, %11 : vector<8x8xf32>
    %cst_37 = arith.constant dense<0xFF800000> : vector<8xf32>
    %88 = vector.multi_reduction <maximumf>, %87, %cst_37 [1] : vector<8x8xf32> to vector<8xf32>
    %89 = vector.shape_cast %88 : vector<8xf32> to vector<8x1xf32>
    %90 = vector.broadcast %89 : vector<8x1xf32> to vector<8x8xf32>
    %91 = arith.subf %87, %90 : vector<8x8xf32>
    %92 = math.exp %91 : vector<8x8xf32>
    %cst_38 = arith.constant dense<0.000000e+00> : vector<8xf32>
    %93 = vector.multi_reduction <add>, %92, %cst_38 [1] : vector<8x8xf32> to vector<8xf32>
    %94 = vector.shape_cast %93 : vector<8xf32> to vector<8x1xf32>
    %95 = vector.broadcast %94 : vector<8x1xf32> to vector<8x8xf32>
    %96 = arith.divf %92, %95 : vector<8x8xf32>
    %cst_39 = arith.constant dense<0.000000e+00> : vector<8x8xf32>
    %97 = tpu.matmul %96, %82, %cst_39 {dimension_numbers = #tpu.dot_dimension_numbers<[1], [0], [0], [1], [0, 0, 1, 1], [], []>} : vector<8x8xf32>, vector<8x8xf32>, vector<8x8xf32> -> vector<8x8xf32>
    %98 = vector.extract_strided_slice %12 {offsets = [24, 0], sizes = [8, 32], strides = [1, 1]} : vector<32x32xf32> to vector<8x32xf32>
    %cst_40 = arith.constant dense<0.000000e+00> : vector<8x32xf32>
    %99 = tpu.matmul %97, %98, %cst_40 {dimension_numbers = #tpu.dot_dimension_numbers<[1], [0], [0], [1], [0, 0, 1, 1], [], []>} : vector<8x8xf32>, vector<8x32xf32>, vector<8x32xf32> -> vector<8x32xf32>
    %100 = arith.addf %79, %99 : vector<8x32xf32>
    %101 = arith.addf %100, %1 : vector<8x32xf32>
    %cst_41 = arith.constant dense<0.000000e+00> : vector<8xf32>
    %102 = vector.multi_reduction <add>, %101, %cst_41 [1] : vector<8x32xf32> to vector<8xf32>
    %103 = vector.shape_cast %102 : vector<8xf32> to vector<8x1xf32>
    %cst_42 = arith.constant 3.200000e+01 : f32
    %104 = vector.broadcast %cst_42 : f32 to vector<8x1xf32>
    %105 = arith.divf %103, %104 : vector<8x1xf32>
    %106 = vector.broadcast %105 : vector<8x1xf32> to vector<8x32xf32>
    %107 = arith.subf %101, %106 : vector<8x32xf32>
    %108 = arith.mulf %107, %107 : vector<8x32xf32>
    %cst_43 = arith.constant dense<0.000000e+00> : vector<8xf32>
    %109 = vector.multi_reduction <add>, %108, %cst_43 [1] : vector<8x32xf32> to vector<8xf32>
    %110 = vector.shape_cast %109 : vector<8xf32> to vector<8x1xf32>
    %cst_44 = arith.constant 3.200000e+01 : f32
    %111 = vector.broadcast %cst_44 : f32 to vector<8x1xf32>
    %112 = arith.divf %110, %111 : vector<8x1xf32>
    %113 = vector.broadcast %105 : vector<8x1xf32> to vector<8x32xf32>
    %114 = arith.subf %101, %113 : vector<8x32xf32>
    %cst_45 = arith.constant 9.99999974E-6 : f32
    %115 = vector.broadcast %cst_45 : f32 to vector<8x1xf32>
    %116 = arith.addf %112, %115 : vector<8x1xf32>
    %117 = math.rsqrt %116 : vector<8x1xf32>
    %118 = vector.broadcast %117 : vector<8x1xf32> to vector<8x32xf32>
    %119 = arith.mulf %114, %118 : vector<8x32xf32>
    %120 = vector.broadcast %14 : vector<1x32xf32> to vector<8x32xf32>
    %121 = arith.mulf %119, %120 : vector<8x32xf32>
    %122 = vector.broadcast %15 : vector<1x32xf32> to vector<8x32xf32>
    %123 = arith.addf %121, %122 : vector<8x32xf32>
    %124 = tpu.concatenate %32, %54, %75, %96 in 1 : vector<8x8xf32>, vector<8x8xf32>, vector<8x8xf32>, vector<8x8xf32> -> vector<8x32xf32>
    %c0_46 = arith.constant 0 : index
    %c0_47 = arith.constant 0 : index
    %125 = vector.load %arg9[%c0_46, %c0_47] : memref<32x64xf32, #tpu.memory_space<vmem>>, vector<32x64xf32>
    %c0_48 = arith.constant 0 : index
    %c0_49 = arith.constant 0 : index
    %126 = vector.load %arg10[%c0_48, %c0_49] : memref<1x64xf32, #tpu.memory_space<vmem>>, vector<1x64xf32>
    %c0_50 = arith.constant 0 : index
    %c0_51 = arith.constant 0 : index
    %127 = vector.load %arg11[%c0_50, %c0_51] : memref<64x32xf32, #tpu.memory_space<vmem>>, vector<64x32xf32>
    %c0_52 = arith.constant 0 : index
    %c0_53 = arith.constant 0 : index
    %128 = vector.load %arg12[%c0_52, %c0_53] : memref<1x32xf32, #tpu.memory_space<vmem>>, vector<1x32xf32>
    %c0_54 = arith.constant 0 : index
    %c0_55 = arith.constant 0 : index
    %129 = vector.load %arg13[%c0_54, %c0_55] : memref<1x32xf32, #tpu.memory_space<vmem>>, vector<1x32xf32>
    %c0_56 = arith.constant 0 : index
    %c0_57 = arith.constant 0 : index
    %130 = vector.load %arg14[%c0_56, %c0_57] : memref<1x32xf32, #tpu.memory_space<vmem>>, vector<1x32xf32>
    %cst_58 = arith.constant dense<0.000000e+00> : vector<8x64xf32>
    %131 = tpu.matmul %123, %125, %cst_58 {dimension_numbers = #tpu.dot_dimension_numbers<[1], [0], [0], [1], [0, 0, 1, 1], [], []>} : vector<8x32xf32>, vector<32x64xf32>, vector<8x64xf32> -> vector<8x64xf32>
    %132 = vector.broadcast %126 : vector<1x64xf32> to vector<8x64xf32>
    %133 = arith.addf %131, %132 : vector<8x64xf32>
    %cst_59 = arith.constant 0.000000e+00 : f32
    %134 = vector.broadcast %cst_59 : f32 to vector<8x64xf32>
    %135 = arith.maximumf %133, %134 : vector<8x64xf32>
    %cst_60 = arith.constant dense<0.000000e+00> : vector<8x32xf32>
    %136 = tpu.matmul %135, %127, %cst_60 {dimension_numbers = #tpu.dot_dimension_numbers<[1], [0], [0], [1], [0, 0, 1, 1], [], []>} : vector<8x64xf32>, vector<64x32xf32>, vector<8x32xf32> -> vector<8x32xf32>
    %137 = vector.broadcast %128 : vector<1x32xf32> to vector<8x32xf32>
    %138 = arith.addf %136, %137 : vector<8x32xf32>
    %139 = arith.addf %138, %123 : vector<8x32xf32>
    %cst_61 = arith.constant dense<0.000000e+00> : vector<8xf32>
    %140 = vector.multi_reduction <add>, %139, %cst_61 [1] : vector<8x32xf32> to vector<8xf32>
    %141 = vector.shape_cast %140 : vector<8xf32> to vector<8x1xf32>
    %cst_62 = arith.constant 3.200000e+01 : f32
    %142 = vector.broadcast %cst_62 : f32 to vector<8x1xf32>
    %143 = arith.divf %141, %142 : vector<8x1xf32>
    %144 = vector.broadcast %143 : vector<8x1xf32> to vector<8x32xf32>
    %145 = arith.subf %139, %144 : vector<8x32xf32>
    %146 = arith.mulf %145, %145 : vector<8x32xf32>
    %cst_63 = arith.constant dense<0.000000e+00> : vector<8xf32>
    %147 = vector.multi_reduction <add>, %146, %cst_63 [1] : vector<8x32xf32> to vector<8xf32>
    %148 = vector.shape_cast %147 : vector<8xf32> to vector<8x1xf32>
    %cst_64 = arith.constant 3.200000e+01 : f32
    %149 = vector.broadcast %cst_64 : f32 to vector<8x1xf32>
    %150 = arith.divf %148, %149 : vector<8x1xf32>
    %151 = vector.broadcast %143 : vector<8x1xf32> to vector<8x32xf32>
    %152 = arith.subf %139, %151 : vector<8x32xf32>
    %cst_65 = arith.constant 9.99999974E-6 : f32
    %153 = vector.broadcast %cst_65 : f32 to vector<8x1xf32>
    %154 = arith.addf %150, %153 : vector<8x1xf32>
    %155 = math.rsqrt %154 : vector<8x1xf32>
    %156 = vector.broadcast %155 : vector<8x1xf32> to vector<8x32xf32>
    %157 = arith.mulf %152, %156 : vector<8x32xf32>
    %158 = vector.broadcast %129 : vector<1x32xf32> to vector<8x32xf32>
    %159 = arith.mulf %157, %158 : vector<8x32xf32>
    %160 = vector.broadcast %130 : vector<1x32xf32> to vector<8x32xf32>
    %161 = arith.addf %159, %160 : vector<8x32xf32>
    %c0_66 = arith.constant 0 : index
    %c0_67 = arith.constant 0 : index
    %c0_68 = arith.constant 0 : index
    %162 = vector.load %arg15[%c0_66, %c0_67, %c0_68] : memref<1x8x32xf32, #tpu.memory_space<vmem>>, vector<1x8x32xf32>
    %163 = vector.shape_cast %162 : vector<1x8x32xf32> to vector<8x32xf32>
    %164 = vector.shape_cast %161 : vector<8x32xf32> to vector<1x8x32xf32>
    tpu.vector_store %arg15[%c0_66, %c0_67, %c0_68], %164 {strides = array<i32>} : memref<1x8x32xf32, #tpu.memory_space<vmem>>, vector<1x8x32xf32>,
    %c0_69 = arith.constant 0 : index
    %c0_70 = arith.constant 0 : index
    %c0_71 = arith.constant 0 : index
    %165 = vector.load %arg16[%c0_69, %c0_70, %c0_71] : memref<1x8x32xf32, #tpu.memory_space<vmem>>, vector<1x8x32xf32>
    %166 = vector.shape_cast %165 : vector<1x8x32xf32> to vector<8x32xf32>
    %167 = vector.shape_cast %124 : vector<8x32xf32> to vector<1x8x32xf32>
    tpu.vector_store %arg16[%c0_69, %c0_70, %c0_71], %167 {strides = array<i32>} : memref<1x8x32xf32, #tpu.memory_space<vmem>>, vector<1x8x32xf32>,
    return
  }
  func.func @transform_0(%arg0: i32) -> (i32, i32, i32) {
    %c0_i32 = arith.constant 0 : i32
    %c0_i32_0 = arith.constant 0 : i32
    %c0_i32_1 = arith.constant 0 : i32
    return %arg0, %c0_i32, %c0_i32_0 : i32, i32, i32
  }
  func.func @transform_1(%arg0: i32) -> (i32, i32, i32) {
    %c0_i32 = arith.constant 0 : i32
    %c0_i32_0 = arith.constant 0 : i32
    %c0_i32_1 = arith.constant 0 : i32
    return %arg0, %c0_i32, %c0_i32_0 : i32, i32, i32
  }
  func.func @transform_2(%arg0: i32) -> (i32, i32) {
    %c0_i32 = arith.constant 0 : i32
    %c0_i32_0 = arith.constant 0 : i32
    %c0_i32_1 = arith.constant 0 : i32
    return %c0_i32, %c0_i32_0 : i32, i32
  }
  func.func @transform_3(%arg0: i32) -> (i32, i32) {
    %c0_i32 = arith.constant 0 : i32
    %c0_i32_0 = arith.constant 0 : i32
    %c0_i32_1 = arith.constant 0 : i32
    return %c0_i32, %c0_i32_0 : i32, i32
  }
  func.func @transform_4(%arg0: i32) -> (i32, i32) {
    %c0_i32 = arith.constant 0 : i32
    %c0_i32_0 = arith.constant 0 : i32
    %c0_i32_1 = arith.constant 0 : i32
    return %c0_i32, %c0_i32_0 : i32, i32
  }
  func.func @transform_5(%arg0: i32) -> (i32, i32) {
    %c0_i32 = arith.constant 0 : i32
    %c0_i32_0 = arith.constant 0 : i32
    %c0_i32_1 = arith.constant 0 : i32
    return %c0_i32, %c0_i32_0 : i32, i32
  }
  func.func @transform_6(%arg0: i32) -> (i32, i32) {
    %c0_i32 = arith.constant 0 : i32
    %c0_i32_0 = arith.constant 0 : i32
    %c0_i32_1 = arith.constant 0 : i32
    return %c0_i32, %c0_i32_0 : i32, i32
  }
  func.func @transform_7(%arg0: i32) -> (i32, i32) {
    %c0_i32 = arith.constant 0 : i32
    %c0_i32_0 = arith.constant 0 : i32
    %c0_i32_1 = arith.constant 0 : i32
    return %c0_i32, %c0_i32_0 : i32, i32
  }
  func.func @transform_8(%arg0: i32) -> (i32, i32) {
    %c0_i32 = arith.constant 0 : i32
    %c0_i32_0 = arith.constant 0 : i32
    %c0_i32_1 = arith.constant 0 : i32
    return %c0_i32, %c0_i32_0 : i32, i32
  }
  func.func @transform_9(%arg0: i32) -> (i32, i32) {
    %c0_i32 = arith.constant 0 : i32
    %c0_i32_0 = arith.constant 0 : i32
    %c0_i32_1 = arith.constant 0 : i32
    return %c0_i32, %c0_i32_0 : i32, i32
  }
  func.func @transform_10(%arg0: i32) -> (i32, i32) {
    %c0_i32 = arith.constant 0 : i32
    %c0_i32_0 = arith.constant 0 : i32
    %c0_i32_1 = arith.constant 0 : i32
    return %c0_i32, %c0_i32_0 : i32, i32
  }
  func.func @transform_11(%arg0: i32) -> (i32, i32) {
    %c0_i32 = arith.constant 0 : i32
    %c0_i32_0 = arith.constant 0 : i32
    %c0_i32_1 = arith.constant 0 : i32
    return %c0_i32, %c0_i32_0 : i32, i32
  }
  func.func @transform_12(%arg0: i32) -> (i32, i32) {
    %c0_i32 = arith.constant 0 : i32
    %c0_i32_0 = arith.constant 0 : i32
    %c0_i32_1 = arith.constant 0 : i32
    return %c0_i32, %c0_i32_0 : i32, i32
  }
  func.func @transform_13(%arg0: i32) -> (i32, i32) {
    %c0_i32 = arith.constant 0 : i32
    %c0_i32_0 = arith.constant 0 : i32
    %c0_i32_1 = arith.constant 0 : i32
    return %c0_i32, %c0_i32_0 : i32, i32
  }
  func.func @transform_14(%arg0: i32) -> (i32, i32, i32) {
    %c0_i32 = arith.constant 0 : i32
    %c0_i32_0 = arith.constant 0 : i32
    %c0_i32_1 = arith.constant 0 : i32
    return %arg0, %c0_i32, %c0_i32_0 : i32, i32, i32
  }
  func.func @transform_15(%arg0: i32) -> (i32, i32, i32) {
    %c0_i32 = arith.constant 0 : i32
    %c0_i32_0 = arith.constant 0 : i32
    %c0_i32_1 = arith.constant 0 : i32
    return %arg0, %c0_i32, %c0_i32_0 : i32, i32, i32
  }
}

module attributes {stable_mosaic.version = 11 : i64} {
  func.func @projection_kernel(%arg0: i32, %arg1: memref<1x8x32xf32, #tpu.memory_space<vmem>>, %arg2: memref<32x16xf32, #tpu.memory_space<vmem>>, %arg3: memref<1x8x16xf32, #tpu.memory_space<vmem>>) attributes {dimension_semantics = [#tpu.dimension_semantics<parallel>], iteration_bounds = array<i64: 2>, scalar_prefetch = 0 : i64, scratch_operands = 0 : i64, tpu.core_type = #tpu.core_type<tc>, window_params = [{transform_indices = @transform_0, window_bounds = array<i64: 1, 8, 32>}, {pipeline_mode = #tpu.pipeline_mode<synchronous>, transform_indices = @transform_1, window_bounds = array<i64: 32, 16>}, {transform_indices = @transform_2, window_bounds = array<i64: 1, 8, 16>}]} {
    %c0 = arith.constant 0 : index
    %c0_0 = arith.constant 0 : index
    %c0_1 = arith.constant 0 : index
    %0 = vector.load %arg1[%c0, %c0_0, %c0_1] : memref<1x8x32xf32, #tpu.memory_space<vmem>>, vector<1x8x32xf32>
    %1 = vector.shape_cast %0 : vector<1x8x32xf32> to vector<8x32xf32>
    %c0_2 = arith.constant 0 : index
    %c0_3 = arith.constant 0 : index
    %2 = vector.load %arg2[%c0_2, %c0_3] : memref<32x16xf32, #tpu.memory_space<vmem>>, vector<32x16xf32>
    %cst = arith.constant dense<0.000000e+00> : vector<8x16xf32>
    %3 = tpu.matmul %1, %2, %cst {dimension_numbers = #tpu.dot_dimension_numbers<[1], [0], [0], [1], [0, 0, 1, 1], [], []>} : vector<8x32xf32>, vector<32x16xf32>, vector<8x16xf32> -> vector<8x16xf32>
    %c0_4 = arith.constant 0 : index
    %c0_5 = arith.constant 0 : index
    %c0_6 = arith.constant 0 : index
    %4 = vector.load %arg3[%c0_4, %c0_5, %c0_6] : memref<1x8x16xf32, #tpu.memory_space<vmem>>, vector<1x8x16xf32>
    %5 = vector.shape_cast %4 : vector<1x8x16xf32> to vector<8x16xf32>
    %6 = vector.shape_cast %3 : vector<8x16xf32> to vector<1x8x16xf32>
    tpu.vector_store %arg3[%c0_4, %c0_5, %c0_6], %6 {strides = array<i32>} : memref<1x8x16xf32, #tpu.memory_space<vmem>>, vector<1x8x16xf32>,
    return
  }
  func.func @transform_0(%arg0: i32) -> (i32, i32, i32) {
    %c0_i32 = arith.constant 0 : i32
    %c0_i32_0 = arith.constant 0 : i32
    %c0_i32_1 = arith.constant 0 : i32
    return %arg0, %c0_i32, %c0_i32_0 : i32, i32, i32
  }
  func.func @transform_1(%arg0: i32) -> (i32, i32) {
    %c0_i32 = arith.constant 0 : i32
    %c0_i32_0 = arith.constant 0 : i32
    %c0_i32_1 = arith.constant 0 : i32
    return %c0_i32, %c0_i32_0 : i32, i32
  }
  func.func @transform_2(%arg0: i32) -> (i32, i32, i32) {
    %c0_i32 = arith.constant 0 : i32
    %c0_i32_0 = arith.constant 0 : i32
    %c0_i32_1 = arith.constant 0 : i32
    return %arg0, %c0_i32, %c0_i32_0 : i32, i32, i32
  }
}

module attributes {stable_mosaic.version = 11 : i64} {
  func.func @decoder_layer_kernel(%arg0: i32, %arg1: memref<1x8x32xf32, #tpu.memory_space<vmem>>, %arg2: memref<1x8x32xf32, #tpu.memory_space<vmem>>, %arg3: memref<1x8x8xf32, #tpu.memory_space<vmem>>, %arg4: memref<1x8x8xf32, #tpu.memory_space<vmem>>, %arg5: memref<32x96xf32, #tpu.memory_space<vmem>>, %arg6: memref<1x96xf32, #tpu.memory_space<vmem>>, %arg7: memref<32x32xf32, #tpu.memory_space<vmem>>, %arg8: memref<1x32xf32, #tpu.memory_space<vmem>>, %arg9: memref<1x32xf32, #tpu.memory_space<vmem>>, %arg10: memref<1x32xf32, #tpu.memory_space<vmem>>, %arg11: memref<32x32xf32, #tpu.memory_space<vmem>>, %arg12: memref<1x32xf32, #tpu.memory_space<vmem>>, %arg13: memref<32x64xf32, #tpu.memory_space<vmem>>, %arg14: memref<1x64xf32, #tpu.memory_space<vmem>>, %arg15: memref<32x32xf32, #tpu.memory_space<vmem>>, %arg16: memref<1x32xf32, #tpu.memory_space<vmem>>, %arg17: memref<1x32xf32, #tpu.memory_space<vmem>>, %arg18: memref<1x32xf32, #tpu.memory_space<vmem>>, %arg19: memref<32x64xf32, #tpu.memory_space<vmem>>, %arg20: memref<1x64xf32, #tpu.memory_space<vmem>>, %arg21: memref<64x32xf32, #tpu.memory_space<vmem>>, %arg22: memref<1x32xf32, #tpu.memory_space<vmem>>, %arg23: memref<1x32xf32, #tpu.memory_space<vmem>>, %arg24: memref<1x32xf32, #tpu.memory_space<vmem>>, %arg25: memref<1x8x32xf32, #tpu.memory_space<vmem>>, %arg26: memref<1x8x32xf32, #tpu.memory_space<vmem>>, %arg27: memref<1x8x32xf32, #tpu.memory_space<vmem>>) attributes {dimension_semantics = [#tpu.dimension_semantics<parallel>], iteration_bounds = array<i64: 2>, scalar_prefetch = 0 : i64, scratch_operands = 0 : i64, tpu.core_type = #tpu.core_type<tc>, window_params = [{transform_indices = @transform_0, window_bounds = array<i64: 1, 8, 32>}, {transform_indices = @transform_1, window_bounds = array<i64: 1, 8, 32>}, {transform_indices = @transform_2, window_bounds = array<i64: 1, 8, 8>}, {transform_indices = @transform_3, window_bounds = array<i64: 1, 8, 8>}, {pipeline_mode = #tpu.pipeline_mode<synchronous>, transform_indices = @transform_4, window_bounds = array<i64: 32, 96>}, {pipeline_mode = #tpu.pipeline_mode<synchronous>, transform_indices = @transform_5, window_bounds = array<i64: 1, 96>}, {pipeline_mode = #tpu.pipeline_mode<synchronous>, transform_indices = @transform_6, window_bounds = array<i64: 32, 32>}, {pipeline_mode = #tpu.pipeline_mode<synchronous>, transform_indices = @transform_7, window_bounds = array<i64: 1, 32>}, {pipeline_mode = #tpu.pipeline_mode<synchronous>, transform_indices = @transform_8, window_bounds = array<i64: 1, 32>}, {pipeline_mode = #tpu.pipeline_mode<synchronous>, transform_indices = @transform_9, window_bounds = array<i64: 1, 32>}, {pipeline_mode = #tpu.pipeline_mode<synchronous>, transform_indices = @transform_10, window_bounds = array<i64: 32, 32>}, {pipeline_mode = #tpu.pipeline_mode<synchronous>, transform_indices = @transform_11, window_bounds = array<i64: 1, 32>}, {pipeline_mode = #tpu.pipeline_mode<synchronous>, transform_indices = @transform_12, window_bounds = array<i64: 32, 64>}, {pipeline_mode = #tpu.pipeline_mode<synchronous>, transform_indices = @transform_13, window_bounds = array<i64: 1, 64>}, {pipeline_mode = #tpu.pipeline_mode<synchronous>, transform_indices = @transform_14, window_bounds = array<i64: 32, 32>}, {pipeline_mode = #tpu.pipeline_mode<synchronous>, transform_indices = @transform_15, window_bounds = array<i64: 1, 32>}, {pipeline_mode = #tpu.pipeline_mode<synchronous>, transform_indices = @transform_16, window_bounds = array<i64: 1, 32>}, {pipeline_mode = #tpu.pipeline_mode<synchronous>, transform_indices = @transform_17, window_bounds = array<i64: 1, 32>}, {pipeline_mode = #tpu.pipeline_mode<synchronous>, transform_indices = @transform_18, window_bounds = array<i64: 32, 64>}, {pipeline_mode = #tpu.pipeline_mode<synchronous>, transform_indices = @transform_19, window_bounds = array<i64: 1, 64>}, {pipeline_mode = #tpu.pipeline_mode<synchronous>, transform_indices = @transform_20, window_bounds = array<i64: 64, 32>}, {pipeline_mode = #tpu.pipeline_mode<synchronous>, transform_indices = @transform_21, window_bounds = array<i64: 1, 32>}, {pipeline_mode = #tpu.pipeline_mode<synchronous>, transform_indices = @transform_22, window_bounds = array<i64: 1, 32>}, {pipeline_mode = #tpu.pipeline_mode<synchronous>, transform_indices = @transform_23, window_bounds = array<i64: 1, 32>}, {transform_indices = @transform_24, window_bounds = array<i64: 1, 8, 32>}, {transform_indices = @transform_25, window_bounds = array<i64: 1, 8, 32>}, {transform_indices = @transform_26, window_bounds = array<i64: 1, 8, 32>}]} {
    %c0 = arith.constant 0 : index
    %c0_0 = arith.constant 0 : index
    %c0_1 = arith.constant 0 : index
    %0 = vector.load %arg1[%c0, %c0_0, %c0_1] : memref<1x8x32xf32, #tpu.memory_space<vmem>>, vector<1x8x32xf32>
    %1 = vector.shape_cast %0 : vector<1x8x32xf32> to vector<8x32xf32>
    %c0_2 = arith.constant 0 : index
    %c0_3 = arith.constant 0 : index
    %c0_4 = arith.constant 0 : index
    %2 = vector.load %arg2[%c0_2, %c0_3, %c0_4] : memref<1x8x32xf32, #tpu.memory_space<vmem>>, vector<1x8x32xf32>
    %3 = vector.shape_cast %2 : vector<1x8x32xf32> to vector<8x32xf32>
    %c0_5 = arith.constant 0 : index
    %c0_6 = arith.constant 0 : index
    %4 = vector.load %arg5[%c0_5, %c0_6] : memref<32x96xf32, #tpu.memory_space<vmem>>, vector<32x96xf32>
    %cst = arith.constant dense<0.000000e+00> : vector<8x96xf32>
    %5 = tpu.matmul %1, %4, %cst {dimension_numbers = #tpu.dot_dimension_numbers<[1], [0], [0], [1], [0, 0, 1, 1], [], []>} : vector<8x32xf32>, vector<32x96xf32>, vector<8x96xf32> -> vector<8x96xf32>
    %c0_7 = arith.constant 0 : index
    %c0_8 = arith.constant 0 : index
    %6 = vector.load %arg6[%c0_7, %c0_8] : memref<1x96xf32, #tpu.memory_space<vmem>>, vector<1x96xf32>
    %7 = vector.broadcast %6 : vector<1x96xf32> to vector<8x96xf32>
    %8 = arith.addf %5, %7 : vector<8x96xf32>
    %9 = vector.extract_strided_slice %8 {offsets = [0, 0], sizes = [8, 32], strides = [1, 1]} : vector<8x96xf32> to vector<8x32xf32>
    %10 = vector.extract_strided_slice %8 {offsets = [0, 32], sizes = [8, 32], strides = [1, 1]} : vector<8x96xf32> to vector<8x32xf32>
    %11 = vector.extract_strided_slice %8 {offsets = [0, 64], sizes = [8, 32], strides = [1, 1]} : vector<8x96xf32> to vector<8x32xf32>
    %c0_9 = arith.constant 0 : index
    %c0_10 = arith.constant 0 : index
    %c0_11 = arith.constant 0 : index
    %12 = vector.load %arg3[%c0_9, %c0_10, %c0_11] : memref<1x8x8xf32, #tpu.memory_space<vmem>>, vector<1x8x8xf32>
    %13 = vector.shape_cast %12 : vector<1x8x8xf32> to vector<8x8xf32>
    %c0_12 = arith.constant 0 : index
    %c0_13 = arith.constant 0 : index
    %14 = vector.load %arg7[%c0_12, %c0_13] : memref<32x32xf32, #tpu.memory_space<vmem>>, vector<32x32xf32>
    %c0_14 = arith.constant 0 : index
    %c0_15 = arith.constant 0 : index
    %15 = vector.load %arg8[%c0_14, %c0_15] : memref<1x32xf32, #tpu.memory_space<vmem>>, vector<1x32xf32>
    %c0_16 = arith.constant 0 : index
    %c0_17 = arith.constant 0 : index
    %16 = vector.load %arg9[%c0_16, %c0_17] : memref<1x32xf32, #tpu.memory_space<vmem>>, vector<1x32xf32>
    %c0_18 = arith.constant 0 : index
    %c0_19 = arith.constant 0 : index
    %17 = vector.load %arg10[%c0_18, %c0_19] : memref<1x32xf32, #tpu.memory_space<vmem>>, vector<1x32xf32>
    %18 = vector.extract_strided_slice %9 {offsets = [0, 0], sizes = [8, 8], strides = [1, 1]} : vector<8x32xf32> to vector<8x8xf32>
    %19 = vector.extract_strided_slice %10 {offsets = [0, 0], sizes = [8, 8], strides = [1, 1]} : vector<8x32xf32> to vector<8x8xf32>
    %20 = vector.extract_strided_slice %11 {offsets = [0, 0], sizes = [8, 8], strides = [1, 1]} : vector<8x32xf32> to vector<8x8xf32>
    %21 = tpu.transpose %19, [1, 0] : vector<8x8xf32> -> vector<8x8xf32>
    %cst_20 = arith.constant dense<0.000000e+00> : vector<8x8xf32>
    %22 = tpu.matmul %18, %21, %cst_20 {dimension_numbers = #tpu.dot_dimension_numbers<[1], [0], [0], [1], [0, 0, 1, 1], [], []>} : vector<8x8xf32>, vector<8x8xf32>, vector<8x8xf32> -> vector<8x8xf32>
    %cst_21 = arith.constant 0.353553385 : f32
    %23 = vector.broadcast %cst_21 : f32 to vector<8x8xf32>
    %24 = arith.mulf %22, %23 : vector<8x8xf32>
    %25 = arith.addf %24, %13 : vector<8x8xf32>
    %cst_22 = arith.constant dense<0xFF800000> : vector<8xf32>
    %26 = vector.multi_reduction <maximumf>, %25, %cst_22 [1] : vector<8x8xf32> to vector<8xf32>
    %27 = vector.shape_cast %26 : vector<8xf32> to vector<8x1xf32>
    %28 = vector.broadcast %27 : vector<8x1xf32> to vector<8x8xf32>
    %29 = arith.subf %25, %28 : vector<8x8xf32>
    %30 = math.exp %29 : vector<8x8xf32>
    %cst_23 = arith.constant dense<0.000000e+00> : vector<8xf32>
    %31 = vector.multi_reduction <add>, %30, %cst_23 [1] : vector<8x8xf32> to vector<8xf32>
    %32 = vector.shape_cast %31 : vector<8xf32> to vector<8x1xf32>
    %33 = vector.broadcast %32 : vector<8x1xf32> to vector<8x8xf32>
    %34 = arith.divf %30, %33 : vector<8x8xf32>
    %cst_24 = arith.constant dense<0.000000e+00> : vector<8x8xf32>
    %35 = tpu.matmul %34, %20, %cst_24 {dimension_numbers = #tpu.dot_dimension_numbers<[1], [0], [0], [1], [0, 0, 1, 1], [], []>} : vector<8x8xf32>, vector<8x8xf32>, vector<8x8xf32> -> vector<8x8xf32>
    %36 = vector.extract_strided_slice %14 {offsets = [0, 0], sizes = [8, 32], strides = [1, 1]} : vector<32x32xf32> to vector<8x32xf32>
    %cst_25 = arith.constant dense<0.000000e+00> : vector<8x32xf32>
    %37 = tpu.matmul %35, %36, %cst_25 {dimension_numbers = #tpu.dot_dimension_numbers<[1], [0], [0], [1], [0, 0, 1, 1], [], []>} : vector<8x8xf32>, vector<8x32xf32>, vector<8x32xf32> -> vector<8x32xf32>
    %38 = vector.broadcast %15 : vector<1x32xf32> to vector<8x32xf32>
    %39 = arith.addf %38, %37 : vector<8x32xf32>
    %40 = vector.extract_strided_slice %9 {offsets = [0, 8], sizes = [8, 8], strides = [1, 1]} : vector<8x32xf32> to vector<8x8xf32>
    %41 = vector.extract_strided_slice %10 {offsets = [0, 8], sizes = [8, 8], strides = [1, 1]} : vector<8x32xf32> to vector<8x8xf32>
    %42 = vector.extract_strided_slice %11 {offsets = [0, 8], sizes = [8, 8], strides = [1, 1]} : vector<8x32xf32> to vector<8x8xf32>
    %43 = tpu.transpose %41, [1, 0] : vector<8x8xf32> -> vector<8x8xf32>
    %cst_26 = arith.constant dense<0.000000e+00> : vector<8x8xf32>
    %44 = tpu.matmul %40, %43, %cst_26 {dimension_numbers = #tpu.dot_dimension_numbers<[1], [0], [0], [1], [0, 0, 1, 1], [], []>} : vector<8x8xf32>, vector<8x8xf32>, vector<8x8xf32> -> vector<8x8xf32>
    %cst_27 = arith.constant 0.353553385 : f32
    %45 = vector.broadcast %cst_27 : f32 to vector<8x8xf32>
    %46 = arith.mulf %44, %45 : vector<8x8xf32>
    %47 = arith.addf %46, %13 : vector<8x8xf32>
    %cst_28 = arith.constant dense<0xFF800000> : vector<8xf32>
    %48 = vector.multi_reduction <maximumf>, %47, %cst_28 [1] : vector<8x8xf32> to vector<8xf32>
    %49 = vector.shape_cast %48 : vector<8xf32> to vector<8x1xf32>
    %50 = vector.broadcast %49 : vector<8x1xf32> to vector<8x8xf32>
    %51 = arith.subf %47, %50 : vector<8x8xf32>
    %52 = math.exp %51 : vector<8x8xf32>
    %cst_29 = arith.constant dense<0.000000e+00> : vector<8xf32>
    %53 = vector.multi_reduction <add>, %52, %cst_29 [1] : vector<8x8xf32> to vector<8xf32>
    %54 = vector.shape_cast %53 : vector<8xf32> to vector<8x1xf32>
    %55 = vector.broadcast %54 : vector<8x1xf32> to vector<8x8xf32>
    %56 = arith.divf %52, %55 : vector<8x8xf32>
    %cst_30 = arith.constant dense<0.000000e+00> : vector<8x8xf32>
    %57 = tpu.matmul %56, %42, %cst_30 {dimension_numbers = #tpu.dot_dimension_numbers<[1], [0], [0], [1], [0, 0, 1, 1], [], []>} : vector<8x8xf32>, vector<8x8xf32>, vector<8x8xf32> -> vector<8x8xf32>
    %58 = vector.extract_strided_slice %14 {offsets = [8, 0], sizes = [8, 32], strides = [1, 1]} : vector<32x32xf32> to vector<8x32xf32>
    %cst_31 = arith.constant dense<0.000000e+00> : vector<8x32xf32>
    %59 = tpu.matmul %57, %58, %cst_31 {dimension_numbers = #tpu.dot_dimension_numbers<[1], [0], [0], [1], [0, 0, 1, 1], [], []>} : vector<8x8xf32>, vector<8x32xf32>, vector<8x32xf32> -> vector<8x32xf32>
    %60 = arith.addf %39, %59 : vector<8x32xf32>
    %61 = vector.extract_strided_slice %9 {offsets = [0, 16], sizes = [8, 8], strides = [1, 1]} : vector<8x32xf32> to vector<8x8xf32>
    %62 = vector.extract_strided_slice %10 {offsets = [0, 16], sizes = [8, 8], strides = [1, 1]} : vector<8x32xf32> to vector<8x8xf32>
    %63 = vector.extract_strided_slice %11 {offsets = [0, 16], sizes = [8, 8], strides = [1, 1]} : vector<8x32xf32> to vector<8x8xf32>
    %64 = tpu.transpose %62, [1, 0] : vector<8x8xf32> -> vector<8x8xf32>
    %cst_32 = arith.constant dense<0.000000e+00> : vector<8x8xf32>
    %65 = tpu.matmul %61, %64, %cst_32 {dimension_numbers = #tpu.dot_dimension_numbers<[1], [0], [0], [1], [0, 0, 1, 1], [], []>} : vector<8x8xf32>, vector<8x8xf32>, vector<8x8xf32> -> vector<8x8xf32>
    %cst_33 = arith.constant 0.353553385 : f32
    %66 = vector.broadcast %cst_33 : f32 to vector<8x8xf32>
    %67 = arith.mulf %65, %66 : vector<8x8xf32>
    %68 = arith.addf %67, %13 : vector<8x8xf32>
    %cst_34 = arith.constant dense<0xFF800000> : vector<8xf32>
    %69 = vector.multi_reduction <maximumf>, %68, %cst_34 [1] : vector<8x8xf32> to vector<8xf32>
    %70 = vector.shape_cast %69 : vector<8xf32> to vector<8x1xf32>
    %71 = vector.broadcast %70 : vector<8x1xf32> to vector<8x8xf32>
    %72 = arith.subf %68, %71 : vector<8x8xf32>
    %73 = math.exp %72 : vector<8x8xf32>
    %cst_35 = arith.constant dense<0.000000e+00> : vector<8xf32>
    %74 = vector.multi_reduction <add>, %73, %cst_35 [1] : vector<8x8xf32> to vector<8xf32>
    %75 = vector.shape_cast %74 : vector<8xf32> to vector<8x1xf32>
    %76 = vector.broadcast %75 : vector<8x1xf32> to vector<8x8xf32>
    %77 = arith.divf %73, %76 : vector<8x8xf32>
    %cst_36 = arith.constant dense<0.000000e+00> : vector<8x8xf32>
    %78 = tpu.matmul %77, %63, %cst_36 {dimension_numbers = #tpu.dot_dimension_numbers<[1], [0], [0], [1], [0, 0, 1, 1], [], []>} : vector<8x8xf32>, vector<8x8xf32>, vector<8x8xf32> -> vector<8x8xf32>
    %79 = vector.extract_strided_slice %14 {offsets = [16, 0], sizes = [8, 32], strides = [1, 1]} : vector<32x32xf32> to vector<8x32xf32>
    %cst_37 = arith.constant dense<0.000000e+00> : vector<8x32xf32>
    %80 = tpu.matmul %78, %79, %cst_37 {dimension_numbers = #tpu.dot_dimension_numbers<[1], [0], [0], [1], [0, 0, 1, 1], [], []>} : vector<8x8xf32>, vector<8x32xf32>, vector<8x32xf32> -> vector<8x32xf32>
    %81 = arith.addf %60, %80 : vector<8x32xf32>
    %82 = vector.extract_strided_slice %9 {offsets = [0, 24], sizes = [8, 8], strides = [1, 1]} : vector<8x32xf32> to vector<8x8xf32>
    %83 = vector.extract_strided_slice %10 {offsets = [0, 24], sizes = [8, 8], strides = [1, 1]} : vector<8x32xf32> to vector<8x8xf32>
    %84 = vector.extract_strided_slice %11 {offsets = [0, 24], sizes = [8, 8], strides = [1, 1]} : vector<8x32xf32> to vector<8x8xf32>
    %85 = tpu.transpose %83, [1, 0] : vector<8x8xf32> -> vector<8x8xf32>
    %cst_38 = arith.constant dense<0.000000e+00> : vector<8x8xf32>
    %86 = tpu.matmul %82, %85, %cst_38 {dimension_numbers = #tpu.dot_dimension_numbers<[1], [0], [0], [1], [0, 0, 1, 1], [], []>} : vector<8x8xf32>, vector<8x8xf32>, vector<8x8xf32> -> vector<8x8xf32>
    %cst_39 = arith.constant 0.353553385 : f32
    %87 = vector.broadcast %cst_39 : f32 to vector<8x8xf32>
    %88 = arith.mulf %86, %87 : vector<8x8xf32>
    %89 = arith.addf %88, %13 : vector<8x8xf32>
    %cst_40 = arith.constant dense<0xFF800000> : vector<8xf32>
    %90 = vector.multi_reduction <maximumf>, %89, %cst_40 [1] : vector<8x8xf32> to vector<8xf32>
    %91 = vector.shape_cast %90 : vector<8xf32> to vector<8x1xf32>
    %92 = vector.broadcast %91 : vector<8x1xf32> to vector<8x8xf32>
    %93 = arith.subf %89, %92 : vector<8x8xf32>
    %94 = math.exp %93 : vector<8x8xf32>
    %cst_41 = arith.constant dense<0.000000e+00> : vector<8xf32>
    %95 = vector.multi_reduction <add>, %94, %cst_41 [1] : vector<8x8xf32> to vector<8xf32>
    %96 = vector.shape_cast %95 : vector<8xf32> to vector<8x1xf32>
    %97 = vector.broadcast %96 : vector<8x1xf32> to vector<8x8xf32>
    %98 = arith.divf %94, %97 : vector<8x8xf32>
    %cst_42 = arith.constant dense<0.000000e+00> : vector<8x8xf32>
    %99 = tpu.matmul %98, %84, %cst_42 {dimension_numbers = #tpu.dot_dimension_numbers<[1], [0], [0], [1], [0, 0, 1, 1], [], []>} : vector<8x8xf32>, vector<8x8xf32>, vector<8x8xf32> -> vector<8x8xf32>
    %100 = vector.extract_strided_slice %14 {offsets = [24, 0], sizes = [8, 32], strides = [1, 1]} : vector<32x32xf32> to vector<8x32xf32>
    %cst_43 = arith.constant dense<0.000000e+00> : vector<8x32xf32>
    %101 = tpu.matmul %99, %100, %cst_43 {dimension_numbers = #tpu.dot_dimension_numbers<[1], [0], [0], [1], [0, 0, 1, 1], [], []>} : vector<8x8xf32>, vector<8x32xf32>, vector<8x32xf32> -> vector<8x32xf32>
    %102 = arith.addf %81, %101 : vector<8x32xf32>
    %103 = arith.addf %102, %1 : vector<8x32xf32>
    %cst_44 = arith.constant dense<0.000000e+00> : vector<8xf32>
    %104 = vector.multi_reduction <add>, %103, %cst_44 [1] : vector<8x32xf32> to vector<8xf32>
    %105 = vector.shape_cast %104 : vector<8xf32> to vector<8x1xf32>
    %cst_45 = arith.constant 3.200000e+01 : f32
    %106 = vector.broadcast %cst_45 : f32 to vector<8x1xf32>
    %107 = arith.divf %105, %106 : vector<8x1xf32>
    %108 = vector.broadcast %107 : vector<8x1xf32> to vector<8x32xf32>
    %109 = arith.subf %103, %108 : vector<8x32xf32>
    %110 = arith.mulf %109, %109 : vector<8x32xf32>
    %cst_46 = arith.constant dense<0.000000e+00> : vector<8xf32>
    %111 = vector.multi_reduction <add>, %110, %cst_46 [1] : vector<8x32xf32> to vector<8xf32>
    %112 = vector.shape_cast %111 : vector<8xf32> to vector<8x1xf32>
    %cst_47 = arith.constant 3.200000e+01 : f32
    %113 = vector.broadcast %cst_47 : f32 to vector<8x1xf32>
    %114 = arith.divf %112, %113 : vector<8x1xf32>
    %115 = vector.broadcast %107 : vector<8x1xf32> to vector<8x32xf32>
    %116 = arith.subf %103, %115 : vector<8x32xf32>
    %cst_48 = arith.constant 9.99999974E-6 : f32
    %117 = vector.broadcast %cst_48 : f32 to vector<8x1xf32>
    %118 = arith.addf %114, %117 : vector<8x1xf32>
    %119 = math.rsqrt %118 : vector<8x1xf32>
    %120 = vector.broadcast %119 : vector<8x1xf32> to vector<8x32xf32>
    %121 = arith.mulf %116, %120 : vector<8x32xf32>
    %122 = vector.broadcast %16 : vector<1x32xf32> to vector<8x32xf32>
    %123 = arith.mulf %121, %122 : vector<8x32xf32>
    %124 = vector.broadcast %17 : vector<1x32xf32> to vector<8x32xf32>
    %125 = arith.addf %123, %124 : vector<8x32xf32>
    %126 = tpu.concatenate %34, %56, %77, %98 in 1 : vector<8x8xf32>, vector<8x8xf32>, vector<8x8xf32>, vector<8x8xf32> -> vector<8x32xf32>
    %c0_49 = arith.constant 0 : index
    %c0_50 = arith.constant 0 : index
    %127 = vector.load %arg11[%c0_49, %c0_50] : memref<32x32xf32, #tpu.memory_space<vmem>>, vector<32x32xf32>
    %cst_51 = arith.constant dense<0.000000e+00> : vector<8x32xf32>
    %128 = tpu.matmul %125, %127, %cst_51 {dimension_numbers = #tpu.dot_dimension_numbers<[1], [0], [0], [1], [0, 0, 1, 1], [], []>} : vector<8x32xf32>, vector<32x32xf32>, vector<8x32xf32> -> vector<8x32xf32>
    %c0_52 = arith.constant 0 : index
    %c0_53 = arith.constant 0 : index
    %129 = vector.load %arg12[%c0_52, %c0_53] : memref<1x32xf32, #tpu.memory_space<vmem>>, vector<1x32xf32>
    %130 = vector.broadcast %129 : vector<1x32xf32> to vector<8x32xf32>
    %131 = arith.addf %128, %130 : vector<8x32xf32>
    %c0_54 = arith.constant 0 : index
    %c0_55 = arith.constant 0 : index
    %132 = vector.load %arg13[%c0_54, %c0_55] : memref<32x64xf32, #tpu.memory_space<vmem>>, vector<32x64xf32>
    %cst_56 = arith.constant dense<0.000000e+00> : vector<8x64xf32>
    %133 = tpu.matmul %3, %132, %cst_56 {dimension_numbers = #tpu.dot_dimension_numbers<[1], [0], [0], [1], [0, 0, 1, 1], [], []>} : vector<8x32xf32>, vector<32x64xf32>, vector<8x64xf32> -> vector<8x64xf32>
    %c0_57 = arith.constant 0 : index
    %c0_58 = arith.constant 0 : index
    %134 = vector.load %arg14[%c0_57, %c0_58] : memref<1x64xf32, #tpu.memory_space<vmem>>, vector<1x64xf32>
    %135 = vector.broadcast %134 : vector<1x64xf32> to vector<8x64xf32>
    %136 = arith.addf %133, %135 : vector<8x64xf32>
    %137 = vector.extract_strided_slice %136 {offsets = [0, 0], sizes = [8, 32], strides = [1, 1]} : vector<8x64xf32> to vector<8x32xf32>
    %138 = vector.extract_strided_slice %136 {offsets = [0, 32], sizes = [8, 32], strides = [1, 1]} : vector<8x64xf32> to vector<8x32xf32>
    %c0_59 = arith.constant 0 : index
    %c0_60 = arith.constant 0 : index
    %c0_61 = arith.constant 0 : index
    %139 = vector.load %arg4[%c0_59, %c0_60, %c0_61] : memref<1x8x8xf32, #tpu.memory_space<vmem>>, vector<1x8x8xf32>
    %140 = vector.shape_cast %139 : vector<1x8x8xf32> to vector<8x8xf32>
    %c0_62 = arith.constant 0 : index
    %c0_63 = arith.constant 0 : index
    %141 = vector.load %arg15[%c0_62, %c0_63] : memref<32x32xf32, #tpu.memory_space<vmem>>, vector<32x32xf32>
    %c0_64 = arith.constant 0 : index
    %c0_65 = arith.constant 0 : index
    %142 = vector.load %arg16[%c0_64, %c0_65] : memref<1x32xf32, #tpu.memory_space<vmem>>, vector<1x32xf32>
    %c0_66 = arith.constant 0 : index
    %c0_67 = arith.constant 0 : index
    %143 = vector.load %arg17[%c0_66, %c0_67] : memref<1x32xf32, #tpu.memory_space<vmem>>, vector<1x32xf32>
    %c0_68 = arith.constant 0 : index
    %c0_69 = arith.constant 0 : index
    %144 = vector.load %arg18[%c0_68, %c0_69] : memref<1x32xf32, #tpu.memory_space<vmem>>, vector<1x32xf32>
    %145 = vector.extract_strided_slice %131 {offsets = [0, 0], sizes = [8, 8], strides = [1, 1]} : vector<8x32xf32> to vector<8x8xf32>
    %146 = vector.extract_strided_slice %137 {offsets = [0, 0], sizes = [8, 8], strides = [1, 1]} : vector<8x32xf32> to vector<8x8xf32>
    %147 = vector.extract_strided_slice %138 {offsets = [0, 0], sizes = [8, 8], strides = [1, 1]} : vector<8x32xf32> to vector<8x8xf32>
    %148 = tpu.transpose %146, [1, 0] : vector<8x8xf32> -> vector<8x8xf32>
    %cst_70 = arith.constant dense<0.000000e+00> : vector<8x8xf32>
    %149 = tpu.matmul %145, %148, %cst_70 {dimension_numbers = #tpu.dot_dimension_numbers<[1], [0], [0], [1], [0, 0, 1, 1], [], []>} : vector<8x8xf32>, vector<8x8xf32>, vector<8x8xf32> -> vector<8x8xf32>
    %cst_71 = arith.constant 0.353553385 : f32
    %150 = vector.broadcast %cst_71 : f32 to vector<8x8xf32>
    %151 = arith.mulf %149, %150 : vector<8x8xf32>
    %152 = arith.addf %151, %140 : vector<8x8xf32>
    %cst_72 = arith.constant dense<0xFF800000> : vector<8xf32>
    %153 = vector.multi_reduction <maximumf>, %152, %cst_72 [1] : vector<8x8xf32> to vector<8xf32>
    %154 = vector.shape_cast %153 : vector<8xf32> to vector<8x1xf32>
    %155 = vector.broadcast %154 : vector<8x1xf32> to vector<8x8xf32>
    %156 = arith.subf %152, %155 : vector<8x8xf32>
    %157 = math.exp %156 : vector<8x8xf32>
    %cst_73 = arith.constant dense<0.000000e+00> : vector<8xf32>
    %158 = vector.multi_reduction <add>, %157, %cst_73 [1] : vector<8x8xf32> to vector<8xf32>
    %159 = vector.shape_cast %158 : vector<8xf32> to vector<8x1xf32>
    %160 = vector.broadcast %159 : vector<8x1xf32> to vector<8x8xf32>
    %161 = arith.divf %157, %160 : vector<8x8xf32>
    %cst_74 = arith.constant dense<0.000000e+00> : vector<8x8xf32>
    %162 = tpu.matmul %161, %147, %cst_74 {dimension_numbers = #tpu.dot_dimension_numbers<[1], [0], [0], [1], [0, 0, 1, 1], [], []>} : vector<8x8xf32>, vector<8x8xf32>, vector<8x8xf32> -> vector<8x8xf32>
    %163 = vector.extract_strided_slice %141 {offsets = [0, 0], sizes = [8, 32], strides = [1, 1]} : vector<32x32xf32> to vector<8x32xf32>
    %cst_75 = arith.constant dense<0.000000e+00> : vector<8x32xf32>
    %164 = tpu.matmul %162, %163, %cst_75 {dimension_numbers = #tpu.dot_dimension_numbers<[1], [0], [0], [1], [0, 0, 1, 1], [], []>} : vector<8x8xf32>, vector<8x32xf32>, vector<8x32xf32> -> vector<8x32xf32>
    %165 = vector.broadcast %142 : vector<1x32xf32> to vector<8x32xf32>
    %166 = arith.addf %165, %164 : vector<8x32xf32>
    %167 = vector.extract_strided_slice %131 {offsets = [0, 8], sizes = [8, 8], strides = [1, 1]} : vector<8x32xf32> to vector<8x8xf32>
    %168 = vector.extract_strided_slice %137 {offsets = [0, 8], sizes = [8, 8], strides = [1, 1]} : vector<8x32xf32> to vector<8x8xf32>
    %169 = vector.extract_strided_slice %138 {offsets = [0, 8], sizes = [8, 8], strides = [1, 1]} : vector<8x32xf32> to vector<8x8xf32>
    %170 = tpu.transpose %168, [1, 0] : vector<8x8xf32> -> vector<8x8xf32>
    %cst_76 = arith.constant dense<0.000000e+00> : vector<8x8xf32>
    %171 = tpu.matmul %167, %170, %cst_76 {dimension_numbers = #tpu.dot_dimension_numbers<[1], [0], [0], [1], [0, 0, 1, 1], [], []>} : vector<8x8xf32>, vector<8x8xf32>, vector<8x8xf32> -> vector<8x8xf32>
    %cst_77 = arith.constant 0.353553385 : f32
    %172 = vector.broadcast %cst_77 : f32 to vector<8x8xf32>
    %173 = arith.mulf %171, %172 : vector<8x8xf32>
    %174 = arith.addf %173, %140 : vector<8x8xf32>
    %cst_78 = arith.constant dense<0xFF800000> : vector<8xf32>
    %175 = vector.multi_reduction <maximumf>, %174, %cst_78 [1] : vector<8x8xf32> to vector<8xf32>
    %176 = vector.shape_cast %175 : vector<8xf32> to vector<8x1xf32>
    %177 = vector.broadcast %176 : vector<8x1xf32> to vector<8x8xf32>
    %178 = arith.subf %174, %177 : vector<8x8xf32>
    %179 = math.exp %178 : vector<8x8xf32>
    %cst_79 = arith.constant dense<0.000000e+00> : vector<8xf32>
    %180 = vector.multi_reduction <add>, %179, %cst_79 [1] : vector<8x8xf32> to vector<8xf32>
    %181 = vector.shape_cast %180 : vector<8xf32> to vector<8x1xf32>
    %182 = vector.broadcast %181 : vector<8x1xf32> to vector<8x8xf32>
    %183 = arith.divf %179, %182 : vector<8x8xf32>
    %cst_80 = arith.constant dense<0.000000e+00> : vector<8x8xf32>
    %184 = tpu.matmul %183, %169, %cst_80 {dimension_numbers = #tpu.dot_dimension_numbers<[1], [0], [0], [1], [0, 0, 1, 1], [], []>} : vector<8x8xf32>, vector<8x8xf32>, vector<8x8xf32> -> vector<8x8xf32>
    %185 = vector.extract_strided_slice %141 {offsets = [8, 0], sizes = [8, 32], strides = [1, 1]} : vector<32x32xf32> to vector<8x32xf32>
    %cst_81 = arith.constant dense<0.000000e+00> : vector<8x32xf32>
    %186 = tpu.matmul %184, %185, %cst_81 {dimension_numbers = #tpu.dot_dimension_numbers<[1], [0], [0], [1], [0, 0, 1, 1], [], []>} : vector<8x8xf32>, vector<8x32xf32>, vector<8x32xf32> -> vector<8x32xf32>
    %187 = arith.addf %166, %186 : vector<8x32xf32>
    %188 = vector.extract_strided_slice %131 {offsets = [0, 16], sizes = [8, 8], strides = [1, 1]} : vector<8x32xf32> to vector<8x8xf32>
    %189 = vector.extract_strided_slice %137 {offsets = [0, 16], sizes = [8, 8], strides = [1, 1]} : vector<8x32xf32> to vector<8x8xf32>
    %190 = vector.extract_strided_slice %138 {offsets = [0, 16], sizes = [8, 8], strides = [1, 1]} : vector<8x32xf32> to vector<8x8xf32>
    %191 = tpu.transpose %189, [1, 0] : vector<8x8xf32> -> vector<8x8xf32>
    %cst_82 = arith.constant dense<0.000000e+00> : vector<8x8xf32>
    %192 = tpu.matmul %188, %191, %cst_82 {dimension_numbers = #tpu.dot_dimension_numbers<[1], [0], [0], [1], [0, 0, 1, 1], [], []>} : vector<8x8xf32>, vector<8x8xf32>, vector<8x8xf32> -> vector<8x8xf32>
    %cst_83 = arith.constant 0.353553385 : f32
    %193 = vector.broadcast %cst_83 : f32 to vector<8x8xf32>
    %194 = arith.mulf %192, %193 : vector<8x8xf32>
    %195 = arith.addf %194, %140 : vector<8x8xf32>
    %cst_84 = arith.constant dense<0xFF800000> : vector<8xf32>
    %196 = vector.multi_reduction <maximumf>, %195, %cst_84 [1] : vector<8x8xf32> to vector<8xf32>
    %197 = vector.shape_cast %196 : vector<8xf32> to vector<8x1xf32>
    %198 = vector.broadcast %197 : vector<8x1xf32> to vector<8x8xf32>
    %199 = arith.subf %195, %198 : vector<8x8xf32>
    %200 = math.exp %199 : vector<8x8xf32>
    %cst_85 = arith.constant dense<0.000000e+00> : vector<8xf32>
    %201 = vector.multi_reduction <add>, %200, %cst_85 [1] : vector<8x8xf32> to vector<8xf32>
    %202 = vector.shape_cast %201 : vector<8xf32> to vector<8x1xf32>
    %203 = vector.broadcast %202 : vector<8x1xf32> to vector<8x8xf32>
    %204 = arith.divf %200, %203 : vector<8x8xf32>
    %cst_86 = arith.constant dense<0.000000e+00> : vector<8x8xf32>
    %205 = tpu.matmul %204, %190, %cst_86 {dimension_numbers = #tpu.dot_dimension_numbers<[1], [0], [0], [1], [0, 0, 1, 1], [], []>} : vector<8x8xf32>, vector<8x8xf32>, vector<8x8xf32> -> vector<8x8xf32>
    %206 = vector.extract_strided_slice %141 {offsets = [16, 0], sizes = [8, 32], strides = [1, 1]} : vector<32x32xf32> to vector<8x32xf32>
    %cst_87 = arith.constant dense<0.000000e+00> : vector<8x32xf32>
    %207 = tpu.matmul %205, %206, %cst_87 {dimension_numbers = #tpu.dot_dimension_numbers<[1], [0], [0], [1], [0, 0, 1, 1], [], []>} : vector<8x8xf32>, vector<8x32xf32>, vector<8x32xf32> -> vector<8x32xf32>
    %208 = arith.addf %187, %207 : vector<8x32xf32>
    %209 = vector.extract_strided_slice %131 {offsets = [0, 24], sizes = [8, 8], strides = [1, 1]} : vector<8x32xf32> to vector<8x8xf32>
    %210 = vector.extract_strided_slice %137 {offsets = [0, 24], sizes = [8, 8], strides = [1, 1]} : vector<8x32xf32> to vector<8x8xf32>
    %211 = vector.extract_strided_slice %138 {offsets = [0, 24], sizes = [8, 8], strides = [1, 1]} : vector<8x32xf32> to vector<8x8xf32>
    %212 = tpu.transpose %210, [1, 0] : vector<8x8xf32> -> vector<8x8xf32>
    %cst_88 = arith.constant dense<0.000000e+00> : vector<8x8xf32>
    %213 = tpu.matmul %209, %212, %cst_88 {dimension_numbers = #tpu.dot_dimension_numbers<[1], [0], [0], [1], [0, 0, 1, 1], [], []>} : vector<8x8xf32>, vector<8x8xf32>, vector<8x8xf32> -> vector<8x8xf32>
    %cst_89 = arith.constant 0.353553385 : f32
    %214 = vector.broadcast %cst_89 : f32 to vector<8x8xf32>
    %215 = arith.mulf %213, %214 : vector<8x8xf32>
    %216 = arith.addf %215, %140 : vector<8x8xf32>
    %cst_90 = arith.constant dense<0xFF800000> : vector<8xf32>
    %217 = vector.multi_reduction <maximumf>, %216, %cst_90 [1] : vector<8x8xf32> to vector<8xf32>
    %218 = vector.shape_cast %217 : vector<8xf32> to vector<8x1xf32>
    %219 = vector.broadcast %218 : vector<8x1xf32> to vector<8x8xf32>
    %220 = arith.subf %216, %219 : vector<8x8xf32>
    %221 = math.exp %220 : vector<8x8xf32>
    %cst_91 = arith.constant dense<0.000000e+00> : vector<8xf32>
    %222 = vector.multi_reduction <add>, %221, %cst_91 [1] : vector<8x8xf32> to vector<8xf32>
    %223 = vector.shape_cast %222 : vector<8xf32> to vector<8x1xf32>
    %224 = vector.broadcast %223 : vector<8x1xf32> to vector<8x8xf32>
    %225 = arith.divf %221, %224 : vector<8x8xf32>
    %cst_92 = arith.constant dense<0.000000e+00> : vector<8x8xf32>
    %226 = tpu.matmul %225, %211, %cst_92 {dimension_numbers = #tpu.dot_dimension_numbers<[1], [0], [0], [1], [0, 0, 1, 1], [], []>} : vector<8x8xf32>, vector<8x8xf32>, vector<8x8xf32> -> vector<8x8xf32>
    %227 = vector.extract_strided_slice %141 {offsets = [24, 0], sizes = [8, 32], strides = [1, 1]} : vector<32x32xf32> to vector<8x32xf32>
    %cst_93 = arith.constant dense<0.000000e+00> : vector<8x32xf32>
    %228 = tpu.matmul %226, %227, %cst_93 {dimension_numbers = #tpu.dot_dimension_numbers<[1], [0], [0], [1], [0, 0, 1, 1], [], []>} : vector<8x8xf32>, vector<8x32xf32>, vector<8x32xf32> -> vector<8x32xf32>
    %229 = arith.addf %208, %228 : vector<8x32xf32>
    %230 = arith.addf %229, %125 : vector<8x32xf32>
    %cst_94 = arith.constant dense<0.000000e+00> : vector<8xf32>
    %231 = vector.multi_reduction <add>, %230, %cst_94 [1] : vector<8x32xf32> to vector<8xf32>
    %232 = vector.shape_cast %231 : vector<8xf32> to vector<8x1xf32>
    %cst_95 = arith.constant 3.200000e+01 : f32
    %233 = vector.broadcast %cst_95 : f32 to vector<8x1xf32>
    %234 = arith.divf %232, %233 : vector<8x1xf32>
    %235 = vector.broadcast %234 : vector<8x1xf32> to vector<8x32xf32>
    %236 = arith.subf %230, %235 : vector<8x32xf32>
    %237 = arith.mulf %236, %236 : vector<8x32xf32>
    %cst_96 = arith.constant dense<0.000000e+00> : vector<8xf32>
    %238 = vector.multi_reduction <add>, %237, %cst_96 [1] : vector<8x32xf32> to vector<8xf32>
    %239 = vector.shape_cast %238 : vector<8xf32> to vector<8x1xf32>
    %cst_97 = arith.constant 3.200000e+01 : f32
    %240 = vector.broadcast %cst_97 : f32 to vector<8x1xf32>
    %241 = arith.divf %239, %240 : vector<8x1xf32>
    %242 = vector.broadcast %234 : vector<8x1xf32> to vector<8x32xf32>
    %243 = arith.subf %230, %242 : vector<8x32xf32>
    %cst_98 = arith.constant 9.99999974E-6 : f32
    %244 = vector.broadcast %cst_98 : f32 to vector<8x1xf32>
    %245 = arith.addf %241, %244 : vector<8x1xf32>
    %246 = math.rsqrt %245 : vector<8x1xf32>
    %247 = vector.broadcast %246 : vector<8x1xf32> to vector<8x32xf32>
    %248 = arith.mulf %243, %247 : vector<8x32xf32>
    %249 = vector.broadcast %143 : vector<1x32xf32> to vector<8x32xf32>
    %250 = arith.mulf %248, %249 : vector<8x32xf32>
    %251 = vector.broadcast %144 : vector<1x32xf32> to vector<8x32xf32>
    %252 = arith.addf %250, %251 : vector<8x32xf32>
    %253 = tpu.concatenate %161, %183, %204, %225 in 1 : vector<8x8xf32>, vector<8x8xf32>, vector<8x8xf32>, vector<8x8xf32> -> vector<8x32xf32>
    %c0_99 = arith.constant 0 : index
    %c0_100 = arith.constant 0 : index
    %254 = vector.load %arg19[%c0_99, %c0_100] : memref<32x64xf32, #tpu.memory_space<vmem>>, vector<32x64xf32>
    %c0_101 = arith.constant 0 : index
    %c0_102 = arith.constant 0 : index
    %255 = vector.load %arg20[%c0_101, %c0_102] : memref<1x64xf32, #tpu.memory_space<vmem>>, vector<1x64xf32>
    %c0_103 = arith.constant 0 : index
    %c0_104 = arith.constant 0 : index
    %256 = vector.load %arg21[%c0_103, %c0_104] : memref<64x32xf32, #tpu.memory_space<vmem>>, vector<64x32xf32>
    %c0_105 = arith.constant 0 : index
    %c0_106 = arith.constant 0 : index
    %257 = vector.load %arg22[%c0_105, %c0_106] : memref<1x32xf32, #tpu.memory_space<vmem>>, vector<1x32xf32>
    %c0_107 = arith.constant 0 : index
    %c0_108 = arith.constant 0 : index
    %258 = vector.load %arg23[%c0_107, %c0_108] : memref<1x32xf32, #tpu.memory_space<vmem>>, vector<1x32xf32>
    %c0_109 = arith.constant 0 : index
    %c0_110 = arith.constant 0 : index
    %259 = vector.load %arg24[%c0_109, %c0_110] : memref<1x32xf32, #tpu.memory_space<vmem>>, vector<1x32xf32>
    %cst_111 = arith.constant dense<0.000000e+00> : vector<8x64xf32>
    %260 = tpu.matmul %252, %254, %cst_111 {dimension_numbers = #tpu.dot_dimension_numbers<[1], [0], [0], [1], [0, 0, 1, 1], [], []>} : vector<8x32xf32>, vector<32x64xf32>, vector<8x64xf32> -> vector<8x64xf32>
    %261 = vector.broadcast %255 : vector<1x64xf32> to vector<8x64xf32>
    %262 = arith.addf %260, %261 : vector<8x64xf32>
    %cst_112 = arith.constant 0.000000e+00 : f32
    %263 = vector.broadcast %cst_112 : f32 to vector<8x64xf32>
    %264 = arith.maximumf %262, %263 : vector<8x64xf32>
    %cst_113 = arith.constant dense<0.000000e+00> : vector<8x32xf32>
    %265 = tpu.matmul %264, %256, %cst_113 {dimension_numbers = #tpu.dot_dimension_numbers<[1], [0], [0], [1], [0, 0, 1, 1], [], []>} : vector<8x64xf32>, vector<64x32xf32>, vector<8x32xf32> -> vector<8x32xf32>
    %266 = vector.broadcast %257 : vector<1x32xf32> to vector<8x32xf32>
    %267 = arith.addf %265, %266 : vector<8x32xf32>
    %268 = arith.addf %267, %252 : vector<8x32xf32>
    %cst_114 = arith.constant dense<0.000000e+00> : vector<8xf32>
    %269 = vector.multi_reduction <add>, %268, %cst_114 [1] : vector<8x32xf32> to vector<8xf32>
    %270 = vector.shape_cast %269 : vector<8xf32> to vector<8x1xf32>
    %cst_115 = arith.constant 3.200000e+01 : f32
    %271 = vector.broadcast %cst_115 : f32 to vector<8x1xf32>
    %272 = arith.divf %270, %271 : vector<8x1xf32>
    %273 = vector.broadcast %272 : vector<8x1xf32> to vector<8x32xf32>
    %274 = arith.subf %268, %273 : vector<8x32xf32>
    %275 = arith.mulf %274, %274 : vector<8x32xf32>
    %cst_116 = arith.constant dense<0.000000e+00> : vector<8xf32>
    %276 = vector.multi_reduction <add>, %275, %cst_116 [1] : vector<8x32xf32> to vector<8xf32>
    %277 = vector.shape_cast %276 : vector<8xf32> to vector<8x1xf32>
    %cst_117 = arith.constant 3.200000e+01 : f32
    %278 = vector.broadcast %cst_117 : f32 to vector<8x1xf32>
    %279 = arith.divf %277, %278 : vector<8x1xf32>
    %280 = vector.broadcast %272 : vector<8x1xf32> to vector<8x32xf32>
    %281 = arith.subf %268, %280 : vector<8x32xf32>
    %cst_118 = arith.constant 9.99999974E-6 : f32
    %282 = vector.broadcast %cst_118 : f32 to vector<8x1xf32>
    %283 = arith.addf %279, %282 : vector<8x1xf32>
    %284 = math.rsqrt %283 : vector<8x1xf32>
    %285 = vector.broadcast %284 : vector<8x1xf32> to vector<8x32xf32>
    %286 = arith.mulf %281, %285 : vector<8x32xf32>
    %287 = vector.broadcast %258 : vector<1x32xf32> to vector<8x32xf32>
    %288 = arith.mulf %286, %287 : vector<8x32xf32>
    %289 = vector.broadcast %259 : vector<1x32xf32> to vector<8x32xf32>
    %290 = arith.addf %288, %289 : vector<8x32xf32>
    %c0_119 = arith.constant 0 : index
    %c0_120 = arith.constant 0 : index
    %c0_121 = arith.constant 0 : index
    %291 = vector.load %arg25[%c0_119, %c0_120, %c0_121] : memref<1x8x32xf32, #tpu.memory_space<vmem>>, vector<1x8x32xf32>
    %292 = vector.shape_cast %291 : vector<1x8x32xf32> to vector<8x32xf32>
    %293 = vector.shape_cast %290 : vector<8x32xf32> to vector<1x8x32xf32>
    tpu.vector_store %arg25[%c0_119, %c0_120, %c0_121], %293 {strides = array<i32>} : memref<1x8x32xf32, #tpu.memory_space<vmem>>, vector<1x8x32xf32>,
    %c0_122 = arith.constant 0 : index
    %c0_123 = arith.constant 0 : index
    %c0_124 = arith.constant 0 : index
    %294 = vector.load %arg26[%c0_122, %c0_123, %c0_124] : memref<1x8x32xf32, #tpu.memory_space<vmem>>, vector<1x8x32xf32>
    %295 = vector.shape_cast %294 : vector<1x8x32xf32> to vector<8x32xf32>
    %296 = vector.shape_cast %126 : vector<8x32xf32> to vector<1x8x32xf32>
    tpu.vector_store %arg26[%c0_122, %c0_123, %c0_124], %296 {strides = array<i32>} : memref<1x8x32xf32, #tpu.memory_space<vmem>>, vector<1x8x32xf32>,
    %c0_125 = arith.constant 0 : index
    %c0_126 = arith.constant 0 : index
    %c0_127 = arith.constant 0 : index
    %297 = vector.load %arg27[%c0_125, %c0_126, %c0_127] : memref<1x8x32xf32, #tpu.memory_space<vmem>>, vector<1x8x32xf32>
    %298 = vector.shape_cast %297 : vector<1x8x32xf32> to vector<8x32xf32>
    %299 = vector.shape_cast %253 : vector<8x32xf32> to vector<1x8x32xf32>
    tpu.vector_store %arg27[%c0_125, %c0_126, %c0_127], %299 {strides = array<i32>} : memref<1x8x32xf32, #tpu.memory_space<vmem>>, vector<1x8x32xf32>,
    return
  }
  func.func @transform_0(%arg0: i32) -> (i32, i32, i32) {
    %c0_i32 = arith.constant 0 : i32
    %c0_i32_0 = arith.constant 0 : i32
    %c0_i32_1 = arith.constant 0 : i32
    return %arg0, %c0_i32, %c0_i32_0 : i32, i32, i32
  }
  func.func @transform_1(%arg0: i32) -> (i32, i32, i32) {
    %c0_i32 = arith.constant 0 : i32
    %c0_i32_0 = arith.constant 0 : i32
    %c0_i32_1 = arith.constant 0 : i32
    return %arg0, %c0_i32, %c0_i32_0 : i32, i32, i32
  }
  func.func @transform_2(%arg0: i32) -> (i32, i32, i32) {
    %c0_i32 = arith.constant 0 : i32
    %c0_i32_0 = arith.constant 0 : i32
    %c0_i32_1 = arith.constant 0 : i32
    return %arg0, %c0_i32, %c0_i32_0 : i32, i32, i32
  }
  func.func @transform_3(%arg0: i32) -> (i32, i32, i32) {
    %c0_i32 = arith.constant 0 : i32
    %c0_i32_0 = arith.constant 0 : i32
    %c0_i32_1 = arith.constant 0 : i32
    return %arg0, %c0_i32, %c0_i32_0 : i32, i32, i32
  }
  func.func @transform_4(%arg0: i32) -> (i32, i32) {
    %c0_i32 = arith.constant 0 : i32
    %c0_i32_0 = arith.constant 0 : i32
    %c0_i32_1 = arith.constant 0 : i32
    return %c0_i32, %c0_i32_0 : i32, i32
  }
  func.func @transform_5(%arg0: i32) -> (i32, i32) {
    %c0_i32 = arith.constant 0 : i32
    %c0_i32_0 = arith.constant 0 : i32
    %c0_i32_1 = arith.constant 0 : i32
    return %c0_i32, %c0_i32_0 : i32, i32
  }
  func.func @transform_6(%arg0: i32) -> (i32, i32) {
    %c0_i32 = arith.constant 0 : i32
    %c0_i32_0 = arith.constant 0 : i32
    %c0_i32_1 = arith.constant 0 : i32
    return %c0_i32, %c0_i32_0 : i32, i32
  }
  func.func @transform_7(%arg0: i32) -> (i32, i32) {
    %c0_i32 = arith.constant 0 : i32
    %c0_i32_0 = arith.constant 0 : i32
    %c0_i32_1 = arith.constant 0 : i32
    return %c0_i32, %c0_i32_0 : i32, i32
  }
  func.func @transform_8(%arg0: i32) -> (i32, i32) {
    %c0_i32 = arith.constant 0 : i32
    %c0_i32_0 = arith.constant 0 : i32
    %c0_i32_1 = arith.constant 0 : i32
    return %c0_i32, %c0_i32_0 : i32, i32
  }
  func.func @transform_9(%arg0: i32) -> (i32, i32) {
    %c0_i32 = arith.constant 0 : i32
    %c0_i32_0 = arith.constant 0 : i32
    %c0_i32_1 = arith.constant 0 : i32
    return %c0_i32, %c0_i32_0 : i32, i32
  }
  func.func @transform_10(%arg0: i32) -> (i32, i32) {
    %c0_i32 = arith.constant 0 : i32
    %c0_i32_0 = arith.constant 0 : i32
    %c0_i32_1 = arith.constant 0 : i32
    return %c0_i32, %c0_i32_0 : i32, i32
  }
  func.func @transform_11(%arg0: i32) -> (i32, i32) {
    %c0_i32 = arith.constant 0 : i32
    %c0_i32_0 = arith.constant 0 : i32
    %c0_i32_1 = arith.constant 0 : i32
    return %c0_i32, %c0_i32_0 : i32, i32
  }
  func.func @transform_12(%arg0: i32) -> (i32, i32) {
    %c0_i32 = arith.constant 0 : i32
    %c0_i32_0 = arith.constant 0 : i32
    %c0_i32_1 = arith.constant 0 : i32
    return %c0_i32, %c0_i32_0 : i32, i32
  }
  func.func @transform_13(%arg0: i32) -> (i32, i32) {
    %c0_i32 = arith.constant 0 : i32
    %c0_i32_0 = arith.constant 0 : i32
    %c0_i32_1 = arith.constant 0 : i32
    return %c0_i32, %c0_i32_0 : i32, i32
  }
  func.func @transform_14(%arg0: i32) -> (i32, i32) {
    %c0_i32 = arith.constant 0 : i32
    %c0_i32_0 = arith.constant 0 : i32
    %c0_i32_1 = arith.constant 0 : i32
    return %c0_i32, %c0_i32_0 : i32, i32
  }
  func.func @transform_15(%arg0: i32) -> (i32, i32) {
    %c0_i32 = arith.constant 0 : i32
    %c0_i32_0 = arith.constant 0 : i32
    %c0_i32_1 = arith.constant 0 : i32
    return %c0_i32, %c0_i32_0 : i32, i32
  }
  func.func @transform_16(%arg0: i32) -> (i32, i32) {
    %c0_i32 = arith.constant 0 : i32
    %c0_i32_0 = arith.constant 0 : i32
    %c0_i32_1 = arith.constant 0 : i32
    return %c0_i32, %c0_i32_0 : i32, i32
  }
  func.func @transform_17(%arg0: i32) -> (i32, i32) {
    %c0_i32 = arith.constant 0 : i32
    %c0_i32_0 = arith.constant 0 : i32
    %c0_i32_1 = arith.constant 0 : i32
    return %c0_i32, %c0_i32_0 : i32, i32
  }
  func.func @transform_18(%arg0: i32) -> (i32, i32) {
    %c0_i32 = arith.constant 0 : i32
    %c0_i32_0 = arith.constant 0 : i32
    %c0_i32_1 = arith.constant 0 : i32
    return %c0_i32, %c0_i32_0 : i32, i32
  }
  func.func @transform_19(%arg0: i32) -> (i32, i32) {
    %c0_i32 = arith.constant 0 : i32
    %c0_i32_0 = arith.constant 0 : i32
    %c0_i32_1 = arith.constant 0 : i32
    return %c0_i32, %c0_i32_0 : i32, i32
  }
  func.func @transform_20(%arg0: i32) -> (i32, i32) {
    %c0_i32 = arith.constant 0 : i32
    %c0_i32_0 = arith.constant 0 : i32
    %c0_i32_1 = arith.constant 0 : i32
    return %c0_i32, %c0_i32_0 : i32, i32
  }
  func.func @transform_21(%arg0: i32) -> (i32, i32) {
    %c0_i32 = arith.constant 0 : i32
    %c0_i32_0 = arith.constant 0 : i32
    %c0_i32_1 = arith.constant 0 : i32
    return %c0_i32, %c0_i32_0 : i32, i32
  }
  func.func @transform_22(%arg0: i32) -> (i32, i32) {
    %c0_i32 = arith.constant 0 : i32
    %c0_i32_0 = arith.constant 0 : i32
    %c0_i32_1 = arith.constant 0 : i32
    return %c0_i32, %c0_i32_0 : i32, i32
  }
  func.func @transform_23(%arg0: i32) -> (i32, i32) {
    %c0_i32 = arith.constant 0 : i32
    %c0_i32_0 = arith.constant 0 : i32
    %c0_i32_1 = arith.constant 0 : i32
    return %c0_i32, %c0_i32_0 : i32, i32
  }
  func.func @transform_24(%arg0: i32) -> (i32, i32, i32) {
    %c0_i32 = arith.constant 0 : i32
    %c0_i32_0 = arith.constant 0 : i32
    %c0_i32_1 = arith.constant 0 : i32
    return %arg0, %c0_i32, %c0_i32_0 : i32, i32, i32
  }
  func.func @transform_25(%arg0: i32) -> (i32, i32, i32) {
    %c0_i32 = arith.constant 0 : i32
    %c0_i32_0 = arith.constant 0 : i32
    %c0_i32_1 = arith.constant 0 : i32
    return %arg0, %c0_i32, %c0_i32_0 : i32, i32, i32
  }
  func.func @transform_26(%arg0: i32) -> (i32, i32, i32) {
    %c0_i32 = arith.constant 0 : i32
    %c0_i32_0 = arith.constant 0 : i32
    %c0_i32_1 = arith.constant 0 : i32
    return %arg0, %c0_i32, %c0_i32_0 : i32, i32, i32
  }
}

</mosaic_0001>

<bundles_post_ra>
// kernel: transformer_forward.9
= control target key start
LH: loop header
LB: loop body
LE: loop exit
PB: predicated region body
PF: predicated region fallthrough
CT: control target
= control target key end

     0   :  { %7 = vsyncpa [#allocation3], 0  ;;  %s552_s0 = inlined_call_operand.vmem [shape: f32[2,8,32], index: 0, kind: input, shape index: {}]   ;;  %s553_s1 = inlined_call_operand.vmem [shape: f32[32,16], index: 1, kind: input, shape index: {}]   ;;  %s554_s2 = inlined_call_operand.hbm [shape: f32[2,8,16], index: 2, kind: output, shape index: {}]  }
   0x1   :  { %9 = vsyncpa [#allocation3 + $0x1], 0  ;;  %s441_s9 = smov 0   ;;  %s443_s10 = smov 0  }
   0x2   :  { %s445_s11 = smov 0   ;;  %s447_s12 = smov 0  }
   0x3 LB: > { %s462_s13 = sadd.s32 4294967295, %s421_s12   ;;  %s293_s14 = sadd.s32 4294967294, %s421_s12   ;;  %s421_s12 = sphi %s447_s12, %s560_s12   ;;  %s417_s11 = sphi %s445_s11, %s559_s11   ;;  %s413_s10 = sphi %s443_s10, %s558_s10   ;;  %s409_s9 = sphi %s441_s9, %s557_s9  }
   0x4   : > { %s466_s15 = sadd.s32 1, %s421_s12   ;;  %s69_s16 = sadd.s32 1, %s417_s11 }
   0x5   : > { %s66_s17 = ssub.s32 %s421_s12, %s466_s15  ;;  %p79_p0 = scmp.ne.s32.totalorder %s417_s11, %s413_s10 }
   0x6   : > { %p67_p1 = scmp.eq.s32.totalorder %s66_s17, 0  ;;  %p80_p2 = scmp.eq.s32.totalorder %s462_s13, 1 }
   0x7   : > { %p85_p3 = scmp.ne.s32.totalorder %s413_s10, %s409_s9  ;;  %p86_p4 = scmp.eq.s32.totalorder %s293_s14, 1 }
   0x8   : > { %s477_s18 = scalar_select %p67_p1, %s417_s11, %s69_s16  }
   0x9   : > { %p479_p5 = por %p80_p2, %p79_p0  ;;  %p483_p6 = por %p86_p4, %p85_p3 }
   0xa   : > { %p296_p7 = scmp.ge.s32.totalorder %s421_s12, 1  ;;  %p114_p8 = scmp.lt.s32.totalorder %s421_s12, 3 }
   0xc   : > { %p115_p9 = pnand %p296_p7, %p114_p8 }
   0xd   : > { %p135_p10 = scmp.lt.s32.totalorder (!%p115_p9), %s462_s13, 1  ;;  %s132_s6 = sand.u32 (!%p115_p9), 1, %s413_s10  }
   0xe   : > { %118 = sbr.rel (%p115_p9) target bundleno = 235 (0xeb), region = 28  ;;  %s297_s7 = sshll.u32 (!%p115_p9), %s132_s6, 3 }
   0xf   : > { %s301_s8 = sshll.u32 (!%p115_p9), %s462_s13, 7  ;;  %s134_s14 = scalar_lea.vmem (!%p115_p9), [#allocation2], %s297_s7 }
  0x10   : > { %s234_s16 = sshll.u32 (!%p115_p9), %s134_s14, 4  ;;  %s511_s22 = scalar_lea.hbm (!%p115_p9), %s554_s2, %s301_s8  ;;  %s513_s16 = int_to_ptr.vmem [resolvable:$true] %s234_s16 }
  0x11   : > { %s221_s23 = scalar_lea.sflag (!%p115_p9), [#allocation3], %s132_s6  ;;  %s361_s24 = scalar_lea.vmem (!%p115_p9), %s513_s16, 128 }
  0x12   : > { %p362_p11 = scmp.ne.s32.totalorder (!%p115_p9), %s513_s16, %s361_s24 }
  0x13   : > { %v143_v0 = vld [vmem:[%s553_s1 + $0x18] sm:$0xff]  ;;  %v423_v1 = vmov 0.0   ;;  %v142_v2 = vld [vmem:[%s553_s1 + $0x10] sm:$0xff]  ;;  %vm424_vm0 = vmmov 0   ;;  %s136_s25 = scalar_select %p135_p10, %s462_s13, 1  ;;  %v141_v3 = vld [vmem:[%s553_s1 + $0x8] sm:$0xff] }
  0x14   : > { %309 = vmatprep.subr.mxu0 %v423_v1  ;;  %317 = vmatprep.mubr.msk.f32.mxu0 %vm424_vm0, %v423_v1  ;;  %v140_v4 = vld [vmem:[%s553_s1] sm:$0xff]  ;;  %vm144_vm1 = vcmask 261120   ;;  %vm218_vm2 = vcmask 130048   ;;  %p363_p12 = pnand %p362_p11, %p479_p5  ;;  %s425_s13 = smov [#allocation2]  }
  0x15   : > { %310 = vmatpush3.msra.mxu0 %v143_v0  ;;  %s298_s28 = sshll.u32 %s136_s25, 3  ;;  %s365_s25 = sshll.u32 %s425_s13, 4  ;;  %s366_s25 = int_to_ptr.vmem [resolvable:$false] %s365_s25 }
  0x16   : > { %311 = vmatprep.subr.mxu0 %v423_v1  ;;  %s138_s5 = scalar_lea.vmem %s552_s0, %s298_s28  ;;  %p364_p13 = pneg %p363_p12 }
  0x17   : > { %312 = vmatpush3.msra.mxu0 %v142_v2  ;;  %v139_v5 = vld [vmem:[%s138_s5] sm:$0xff]  ;;  %s367_s26 = scalar_lea.vmem %s366_s25, 256  ;;  %p368_p0 = scmp.lt.s32.totalorder %s513_s16, %s366_s25 }
  0x18   : > { %313 = vmatprep.subr.mxu0 %v423_v1  ;;  %p369_p1 = scmp.lt.s32.totalorder %s367_s26, %s361_s24 }
  0x19   : > { %314 = vmatpush3.msra.mxu0 %v141_v3 }
  0x1a   : > { %315 = vmatprep.subr.mxu0 %v423_v1  ;;  %p370_p2 = por %p369_p1, %p368_p0 }
  0x1b   : > { %316 = vmatpush3.msra.mxu0 %v140_v4 }
  0x1c   : > { %318 = vmatmul.mubr.msk.f32.vlgmr.msra.gmra.mxu0 %vm144_vm1, %v139_v5  ;;  %p371_p3 = pnand %p370_p2, %p364_p13 }
  0xdc   : > { %v214_v6 = vpop.f32.mrf.mxu0 }
  0xdd   : > { %219 = vst.msk [vmem:[%s134_s14] sm:$0xff] %vm218_vm2, %v214_v6 }
  0xde   : > { %v319_v7 = vpop.f32.mrf.mxu0 }
  0xdf   : > { %374 = shalt.err (!%p371_p3)
}
  0xe0   : > { %s375_s27 = scalar_lea.hbm %s511_s22, 128  ;;  %s379_s30 = scalar_lea.hbm %s554_s2, 256 }
  0xe1   : > { %p376_p4 = scmp.ne.s32.totalorder %s511_s22, %s375_s27  ;;  %p380_p9 = scmp.lt.s32.totalorder %s511_s22, %s554_s2 }
  0xe2   : > { %p381_p10 = scmp.lt.s32.totalorder %s379_s30, %s375_s27 }
  0xe3   : > { %p377_p7 = pnand %p376_p4, %p479_p5 }
  0xe4   : > { %p382_p11 = por %p381_p10, %p380_p9 }
  0xe5   : > { %p378_p8 = pneg %p377_p7 }
  0xe7   : > { %p383_p12 = pnand %p382_p11, %p378_p8 }
  0xe9   : > { %386 = shalt.err (!%p383_p12)
}
  0xea   : > { %320 = dma.vmem_to_hbm [thread:$0]  (%p479_p5), %s513_s16, 128, %s511_s22, %s221_s23  }
  0xeb PF: > { %p326_p13 = scmp.ge.s32.totalorder %s421_s12, 2  ;;  %s246_s5 = sand.u32 1, %s409_s9  }
  0xec   : > { %s247_s6 = scalar_lea.sflag [#allocation3], %s246_s5 }
  0xed   : > { %p323_p0 = pnand %p326_p13, %p483_p6 }
  0xef   : > { %p324_p1 = pneg %p323_p0 }
  0xf1   : > { %404 = dma.done.wait (%p324_p1), %s247_s6, 128  }
  0xf2   : > { %406 = vsyncadd (%p324_p1), %s247_s6, 4294967168  ;;  %p12_p2 = scmp.ge.s32.totalorder %s466_s15, 4   ;;  %s557_s9 = smov %s413_s10 }
  0xf3   : > { %s558_s10 = smov %s417_s11  ;;  %s559_s11 = smov %s477_s18 }
  0xf4   : > { %s560_s12 = smov %s466_s15  ;;  %14 = sbr.rel (!%p12_p2) target bundleno = 3 (0x3), region = 63 }
  0xf9   :  { %252 = vsyncpa [#allocation3], 1 }
  0xfa   :  { %254 = vsyncpa [#allocation3 + $0x1], 1 }

// kernel: transformer_forward.5
= control target key start
LH: loop header
LB: loop body
LE: loop exit
PB: predicated region body
PF: predicated region fallthrough
CT: control target
= control target key end

     0   :  { %s2257_s18 = smov 0   ;;  %s2497_s0 = inlined_call_operand.vmem [shape: f32[2,8,32], index: 0, kind: input, shape index: {}]   ;;  %s2498_s1 = inlined_call_operand.vmem [shape: f32[2,8,8], index: 1, kind: input, shape index: {}]   ;;  %s2499_s2 = inlined_call_operand.vmem [shape: f32[32,96], index: 2, kind: input, shape index: {}]   ;;  %s2500_s3 = inlined_call_operand.vmem [shape: f32[1,96], index: 3, kind: input, shape index: {}]   ;;  %s2501_s4 = inlined_call_operand.vmem [shape: f32[32,32], index: 4, kind: input, shape index: {}]   ;;  %s2502_s5 = inlined_call_operand.vmem [shape: f32[1,32], index: 5, kind: input, shape index: {}]   ;;  %s2503_s6 = inlined_call_operand.vmem [shape: f32[1,32], index: 6, kind: input, shape index: {}]   ;;  %s2504_s7 = inlined_call_operand.vmem [shape: f32[1,32], index: 7, kind: input, shape index: {}]   ;;  %s2505_s8 = inlined_call_operand.vmem [shape: f32[32,64], index: 8, kind: input, shape index: {}]   ;;  %s2506_s9 = inlined_call_operand.vmem [shape: f32[1,64], index: 9, kind: input, shape index: {}]   ;;  %s2507_s10 = inlined_call_operand.vmem [shape: f32[64,32], index: 10, kind: input, shape index: {}]   ;;  %s2508_s11 = inlined_call_operand.vmem [shape: f32[1,32], index: 11, kind: input, shape index: {}]   ;;  %s2509_s12 = inlined_call_operand.vmem [shape: f32[1,32], index: 12, kind: input, shape index: {}]   ;;  %s2510_s13 = inlined_call_operand.vmem [shape: f32[1,32], index: 13, kind: input, shape index: {}]   ;;  %s2511_s14 = inlined_call_operand.vmem [shape: f32[2,8,32], index: 14, kind: output, shape index: {0}]   ;;  %s2512_s15 = inlined_call_operand.vmem [shape: f32[2,8,32], index: 15, kind: output, shape index: {1}]  }
   0x1 LB: > { %s1927_s19 = sadd.s32 4294967295, %s2159_s18   ;;  %p1931_p0 = scmp.ge.s32.totalorder %s2159_s18, 1  ;;  %s2159_s18 = sphi %s2257_s18, %s26_s18  }
   0x2   : > { %p448_p1 = scmp.lt.s32.totalorder %s2159_s18, 3 }
   0x4   : > { %p449_p2 = pnand %p1931_p0, %p448_p1 }
   0x5   : > { %p502_p3 = scmp.lt.s32.totalorder (!%p449_p2), %s1927_s19, 1  ;;  %s2163_s20 = smov (!%p449_p2), 64  }
   0x6   : > { %452 = sbr.rel (%p449_p2) target bundleno = 3782 (0xec6), region = 76  ;;  %s2164_s21 = smov (!%p449_p2), 96  }
   0x7   : > { %s2165_s22 = smov (!%p449_p2), 88   ;;  %s2166_s27 = smov (!%p449_p2), 56  }
   0x8   : > { %s2167_s28 = smov (!%p449_p2), 120   ;;  %s2169_s17 = smov (!%p449_p2), 112  }
   0x9   : > { %s2172_s23 = smov (!%p449_p2), 104   ;;  %s2173_s29 = smov (!%p449_p2), 40  }
   0xb   : > { %v522_v0 = vld [vmem:[%s2499_s2 + $0x18] sm:$0xff]  ;;  %v2161_v1 = vmov 0.0   ;;  %v521_v2 = vld [vmem:[%s2499_s2 + $0x10] sm:$0xff]  ;;  %vm2162_vm0 = vmmov 0   ;;  %s2514_s19 = smov (!%p502_p3, %s1927_s19), 1  ;;  %v520_v3 = vld [vmem:[%s2499_s2 + $0x8] sm:$0xff] }
   0xc   : > { %2008 = vmatprep.subr.mxu0 %v2161_v1  ;;  %2016 = vmatprep.mubr.msk.f32.mxu0 %vm2162_vm0, %v2161_v1  ;;  %s2281_s26 = sshll.u32 %s2514_s19, 3  ;;  %v519_v4 = vld [vmem:[%s2499_s2] sm:$0xff]  ;;  %vm530_vm1 = vcmask 261120   ;;  %vm615_vm2 = vcmask 64512   ;;  %v606_v49 = vld [vmem:[%s2501_s4 + $0x8] sm:$0xff]  ;;  %vm1727_vm3 = vcmask 523264  }
   0xd   : > { %2009 = vmatpush3.msra.mxu0 %v522_v0  ;;  %2024 = vmatprep.subr.mxu1 %v2161_v1  ;;  %s505_s16 = scalar_lea.vmem %s2497_s0, %s2281_s26  ;;  %v1936_v6 = vld [vmem:[%s2500_s3] ss:$0 sm:$0xff]  ;;  %s509_s25 = scalar_lea.vmem %s2498_s1, %s2281_s26  ;;  %vm1621_vm4 = vcmask 130048   ;;  %vm1623_vm5 = vcmask 195584  }
   0xe   : > { %2010 = vmatprep.subr.mxu0 %v2161_v1  ;;  %2026 = vmatprep.mubr.msk.f32.mxu1 %vm2162_vm0, %v2161_v1  ;;  %v2291_v5 = vld [vmem:[%s505_s16] sm:$0xff]  ;;  %s2168_s16 = smov 80   ;;  %s517_s30 = scalar_lea.vmem %s2512_s15, %s2281_s26 }
   0xf   : > { %2011 = vmatpush3.msra.mxu0 %v521_v2  ;;  %v2318_v13 = vld [vmem:[%s509_s25] sm:$0xff]  ;;  %s2175_s25 = smov 8  }
  0x10   : > { %2012 = vmatprep.subr.mxu0 %v2161_v1  ;;  %v605_v23 = vld [vmem:[%s2501_s4] sm:$0xff] }
  0x11   : > { %2013 = vmatpush3.msra.mxu0 %v520_v3  ;;  %v1942_v63 = vld [vmem:[%s2502_s5] ss:$0 sm:$0xff] }
  0x12   : > { %2014 = vmatprep.subr.mxu0 %v2161_v1 }
  0x13   : > { %2015 = vmatpush3.msra.mxu0 %v519_v4 }
  0x14   : > { %2017 = vmatmul.mubr.msk.f32.vlgmr.msra.gmra.mxu0 %vm530_vm1, %v2291_v5  ;;  %2019 = vmatprep.subr.mxu0 %v2161_v1 }
  0x15   : > { %2021 = vmatprep.mubr.msk.f32.mxu0 %vm2162_vm0, %v2161_v1 }
  0xd4   : > { %v600_v7 = vpop.f32.mrf.mxu0 }
  0xd5   : > { %v2302_v8 = vadd.f32 %v1936_v6, %v600_v7 }
  0xd6   : > { %v2018_v9 = vpop.f32.mrf.mxu0 }
  0xd7   : > { %703 = vrot.lane.b32.xlu1 %v2302_v8, %s2163_s20  ;;  %613 = vrot.lane.b32.xlu0 %v2302_v8, %s2164_s21  ;;  %s2170_s21 = smov 48  }
  0xdb   : > { %861 = vrot.lane.b32.xlu1 %v2302_v8, %s2165_s22  ;;  %s2171_s22 = smov 72  }
 0x149   : > { %v704_v10 = vpop.permute.xlu1 %703  ;;  %v614_v11 = vpop.permute.xlu0 %613 }
 0x14a   : > { %2020 = vmatpush3.xpose.msk.msra.mxu0 %vm615_vm2, %v614_v11  ;;  %2025 = vmatpush3.msra.mxu1 %v704_v10 }
 0x14b   : > { %2034 = vmatprep.subr.mxu1 %v2161_v1  ;;  %2029 = vmatprep.subr.mxu0 %v2161_v1 }
 0x14d   : > { %2022 = vmatmul.mubr.msk.f32.vlgmr.msra.gmra.mxu0 %vm615_vm2, %v2302_v8  ;;  %v862_v24 = vpop.permute.xlu1 %861 }
 0x14e   : > { %2031 = vmatprep.mubr.msk.f32.mxu0 %vm2162_vm0, %v2161_v1  ;;  %2030 = vmatpush3.msra.mxu0 %v605_v23 }
 0x14f   : > { %2039 = vmatprep.subr.mxu0 %v2161_v1 }
 0x20d   : > { %v686_v12 = vpop.f32.mrf.mxu0 }
 0x20e   : > { %v690_v14 = vmul.f32 0.35355338, %v686_v12  ;;  %v607_v12 = vld [vmem:[%s2501_s4 + $0x10] sm:$0xff] }
 0x20f   : > { %v2023_v15 = vpop.f32.mrf.mxu0 }
 0x210   : > { %v691_v16 = vadd.f32 %v690_v14, %v2318_v13 }
 0x212   : > { %v692_v17 = vsel %vm615_vm2, %v691_v16, -inf }
 0x213   : > { %693 = vmax.xlane.f32.xlu0 %v692_v17 }
 0x229   : > { %950 = vrot.lane.b32.xlu0 %v2302_v8, %s2166_s27  ;;  %s2176_s27 = smov 24  }
 0x29c   : > { %v694_v18 = vpop.xlane.xlu0 %693 }
 0x29d   : > { %v695_v19 = vsub.f32 %v691_v16, %v694_v18 }
 0x29f   : > { %v696_v20 = vmul.f32 1.442695, %v695_v19 }
 0x2a0   : > { %v951_v30 = vpop.permute.xlu0 %950 }
 0x2a1   : > { %2133 = vpow2.f32 %v696_v20 }
 0x2ae   : > { %v2134_v21 = vpop.eup %2133 }
 0x2af   : > { %v698_v22 = vsel %vm615_vm2, %v2134_v21, 0.0 }
 0x2b0   : > { %699 = vadd.xlane.f32.xlu1 %v698_v22 }
 0x2c1   : > { %859 = vrot.lane.b32.xlu1 %v2302_v8, %s2167_s28 }
 0x339   : > { %v700_v25 = vpop.xlane.xlu1 %699 }
 0x33a   : > { %2135 = vrcp.f32 %v700_v25 }
 0x33d   : > { %v860_v28 = vpop.permute.xlu1 %859 }
 0x347   : > { %v2136_v26 = vpop.eup %2135 }
 0x348   : > { %v2329_v27 = vmul.f32 %v2136_v26, %v2134_v21 }
 0x34a   : > { %2027 = vmatmul.mubr.msk.f32.vlgmr.msra.gmra.mxu1 %vm615_vm2, %v2329_v27 }
 0x34b   : > { %2035 = vmatpush3.xpose.msk.msra.mxu1 %vm615_vm2, %v862_v24  ;;  %2036 = vmatprep.mubr.msk.f32.mxu1 %vm2162_vm0, %v2161_v1 }
 0x34c   : > { %2044 = vmatprep.subr.mxu1 %v2161_v1 }
 0x34e   : > { %2037 = vmatmul.mubr.msk.f32.vlgmr.msra.gmra.mxu1 %vm615_vm2, %v860_v28  ;;  %v608_v28 = vld [vmem:[%s2501_s4 + $0x18] sm:$0xff] }
 0x34f   : > { %2046 = vmatprep.mubr.msk.f32.mxu1 %vm2162_vm0, %v2161_v1  ;;  %2045 = vmatpush3.msra.mxu1 %v606_v49  ;;  %v1637_v49 = vld [vmem:[%s2507_s10 + $0x38] sm:$0xff] }
 0x350   : > { %2054 = vmatprep.subr.mxu1 %v2161_v1 }
 0x40a   : > { %v775_v29 = vpop.f32.mrf.mxu1 }
 0x40b   : > { %2032 = vmatmul.mubr.msk.f32.vlgmr.msra.gmra.mxu0 %vm615_vm2, %v775_v29 }
 0x40c   : > { %2040 = vmatpush3.msra.mxu0 %v951_v30  ;;  %v2028_v31 = vpop.f32.mrf.mxu1  ;;  %2041 = vmatprep.mubr.msk.f32.mxu0 %vm2162_vm0, %v2161_v1 }
 0x40d   : > { %2049 = vmatprep.subr.mxu0 %v2161_v1 }
 0x40e   : > { %v933_v32 = vpop.f32.mrf.mxu1 }
 0x40f   : > { %v937_v33 = vmul.f32 0.35355338, %v933_v32 }
 0x410   : > { %v2038_v34 = vpop.f32.mrf.mxu1 }
 0x411   : > { %v938_v35 = vadd.f32 %v937_v33, %v2318_v13 }
 0x413   : > { %v939_v36 = vsel %vm615_vm2, %v938_v35, -inf }
 0x414   : > { %940 = vmax.xlane.f32.xlu1 %v939_v36 }
 0x49d   : > { %v941_v37 = vpop.xlane.xlu1 %940 }
 0x49e   : > { %v942_v38 = vsub.f32 %v938_v35, %v941_v37 }
 0x4a0   : > { %v943_v39 = vmul.f32 1.442695, %v942_v38 }
 0x4a2   : > { %2137 = vpow2.f32 %v943_v39 }
 0x4af   : > { %v2138_v40 = vpop.eup %2137 }
 0x4b0   : > { %v945_v41 = vsel %vm615_vm2, %v2138_v40, 0.0 }
 0x4b1   : > { %946 = vadd.xlane.f32.xlu0 %v945_v41 }
 0x4c7   : > { %1102 = vrot.lane.b32.xlu0 %v2302_v8, %s2168_s16 }
 0x4cb   : > { %1100 = vrot.lane.b32.xlu0 %v2302_v8, %s2169_s17  ;;  %v848_v42 = vpop.f32.mrf.mxu0  ;;  %s2174_s17 = smov 16  }
 0x4cc   : > { %v858_v0 = vadd.f32 %v1942_v63, %v848_v42  ;;  %v1632_v63 = vld [vmem:[%s2507_s10 + $0x10] sm:$0xff] }
 0x4cd   : > { %v2033_v43 = vpop.f32.mrf.mxu0 }
 0x53a   : > { %v947_v44 = vpop.xlane.xlu0 %946 }
 0x53b   : > { %2139 = vrcp.f32 %v947_v44 }
 0x53e   : > { %v1103_v46 = vpop.permute.xlu0 %1102 }
 0x542   : > { %v1101_v48 = vpop.permute.xlu0 %1100 }
 0x548   : > { %v2140_v45 = vpop.eup %2139 }
 0x549   : > { %v2349_v47 = vmul.f32 %v2140_v45, %v2138_v40  ;;  %v1628_v45 = vld [vmem:[%s2505_s8 + $0x18] sm:$0xff] }
 0x54b   : > { %2042 = vmatmul.mubr.msk.f32.vlgmr.msra.gmra.mxu0 %vm615_vm2, %v2349_v47 }
 0x54c   : > { %2050 = vmatpush3.xpose.msk.msra.mxu0 %vm615_vm2, %v1103_v46  ;;  %2051 = vmatprep.mubr.msk.f32.mxu0 %vm2162_vm0, %v2161_v1  ;;  %v1626_v46 = vld [vmem:[%s2505_s8 + $0x8] sm:$0xff] }
 0x54d   : > { %2059 = vmatprep.subr.mxu0 %v2161_v1 }
 0x54f   : > { %2052 = vmatmul.mubr.msk.f32.vlgmr.msra.gmra.mxu0 %vm615_vm2, %v1101_v48  ;;  %v1625_v48 = vld [vmem:[%s2505_s8] sm:$0xff] }
 0x550   : > { %2061 = vmatprep.mubr.msk.f32.mxu0 %vm2162_vm0, %v2161_v1  ;;  %2060 = vmatpush3.msra.mxu0 %v607_v12 }
 0x551   : > { %2069 = vmatprep.subr.mxu0 %v2161_v1 }
 0x60b   : > { %v1022_v50 = vpop.f32.mrf.mxu0 }
 0x60c   : > { %2047 = vmatmul.mubr.msk.f32.vlgmr.msra.gmra.mxu1 %vm615_vm2, %v1022_v50  ;;  %v1636_v50 = vld [vmem:[%s2507_s10 + $0x30] sm:$0xff] }
 0x60d   : > { %v2043_v51 = vpop.f32.mrf.mxu0  ;;  %2056 = vmatprep.mubr.msk.f32.mxu1 %vm2162_vm0, %v2161_v1 }
 0x60e   : > { %v1635_v51 = vld [vmem:[%s2507_s10 + $0x28] sm:$0xff] }
 0x60f   : > { %v1174_v52 = vpop.f32.mrf.mxu0 }
 0x610   : > { %v1178_v53 = vmul.f32 0.35355338, %v1174_v52  ;;  %v1634_v52 = vld [vmem:[%s2507_s10 + $0x20] sm:$0xff] }
 0x611   : > { %v2053_v54 = vpop.f32.mrf.mxu0 }
 0x612   : > { %v1179_v55 = vadd.f32 %v1178_v53, %v2318_v13  ;;  %v1633_v53 = vld [vmem:[%s2507_s10 + $0x18] sm:$0xff] }
 0x614   : > { %v1180_v56 = vsel %vm615_vm2, %v1179_v55, -inf }
 0x615   : > { %1181 = vmax.xlane.f32.xlu1 %v1180_v56 }
 0x626   : > { %1191 = vrot.lane.b32.xlu1 %v2302_v8, %s2170_s21 }
 0x62a   : > { %1343 = vrot.lane.b32.xlu1 %v2302_v8, %s2171_s22 }
 0x62e   : > { %1341 = vrot.lane.b32.xlu1 %v2302_v8, %s2172_s23  ;;  %s513_s23 = scalar_lea.vmem %s2511_s14, %s2281_s26 }
 0x69e   : > { %v1182_v57 = vpop.xlane.xlu1 %1181 }
 0x69f   : > { %v1183_v58 = vsub.f32 %v1179_v55, %v1182_v57 }
 0x6a1   : > { %v1184_v59 = vmul.f32 1.442695, %v1183_v58  ;;  %v1955_v58 = vld [vmem:[%s2503_s6] ss:$0 sm:$0xff] }
 0x6a2   : > { %v1192_v60 = vpop.permute.xlu1 %1191 }
 0x6a3   : > { %2141 = vpow2.f32 %v1184_v59  ;;  %2055 = vmatpush3.msra.mxu1 %v1192_v60  ;;  %v1956_v60 = vld [vmem:[%s2504_s7] ss:$0 sm:$0xff] }
 0x6a4   : > { %2064 = vmatprep.subr.mxu1 %v2161_v1 }
 0x6a6   : > { %v1344_v9 = vpop.permute.xlu1 %1343 }
 0x6aa   : > { %v1342_v11 = vpop.permute.xlu1 %1341 }
 0x6b0   : > { %v2142_v61 = vpop.eup %2141 }
 0x6b1   : > { %v1186_v62 = vsel %vm615_vm2, %v2142_v61, 0.0 }
 0x6b2   : > { %1187 = vadd.xlane.f32.xlu0 %v1186_v62 }
 0x6cc   : > { %v1095_v2 = vpop.f32.mrf.mxu1 }
 0x6cd   : > { %v1099_v3 = vadd.f32 %v1095_v2, %v858_v0  ;;  %v1631_v0 = vld [vmem:[%s2507_s10 + $0x8] sm:$0xff]  ;;  %v1630_v2 = vld [vmem:[%s2507_s10] sm:$0xff] }
 0x6ce   : > { %v2048_v4 = vpop.f32.mrf.mxu1 }
 0x73b   : > { %v1188_v6 = vpop.xlane.xlu0 %1187 }
 0x73c   : > { %2143 = vrcp.f32 %v1188_v6 }
 0x749   : > { %v2144_v7 = vpop.eup %2143 }
 0x74a   : > { %v1190_v10 = vmul.f32 %v2144_v7, %v2142_v61 }
 0x74c   : > { %2057 = vmatmul.mubr.msk.f32.vlgmr.msra.gmra.mxu1 %vm615_vm2, %v1190_v10 }
 0x74d   : > { %2065 = vmatpush3.xpose.msk.msra.mxu1 %vm615_vm2, %v1344_v9  ;;  %2066 = vmatprep.mubr.msk.f32.mxu1 %vm2162_vm0, %v2161_v1 }
 0x74e   : > { %2074 = vmatprep.subr.mxu1 %v2161_v1 }
 0x750   : > { %2067 = vmatmul.mubr.msk.f32.vlgmr.msra.gmra.mxu1 %vm615_vm2, %v1342_v11 }
 0x751   : > { %2076 = vmatprep.mubr.msk.f32.mxu1 %vm2162_vm0, %v2161_v1  ;;  %2075 = vmatpush3.msra.mxu1 %v608_v28 }
 0x752   : > { %2090 = vmatprep.subr.mxu1 %v2161_v1 }
 0x80c   : > { %v1263_v14 = vpop.f32.mrf.mxu1 }
 0x80d   : > { %2062 = vmatmul.mubr.msk.f32.vlgmr.msra.gmra.mxu0 %vm615_vm2, %v1263_v14 }
 0x80e   : > { %v2058_v15 = vpop.f32.mrf.mxu1  ;;  %2071 = vmatprep.mubr.msk.f32.mxu0 %vm2162_vm0, %v2161_v1 }
 0x810   : > { %v1415_v16 = vpop.f32.mrf.mxu1 }
 0x811   : > { %v1419_v17 = vmul.f32 0.35355338, %v1415_v16 }
 0x812   : > { %v2068_v18 = vpop.f32.mrf.mxu1 }
 0x813   : > { %v1420_v19 = vadd.f32 %v1419_v17, %v2318_v13 }
 0x815   : > { %v1421_v20 = vsel %vm615_vm2, %v1420_v19, -inf }
 0x816   : > { %1422 = vmax.xlane.f32.xlu1 %v1421_v20 }
 0x89f   : > { %v1423_v21 = vpop.xlane.xlu1 %1422 }
 0x8a0   : > { %v1424_v22 = vsub.f32 %v1420_v19, %v1423_v21 }
 0x8a2   : > { %v1425_v23 = vmul.f32 1.442695, %v1424_v22 }
 0x8a4   : > { %2145 = vpow2.f32 %v1425_v23 }
 0x8b1   : > { %v2146_v24 = vpop.eup %2145 }
 0x8b2   : > { %v1427_v25 = vsel %vm615_vm2, %v2146_v24, 0.0 }
 0x8b3   : > { %1428 = vadd.xlane.f32.xlu0 %v1427_v25 }
 0x8c9   : > { %1432 = vrot.lane.b32.xlu0 %v2302_v8, %s2173_s29 }
 0x8cd   : > { %v1336_v26 = vpop.f32.mrf.mxu0 }
 0x8ce   : > { %v1340_v13 = vadd.f32 %v1336_v26, %v1099_v3  ;;  %v1957_v3 = vld [vmem:[%s2506_s9] ss:$0 sm:$0xff] }
 0x8cf   : > { %v2063_v29 = vpop.f32.mrf.mxu0 }
 0x93c   : > { %v1429_v30 = vpop.xlane.xlu0 %1428 }
 0x93d   : > { %2147 = vrcp.f32 %v1429_v30 }
 0x940   : > { %v1433_v31 = vpop.permute.xlu0 %1432 }
 0x941   : > { %2070 = vmatpush3.msra.mxu0 %v1433_v31  ;;  %v1962_v31 = vld [vmem:[%s2510_s13] ss:$0 sm:$0xff] }
 0x942   : > { %2079 = vmatprep.subr.mxu0 %v2161_v1 }
 0x94a   : > { %v2148_v32 = vpop.eup %2147 }
 0x94b   : > { %v2401_v33 = vmul.f32 %v2148_v32, %v2146_v24 }
 0x94d   : > { %2072 = vmatmul.mubr.msk.f32.vlgmr.msra.gmra.mxu0 %vm615_vm2, %v2401_v33 }
 0x94e   : > { %2087 = vmatprep.mubr.msk.f32.mxu0 %vm2162_vm0, %v2161_v1  ;;  %2080 = vmatpush3.msra.mxu0 %v1628_v45 }
 0x94f   : > { %2081 = vmatprep.subr.mxu0 %v2161_v1 }
 0xa0d   : > { %v1504_v8 = vpop.f32.mrf.mxu0 }
 0xa0e   : > { %2077 = vmatmul.mubr.msk.f32.vlgmr.msra.gmra.mxu1 %vm615_vm2, %v1504_v8 }
 0xa0f   : > { %v2073_v34 = vpop.f32.mrf.mxu0  ;;  %2106 = vmatprep.mubr.msk.f32.mxu1 %vm2162_vm0, %v2161_v1  ;;  %2091 = vmatpush3.msra.mxu1 %v1637_v49 }
 0xa10   : > { %2092 = vmatprep.subr.mxu1 %v2161_v1 }
 0xa11   : > { %2093 = vmatpush3.msra.mxu1 %v1636_v50 }
 0xa12   : > { %2094 = vmatprep.subr.mxu1 %v2161_v1 }
 0xa13   : > { %2095 = vmatpush3.msra.mxu1 %v1635_v51 }
 0xa14   : > { %2096 = vmatprep.subr.mxu1 %v2161_v1 }
 0xa15   : > { %2097 = vmatpush3.msra.mxu1 %v1634_v52 }
 0xa16   : > { %2098 = vmatprep.subr.mxu1 %v2161_v1 }
 0xa17   : > { %2099 = vmatpush3.msra.mxu1 %v1633_v53 }
 0xa18   : > { %2100 = vmatprep.subr.mxu1 %v2161_v1 }
 0xa19   : > { %2101 = vmatpush3.msra.mxu1 %v1632_v63 }
 0xa1a   : > { %2102 = vmatprep.subr.mxu1 %v2161_v1 }
 0xa1b   : > { %2103 = vmatpush3.msra.mxu1 %v1631_v0 }
 0xa1c   : > { %2104 = vmatprep.subr.mxu1 %v2161_v1 }
 0xa1d   : > { %2105 = vmatpush3.msra.mxu1 %v1630_v2 }
 0xace   : > { %v1577_v35 = vpop.f32.mrf.mxu1 }
 0xacf   : > { %v1581_v36 = vadd.f32 %v1577_v35, %v1340_v13 }
 0xad0   : > { %v2078_v37 = vpop.f32.mrf.mxu1 }
 0xad1   : > { %v1582_v38 = vadd.f32 %v1581_v36, %v2291_v5  ;;  %v1627_v5 = vld [vmem:[%s2505_s8 + $0x10] sm:$0xff] }
 0xad2   : > { %2082 = vmatpush3.msra.mxu0 %v1627_v5 }
 0xad3   : > { %v1583_v39 = vsel %vm530_vm1, %v1582_v38, 0.0  ;;  %2083 = vmatprep.subr.mxu0 %v2161_v1 }
 0xad4   : > { %1584 = vadd.xlane.f32.xlu0 %v1583_v39  ;;  %2084 = vmatpush3.msra.mxu0 %v1626_v46 }
 0xad5   : > { %2085 = vmatprep.subr.mxu0 %v2161_v1 }
 0xad6   : > { %2086 = vmatpush3.msra.mxu0 %v1625_v48 }
 0xaea   : > { %1614 = vrot.lane.b32.xlu0 %v1190_v10, %s2174_s17  ;;  %v1959_v10 = vld [vmem:[%s2508_s11] ss:$0 sm:$0xff] }
 0xb5d   : > { %v1585_v40 = vpop.xlane.xlu0 %1584 }
 0xb5e   : > { %v1587_v41 = vmul.f32 0.03125, %v1585_v40 }
 0xb60   : > { %v1588_v42 = vsub.f32 %v1582_v38, %v1587_v41 }
 0xb62   : > { %v1589_v43 = vmul.f32 %v1588_v42, %v1588_v42 }
 0xb64   : > { %v1590_v44 = vsel %vm530_vm1, %v1589_v43, 0.0 }
 0xb65   : > { %1591 = vadd.xlane.f32.xlu1 %v1590_v44 }
 0xbee   : > { %v1592_v54 = vpop.xlane.xlu1 %1591 }
 0xbef   : > { %v1593_v55 = vmul.f32 0.03125, %v1592_v54 }
 0xbf1   : > { %v1594_v56 = vadd.f32 1e-05, %v1593_v55 }
 0xbf3   : > { %2149 = vrsqrt.f32 %v1594_v56 }
 0xc00   : > { %v2150_v57 = vpop.eup %2149 }
 0xc01   : > { %v1596_v59 = vmul.f32 %v2150_v57, %v1588_v42 }
 0xc03   : > { %v1603_v61 = vmul.f32 %v1955_v58, %v1596_v59 }
 0xc05   : > { %v1610_v62 = vadd.f32 %v1956_v60, %v1603_v61 }
 0xc07   : > { %2088 = vmatmul.mubr.msk.f32.vlgmr.msra.gmra.mxu0 %vm530_vm1, %v1610_v62 }
 0xcc7   : > { %v1716_v4 = vpop.f32.mrf.mxu0 }
 0xcc8   : > { %v1717_v6 = vadd.f32 %v1957_v3, %v1716_v4 }
 0xcc9   : > { %v2089_v7 = vpop.f32.mrf.mxu0 }
 0xcca   : > { %v1720_v9 = vmax.f32 %v1717_v6, 0.0 }
 0xccc   : > { %2107 = vmatmul.mubr.msk.f32.vlgmr.msra.gmra.mxu1 %vm1727_vm3, %v1720_v9 }
 0xd8c   : > { %v1797_v11 = vpop.f32.mrf.mxu1 }
 0xd8d   : > { %v1798_v12 = vadd.f32 %v1959_v10, %v1797_v11 }
 0xd8e   : > { %v2108_v14 = vpop.f32.mrf.mxu1 }
 0xd8f   : > { %v1801_v15 = vadd.f32 %v1798_v12, %v1610_v62 }
 0xd91   : > { %v1802_v1 = vsel %vm530_vm1, %v1801_v15, 0.0 }
 0xd92   : > { %1803 = vadd.xlane.f32.xlu1 %v1802_v1 }
 0xda3   : > { %1611 = vrot.lane.b32.xlu1 %v2349_v47, %s2175_s25  ;;  %v1615_v47 = vpop.permute.xlu0 %1614 }
 0xe1b   : > { %v1804_v16 = vpop.xlane.xlu1 %1803 }
 0xe1c   : > { %v1805_v17 = vmul.f32 0.03125, %v1804_v16 }
 0xe1e   : > { %v1806_v18 = vsub.f32 %v1801_v15, %v1805_v17 }
 0xe1f   : > { %v1612_v21 = vpop.permute.xlu1 %1611 }
 0xe20   : > { %v1807_v19 = vmul.f32 %v1806_v18, %v1806_v18  ;;  %v1620_v23 = vsel %vm615_vm2, %v2329_v27, %v1612_v21  ;;  %v1961_v27 = vld [vmem:[%s2509_s12] ss:$0 sm:$0xff] }
 0xe21   : > { %v1622_v26 = vsel %vm1621_vm4, %v1620_v23, %v1615_v47 }
 0xe22   : > { %v1808_v20 = vsel %vm530_vm1, %v1807_v19, 0.0 }
 0xe23   : > { %1809 = vadd.xlane.f32.xlu1 %v1808_v20 }
 0xe34   : > { %1617 = vrot.lane.b32.xlu1 %v2401_v33, %s2176_s27 }
 0xeac   : > { %v1810_v22 = vpop.xlane.xlu1 %1809 }
 0xead   : > { %v1811_v24 = vmul.f32 0.03125, %v1810_v22 }
 0xeaf   : > { %v1812_v25 = vadd.f32 1e-05, %v1811_v24 }
 0xeb0   : > { %v1618_v28 = vpop.permute.xlu1 %1617 }
 0xeb1   : > { %2151 = vrsqrt.f32 %v1812_v25  ;;  %v1624_v13 = vsel %vm1623_vm5, %v1622_v26, %v1618_v28 }
 0xeb2   : > { %1830 = vst.msk [vmem:[%s517_s30] sm:$0xff] %vm530_vm1, %v1624_v13 }
 0xebe   : > { %v2152_v29 = vpop.eup %2151 }
 0xebf   : > { %v1814_v30 = vmul.f32 %v2152_v29, %v1806_v18 }
 0xec1   : > { %v1821_v32 = vmul.f32 %v1961_v27, %v1814_v30 }
 0xec3   : > { %v1828_v33 = vadd.f32 %v1962_v31, %v1821_v32 }
 0xec5   : > { %1829 = vst.msk [vmem:[%s513_s23] sm:$0xff] %vm530_vm1, %v1828_v33 }
 0xec6 PF: > { %s26_s18 = sadd.s32 1, %s2159_s18  }
 0xec7   : > { %p23_p4 = scmp.ge.s32.totalorder %s26_s18, 4  }
 0xec9   :  { %25 = sbr.rel (!%p23_p4) target bundleno = 1 (0x1), region = 121 }

// kernel: transformer_forward.7
= control target key start
LH: loop header
LB: loop body
LE: loop exit
PB: predicated region body
PF: predicated region fallthrough
CT: control target
= control target key end

     0   :  { %s4054_s27 = smov 0   ;;  %s4501_s0 = inlined_call_operand.vmem [shape: f32[2,8,32], index: 0, kind: input, shape index: {}]   ;;  %s4502_s1 = inlined_call_operand.vmem [shape: f32[2,8,32], index: 1, kind: input, shape index: {}]   ;;  %s4503_s2 = inlined_call_operand.vmem [shape: f32[2,8,8], index: 2, kind: input, shape index: {}]   ;;  %s4504_s3 = inlined_call_operand.vmem [shape: f32[2,8,8], index: 3, kind: input, shape index: {}]   ;;  %s4505_s4 = inlined_call_operand.vmem [shape: f32[32,96], index: 4, kind: input, shape index: {}]   ;;  %s4506_s5 = inlined_call_operand.vmem [shape: f32[1,96], index: 5, kind: input, shape index: {}]   ;;  %s4507_s6 = inlined_call_operand.vmem [shape: f32[32,32], index: 6, kind: input, shape index: {}]   ;;  %s4508_s7 = inlined_call_operand.vmem [shape: f32[1,32], index: 7, kind: input, shape index: {}]   ;;  %s4509_s8 = inlined_call_operand.vmem [shape: f32[1,32], index: 8, kind: input, shape index: {}]   ;;  %s4510_s9 = inlined_call_operand.vmem [shape: f32[1,32], index: 9, kind: input, shape index: {}]   ;;  %s4511_s10 = inlined_call_operand.vmem [shape: f32[32,32], index: 10, kind: input, shape index: {}]   ;;  %s4512_s11 = inlined_call_operand.vmem [shape: f32[1,32], index: 11, kind: input, shape index: {}]   ;;  %s4513_s12 = inlined_call_operand.vmem [shape: f32[32,64], index: 12, kind: input, shape index: {}]   ;;  %s4514_s13 = inlined_call_operand.vmem [shape: f32[1,64], index: 13, kind: input, shape index: {}]   ;;  %s4515_s14 = inlined_call_operand.vmem [shape: f32[32,32], index: 14, kind: input, shape index: {}]   ;;  %s4516_s15 = inlined_call_operand.vmem [shape: f32[1,32], index: 15, kind: input, shape index: {}]   ;;  %s4517_s16 = inlined_call_operand.vmem [shape: f32[1,32], index: 16, kind: input, shape index: {}]   ;;  %s4518_s17 = inlined_call_operand.vmem [shape: f32[1,32], index: 17, kind: input, shape index: {}]   ;;  %s4519_s18 = inlined_call_operand.vmem [shape: f32[32,64], index: 18, kind: input, shape index: {}]   ;;  %s4520_s19 = inlined_call_operand.vmem [shape: f32[1,64], index: 19, kind: input, shape index: {}]   ;;  %s4521_s20 = inlined_call_operand.vmem [shape: f32[64,32], index: 20, kind: input, shape index: {}]   ;;  %s4522_s21 = inlined_call_operand.vmem [shape: f32[1,32], index: 21, kind: input, shape index: {}]   ;;  %s4523_s22 = inlined_call_operand.vmem [shape: f32[1,32], index: 22, kind: input, shape index: {}]   ;;  %s4524_s23 = inlined_call_operand.vmem [shape: f32[1,32], index: 23, kind: input, shape index: {}]   ;;  %s4525_s24 = inlined_call_operand.vmem [shape: f32[2,8,32], index: 24, kind: output, shape index: {0}]   ;;  %s4526_s25 = inlined_call_operand.vmem [shape: f32[2,8,32], index: 25, kind: output, shape index: {1}]   ;;  %s4527_s26 = inlined_call_operand.vmem [shape: f32[2,8,32], index: 26, kind: output, shape index: {2}]  }
   0x1   :  { %4541 = sst [smem:[#allocation2_spill]] %s4501_s0 }
   0x2   :  { %4542 = sst [smem:[#allocation3_spill]] %s4502_s1 }
   0x3   :  { %4543 = sst [smem:[#allocation4_spill]] %s4503_s2 }
   0x4   :  { %4544 = sst [smem:[#allocation5_spill]] %s4504_s3 }
   0x5   :  { %4545 = sst [smem:[#allocation6_spill]] %s4505_s4 }
   0x6   :  { %4546 = sst [smem:[#allocation7_spill]] %s4506_s5 }
   0x7   :  { %4547 = sst [smem:[#allocation8_spill]] %s4507_s6 }
   0x8   :  { %4548 = sst [smem:[#allocation9_spill]] %s4508_s7 }
   0x9   :  { %4549 = sst [smem:[#allocation10_spill]] %s4509_s8 }
   0xa   :  { %4550 = sst [smem:[#allocation11_spill]] %s4510_s9 }
   0xb   :  { %4551 = sst [smem:[#allocation12_spill]] %s4511_s10 }
   0xc LB: > { %s3509_s3 = sadd.s32 4294967295, %s3901_s27   ;;  %p3513_p0 = scmp.ge.s32.totalorder %s3901_s27, 1  ;;  %s3901_s27 = sphi %s4054_s27, %s37_s27  }
   0xd   : > { %p743_p1 = scmp.lt.s32.totalorder %s3901_s27, 3 }
   0xf   : > { %p744_p2 = pnand %p3513_p0, %p743_p1 }
  0x10   : > { %s4552_s8 = sld [smem:[#allocation6_spill]] (!%p744_p2)  ;;  %p831_p3 = scmp.lt.s32.totalorder (!%p744_p2), %s3509_s3, 1 }
  0x11   : > { %747 = sbr.rel (%p744_p2) target bundleno = 6734 (0x1a4e), region = 116  ;;  %s4553_s1 = sld [smem:[#allocation2_spill]] (!%p744_p2) }
  0x12   : > { %s4554_s4 = sld [smem:[#allocation7_spill]] (!%p744_p2)  ;;  %s3905_s29 = smov (!%p744_p2), 64  }
  0x13   : > { %s4538_s0 = smov (!%p744_p2), 96   ;;  %s4537_s9 = smov (!%p744_p2), 88  }
  0x14   : > { %s4555_s10 = sld [smem:[#allocation4_spill]] (!%p744_p2)  ;;  %s4535_s2 = smov (!%p744_p2), 112  }
  0x15   : > { %s3915_s5 = smov (!%p744_p2), 40   ;;  %s4562_s28 = smov (!%p744_p2), 120  }
  0x16   : > { %v864_v0 = vld [vmem:[%s4552_s8 + $0x18] sm:$0xff]  ;;  %v3903_v1 = vmov 0.0   ;;  %v863_v2 = vld [vmem:[%s4552_s8 + $0x10] sm:$0xff]  ;;  %vm3904_vm0 = vmmov 0   ;;  %s4571_s3 = smov (!%p831_p3, %s3509_s3), 1  ;;  %v862_v3 = vld [vmem:[%s4552_s8 + $0x8] sm:$0xff] }
  0x17   : > { %3650 = vmatprep.subr.mxu0 %v3903_v1  ;;  %3658 = vmatprep.mubr.msk.f32.mxu0 %vm3904_vm0, %v3903_v1  ;;  %s4078_s30 = sshll.u32 %s4571_s3, 3  ;;  %v861_v4 = vld [vmem:[%s4552_s8] sm:$0xff]  ;;  %vm872_vm1 = vcmask 261120   ;;  %vm957_vm2 = vcmask 64512   ;;  %s4532_s3 = smov 104   ;;  %vm1963_vm3 = vcmask 130048  }
  0x18   : > { %3651 = vmatpush3.msra.mxu0 %v864_v0  ;;  %3666 = vmatprep.subr.mxu1 %v3903_v1  ;;  %s834_s7 = scalar_lea.vmem %s4553_s1, %s4078_s30  ;;  %v3521_v6 = vld [vmem:[%s4554_s4] ss:$0 sm:$0xff]  ;;  %s3908_s1 = smov 56   ;;  %vm1965_vm4 = vcmask 195584   ;;  %vm3253_vm5 = vcmask 523264  }
  0x19   : > { %3652 = vmatprep.subr.mxu0 %v3903_v1  ;;  %3668 = vmatprep.mubr.msk.f32.mxu1 %vm3904_vm0, %v3903_v1  ;;  %v4088_v5 = vld [vmem:[%s834_s7] sm:$0xff]  ;;  %s4539_s7 = smov 120   ;;  %s4556_s4 = sld [smem:[#allocation8_spill]] }
  0x1a   : > { %3653 = vmatpush3.msra.mxu0 %v863_v2  ;;  %s842_s6 = scalar_lea.vmem %s4555_s10, %s4078_s30  ;;  %s4557_s10 = sld [smem:[#allocation9_spill]] }
  0x1b   : > { %3654 = vmatprep.subr.mxu0 %v3903_v1  ;;  %v4117_v13 = vld [vmem:[%s842_s6] sm:$0xff]  ;;  %s3912_s6 = smov 48  }
  0x1c   : > { %3655 = vmatpush3.msra.mxu0 %v862_v3 }
  0x1d   : > { %3656 = vmatprep.subr.mxu0 %v3903_v1 }
  0x1e   : > { %3657 = vmatpush3.msra.mxu0 %v861_v4 }
  0x1f   : > { %3659 = vmatmul.mubr.msk.f32.vlgmr.msra.gmra.mxu0 %vm872_vm1, %v4088_v5  ;;  %3661 = vmatprep.subr.mxu0 %v3903_v1  ;;  %v947_v23 = vld [vmem:[%s4556_s4] sm:$0xff]  ;;  %v948_v49 = vld [vmem:[%s4556_s4 + $0x8] sm:$0xff] }
  0x20   : > { %3663 = vmatprep.mubr.msk.f32.mxu0 %vm3904_vm0, %v3903_v1  ;;  %v3527_v63 = vld [vmem:[%s4557_s10] ss:$0 sm:$0xff]  ;;  %s4560_s10 = sld [smem:[#allocation10_spill]] }
  0xdf   : > { %v942_v7 = vpop.f32.mrf.mxu0 }
  0xe0   : > { %v4099_v8 = vadd.f32 %v3521_v6, %v942_v7 }
  0xe1   : > { %v3660_v9 = vpop.f32.mrf.mxu0 }
  0xe2   : > { %1045 = vrot.lane.b32.xlu1 %v4099_v8, %s3905_s29  ;;  %955 = vrot.lane.b32.xlu0 %v4099_v8, %s4538_s0  ;;  %s4534_s29 = smov 80   ;;  %s3917_s0 = smov 16  }
  0xe6   : > { %1203 = vrot.lane.b32.xlu1 %v4099_v8, %s4537_s9  ;;  %s4558_s9 = sld [smem:[#allocation12_spill]] }
 0x154   : > { %v1046_v10 = vpop.permute.xlu1 %1045  ;;  %v956_v11 = vpop.permute.xlu0 %955 }
 0x155   : > { %3662 = vmatpush3.xpose.msk.msra.mxu0 %vm957_vm2, %v956_v11  ;;  %3667 = vmatpush3.msra.mxu1 %v1046_v10 }
 0x156   : > { %3676 = vmatprep.subr.mxu1 %v3903_v1  ;;  %3671 = vmatprep.subr.mxu0 %v3903_v1 }
 0x158   : > { %3664 = vmatmul.mubr.msk.f32.vlgmr.msra.gmra.mxu0 %vm957_vm2, %v4099_v8  ;;  %v1204_v24 = vpop.permute.xlu1 %1203 }
 0x159   : > { %3673 = vmatprep.mubr.msk.f32.mxu0 %vm3904_vm0, %v3903_v1  ;;  %3672 = vmatpush3.msra.mxu0 %v947_v23 }
 0x15a   : > { %3681 = vmatprep.subr.mxu0 %v3903_v1 }
 0x218   : > { %v1028_v12 = vpop.f32.mrf.mxu0 }
 0x219   : > { %v1032_v14 = vmul.f32 0.35355338, %v1028_v12  ;;  %v949_v12 = vld [vmem:[%s4556_s4 + $0x10] sm:$0xff] }
 0x21a   : > { %v3665_v15 = vpop.f32.mrf.mxu0 }
 0x21b   : > { %v1033_v16 = vadd.f32 %v1032_v14, %v4117_v13 }
 0x21d   : > { %v1034_v17 = vsel %vm957_vm2, %v1033_v16, -inf }
 0x21e   : > { %1035 = vmax.xlane.f32.xlu0 %v1034_v17 }
 0x234   : > { %1292 = vrot.lane.b32.xlu0 %v4099_v8, %s3908_s1  ;;  %s4531_s1 = smov 72  }
 0x2a7   : > { %v1036_v18 = vpop.xlane.xlu0 %1035 }
 0x2a8   : > { %v1037_v19 = vsub.f32 %v1033_v16, %v1036_v18 }
 0x2aa   : > { %v1038_v20 = vmul.f32 1.442695, %v1037_v19 }
 0x2ab   : > { %v1293_v30 = vpop.permute.xlu0 %1292 }
 0x2ac   : > { %3857 = vpow2.f32 %v1038_v20 }
 0x2b9   : > { %v3858_v21 = vpop.eup %3857 }
 0x2ba   : > { %v1040_v22 = vsel %vm957_vm2, %v3858_v21, 0.0 }
 0x2bb   : > { %1041 = vadd.xlane.f32.xlu1 %v1040_v22 }
 0x2cc   : > { %1201 = vrot.lane.b32.xlu1 %v4099_v8, %s4539_s7  ;;  %s3918_s7 = smov 24  }
 0x344   : > { %v1042_v25 = vpop.xlane.xlu1 %1041 }
 0x345   : > { %3859 = vrcp.f32 %v1042_v25 }
 0x348   : > { %v1202_v28 = vpop.permute.xlu1 %1201 }
 0x352   : > { %v3860_v26 = vpop.eup %3859 }
 0x353   : > { %v4129_v27 = vmul.f32 %v3860_v26, %v3858_v21 }
 0x355   : > { %3669 = vmatmul.mubr.msk.f32.vlgmr.msra.gmra.mxu1 %vm957_vm2, %v4129_v27 }
 0x356   : > { %3677 = vmatpush3.xpose.msk.msra.mxu1 %vm957_vm2, %v1204_v24  ;;  %3678 = vmatprep.mubr.msk.f32.mxu1 %vm3904_vm0, %v3903_v1 }
 0x357   : > { %3686 = vmatprep.subr.mxu1 %v3903_v1 }
 0x359   : > { %3679 = vmatmul.mubr.msk.f32.vlgmr.msra.gmra.mxu1 %vm957_vm2, %v1202_v28  ;;  %v950_v28 = vld [vmem:[%s4556_s4 + $0x18] sm:$0xff] }
 0x35a   : > { %3688 = vmatprep.mubr.msk.f32.mxu1 %vm3904_vm0, %v3903_v1  ;;  %3687 = vmatpush3.msra.mxu1 %v948_v49  ;;  %v2051_v49 = vld [vmem:[%s4513_s12] sm:$0xff] }
 0x35b   : > { %3696 = vmatprep.subr.mxu1 %v3903_v1 }
 0x415   : > { %v1117_v29 = vpop.f32.mrf.mxu1 }
 0x416   : > { %3674 = vmatmul.mubr.msk.f32.vlgmr.msra.gmra.mxu0 %vm957_vm2, %v1117_v29 }
 0x417   : > { %3682 = vmatpush3.msra.mxu0 %v1293_v30  ;;  %v3670_v31 = vpop.f32.mrf.mxu1  ;;  %3683 = vmatprep.mubr.msk.f32.mxu0 %vm3904_vm0, %v3903_v1 }
 0x418   : > { %3691 = vmatprep.subr.mxu0 %v3903_v1 }
 0x419   : > { %v1275_v32 = vpop.f32.mrf.mxu1 }
 0x41a   : > { %v1279_v33 = vmul.f32 0.35355338, %v1275_v32 }
 0x41b   : > { %v3680_v34 = vpop.f32.mrf.mxu1 }
 0x41c   : > { %v1280_v35 = vadd.f32 %v1279_v33, %v4117_v13 }
 0x41e   : > { %v1281_v36 = vsel %vm957_vm2, %v1280_v35, -inf }
 0x41f   : > { %1282 = vmax.xlane.f32.xlu1 %v1281_v36 }
 0x4a8   : > { %v1283_v37 = vpop.xlane.xlu1 %1282 }
 0x4a9   : > { %v1284_v38 = vsub.f32 %v1280_v35, %v1283_v37 }
 0x4ab   : > { %v1285_v39 = vmul.f32 1.442695, %v1284_v38 }
 0x4ad   : > { %3861 = vpow2.f32 %v1285_v39 }
 0x4ba   : > { %v3862_v40 = vpop.eup %3861 }
 0x4bb   : > { %v1287_v41 = vsel %vm957_vm2, %v3862_v40, 0.0 }
 0x4bc   : > { %1288 = vadd.xlane.f32.xlu0 %v1287_v41 }
 0x4d2   : > { %1444 = vrot.lane.b32.xlu0 %v4099_v8, %s4534_s29 }
 0x4d6   : > { %1442 = vrot.lane.b32.xlu0 %v4099_v8, %s4535_s2  ;;  %v1190_v42 = vpop.f32.mrf.mxu0 }
 0x4d7   : > { %v1200_v0 = vadd.f32 %v3527_v63, %v1190_v42  ;;  %v3544_v63 = vld [vmem:[%s4514_s13] ss:$0 sm:$0xff] }
 0x4d8   : > { %v3675_v43 = vpop.f32.mrf.mxu0 }
 0x545   : > { %v1289_v44 = vpop.xlane.xlu0 %1288 }
 0x546   : > { %3863 = vrcp.f32 %v1289_v44 }
 0x549   : > { %v1445_v46 = vpop.permute.xlu0 %1444 }
 0x54d   : > { %v1443_v48 = vpop.permute.xlu0 %1442 }
 0x553   : > { %v3864_v45 = vpop.eup %3863 }
 0x554   : > { %v4151_v47 = vmul.f32 %v3864_v45, %v3862_v40  ;;  %v2054_v45 = vld [vmem:[%s4513_s12 + $0x18] sm:$0xff] }
 0x556   : > { %3684 = vmatmul.mubr.msk.f32.vlgmr.msra.gmra.mxu0 %vm957_vm2, %v4151_v47 }
 0x557   : > { %3692 = vmatpush3.xpose.msk.msra.mxu0 %vm957_vm2, %v1445_v46  ;;  %3693 = vmatprep.mubr.msk.f32.mxu0 %vm3904_vm0, %v3903_v1  ;;  %v2052_v46 = vld [vmem:[%s4513_s12 + $0x8] sm:$0xff] }
 0x558   : > { %3701 = vmatprep.subr.mxu0 %v3903_v1 }
 0x55a   : > { %3694 = vmatmul.mubr.msk.f32.vlgmr.msra.gmra.mxu0 %vm957_vm2, %v1443_v48  ;;  %v1970_v48 = vld [vmem:[%s4558_s9 + $0x18] sm:$0xff] }
 0x55b   : > { %3703 = vmatprep.mubr.msk.f32.mxu0 %vm3904_vm0, %v3903_v1  ;;  %3702 = vmatpush3.msra.mxu0 %v949_v12 }
 0x55c   : > { %3711 = vmatprep.subr.mxu0 %v3903_v1 }
 0x616   : > { %v1364_v50 = vpop.f32.mrf.mxu0 }
 0x617   : > { %3689 = vmatmul.mubr.msk.f32.vlgmr.msra.gmra.mxu1 %vm957_vm2, %v1364_v50  ;;  %v1969_v50 = vld [vmem:[%s4558_s9 + $0x10] sm:$0xff] }
 0x618   : > { %v3685_v51 = vpop.f32.mrf.mxu0  ;;  %3698 = vmatprep.mubr.msk.f32.mxu1 %vm3904_vm0, %v3903_v1 }
 0x61a   : > { %v1516_v52 = vpop.f32.mrf.mxu0 }
 0x61b   : > { %v1520_v53 = vmul.f32 0.35355338, %v1516_v52  ;;  %v1968_v52 = vld [vmem:[%s4558_s9 + $0x8] sm:$0xff] }
 0x61c   : > { %v3695_v54 = vpop.f32.mrf.mxu0 }
 0x61d   : > { %v1521_v55 = vadd.f32 %v1520_v53, %v4117_v13  ;;  %v1967_v53 = vld [vmem:[%s4558_s9] sm:$0xff] }
 0x61f   : > { %v1522_v56 = vsel %vm957_vm2, %v1521_v55, -inf }
 0x620   : > { %1523 = vmax.xlane.f32.xlu1 %v1522_v56 }
 0x631   : > { %1533 = vrot.lane.b32.xlu1 %v4099_v8, %s3912_s6  ;;  %s4563_s6 = sld [smem:[#allocation5_spill]] }
 0x635   : > { %1685 = vrot.lane.b32.xlu1 %v4099_v8, %s4531_s1  ;;  %s4559_s1 = sld [smem:[#allocation3_spill]] }
 0x639   : > { %1683 = vrot.lane.b32.xlu1 %v4099_v8, %s4532_s3 }
 0x63b   : > { %s838_s3 = scalar_lea.vmem %s4559_s1, %s4078_s30  ;;  %s846_s1 = scalar_lea.vmem %s4563_s6, %s4078_s30 }
 0x63c   : > { %v860_v51 = vld [vmem:[%s838_s3] sm:$0xff]  ;;  %s4561_s3 = sld [smem:[#allocation11_spill]]  ;;  %s4568_s6 = smov 104  }
 0x63d   : > { %v4294_v12 = vld [vmem:[%s846_s1] sm:$0xff]  ;;  %s854_s1 = scalar_lea.vmem %s4526_s25, %s4078_s30 }
 0x6a9   : > { %v1524_v57 = vpop.xlane.xlu1 %1523 }
 0x6aa   : > { %v1525_v58 = vsub.f32 %v1521_v55, %v1524_v57 }
 0x6ac   : > { %v1526_v59 = vmul.f32 1.442695, %v1525_v58  ;;  %v3540_v58 = vld [vmem:[%s4560_s10] ss:$0 sm:$0xff]  ;;  %s4567_s10 = smov 80  }
 0x6ad   : > { %v1534_v60 = vpop.permute.xlu1 %1533 }
 0x6ae   : > { %3865 = vpow2.f32 %v1526_v59  ;;  %3697 = vmatpush3.msra.mxu1 %v1534_v60  ;;  %v3541_v60 = vld [vmem:[%s4561_s3] ss:$0 sm:$0xff]  ;;  %s4564_s3 = smov 96  }
 0x6af   : > { %3706 = vmatprep.subr.mxu1 %v3903_v1 }
 0x6b1   : > { %v1686_v9 = vpop.permute.xlu1 %1685 }
 0x6b5   : > { %v1684_v11 = vpop.permute.xlu1 %1683 }
 0x6bb   : > { %v3866_v61 = vpop.eup %3865 }
 0x6bc   : > { %v1528_v62 = vsel %vm957_vm2, %v3866_v61, 0.0 }
 0x6bd   : > { %1529 = vadd.xlane.f32.xlu0 %v1528_v62 }
 0x6d7   : > { %v1437_v2 = vpop.f32.mrf.mxu1 }
 0x6d8   : > { %v1441_v3 = vadd.f32 %v1437_v2, %v1200_v0 }
 0x6d9   : > { %v3690_v4 = vpop.f32.mrf.mxu1 }
 0x6da   : > { %v3542_v4 = vld [vmem:[%s4512_s11] ss:$0 sm:$0xff] }
 0x746   : > { %v1530_v6 = vpop.xlane.xlu0 %1529 }
 0x747   : > { %3867 = vrcp.f32 %v1530_v6 }
 0x754   : > { %v3868_v7 = vpop.eup %3867 }
 0x755   : > { %v4181_v10 = vmul.f32 %v3868_v7, %v3866_v61 }
 0x757   : > { %3699 = vmatmul.mubr.msk.f32.vlgmr.msra.gmra.mxu1 %vm957_vm2, %v4181_v10 }
 0x758   : > { %3707 = vmatpush3.xpose.msk.msra.mxu1 %vm957_vm2, %v1686_v9  ;;  %3708 = vmatprep.mubr.msk.f32.mxu1 %vm3904_vm0, %v3903_v1 }
 0x759   : > { %3716 = vmatprep.subr.mxu1 %v3903_v1 }
 0x75b   : > { %3709 = vmatmul.mubr.msk.f32.vlgmr.msra.gmra.mxu1 %vm957_vm2, %v1684_v11 }
 0x75c   : > { %3718 = vmatprep.mubr.msk.f32.mxu1 %vm3904_vm0, %v3903_v1  ;;  %3717 = vmatpush3.msra.mxu1 %v950_v28 }
 0x75d   : > { %3732 = vmatprep.subr.mxu1 %v3903_v1 }
 0x817   : > { %v1605_v14 = vpop.f32.mrf.mxu1 }
 0x818   : > { %3704 = vmatmul.mubr.msk.f32.vlgmr.msra.gmra.mxu0 %vm957_vm2, %v1605_v14 }
 0x819   : > { %v3700_v15 = vpop.f32.mrf.mxu1  ;;  %3713 = vmatprep.mubr.msk.f32.mxu0 %vm3904_vm0, %v3903_v1 }
 0x81b   : > { %v1757_v16 = vpop.f32.mrf.mxu1 }
 0x81c   : > { %v1761_v17 = vmul.f32 0.35355338, %v1757_v16 }
 0x81d   : > { %v3710_v18 = vpop.f32.mrf.mxu1 }
 0x81e   : > { %v1762_v19 = vadd.f32 %v1761_v17, %v4117_v13 }
 0x820   : > { %v1763_v20 = vsel %vm957_vm2, %v1762_v19, -inf }
 0x821   : > { %1764 = vmax.xlane.f32.xlu1 %v1763_v20 }
 0x8aa   : > { %v1765_v21 = vpop.xlane.xlu1 %1764 }
 0x8ab   : > { %v1766_v22 = vsub.f32 %v1762_v19, %v1765_v21 }
 0x8ad   : > { %v1767_v23 = vmul.f32 1.442695, %v1766_v22 }
 0x8af   : > { %3869 = vpow2.f32 %v1767_v23 }
 0x8bc   : > { %v3870_v24 = vpop.eup %3869 }
 0x8bd   : > { %v1769_v25 = vsel %vm957_vm2, %v3870_v24, 0.0 }
 0x8be   : > { %1770 = vadd.xlane.f32.xlu0 %v1769_v25 }
 0x8d4   : > { %1774 = vrot.lane.b32.xlu0 %v4099_v8, %s3915_s5  ;;  %s4566_s5 = smov 112  }
 0x8d8   : > { %v1678_v26 = vpop.f32.mrf.mxu0 }
 0x8d9   : > { %v1682_v13 = vadd.f32 %v1678_v26, %v1441_v3 }
 0x8da   : > { %v3705_v29 = vpop.f32.mrf.mxu0 }
 0x8db   : > { %v2136_v29 = vld [vmem:[%s4515_s14] sm:$0xff] }
 0x947   : > { %v1771_v30 = vpop.xlane.xlu0 %1770 }
 0x948   : > { %3871 = vrcp.f32 %v1771_v30 }
 0x94b   : > { %v1775_v31 = vpop.permute.xlu0 %1774 }
 0x94c   : > { %3712 = vmatpush3.msra.mxu0 %v1775_v31 }
 0x94d   : > { %3721 = vmatprep.subr.mxu0 %v3903_v1 }
 0x955   : > { %v3872_v32 = vpop.eup %3871 }
 0x956   : > { %v4208_v33 = vmul.f32 %v3872_v32, %v3870_v24 }
 0x958   : > { %3714 = vmatmul.mubr.msk.f32.vlgmr.msra.gmra.mxu0 %vm957_vm2, %v4208_v33 }
 0x959   : > { %3729 = vmatprep.mubr.msk.f32.mxu0 %vm3904_vm0, %v3903_v1  ;;  %3722 = vmatpush3.msra.mxu0 %v1970_v48 }
 0x95a   : > { %3723 = vmatprep.subr.mxu0 %v3903_v1 }
 0x95b   : > { %3724 = vmatpush3.msra.mxu0 %v1969_v50  ;;  %v2137_v50 = vld [vmem:[%s4515_s14 + $0x8] sm:$0xff] }
 0x95c   : > { %3725 = vmatprep.subr.mxu0 %v3903_v1 }
 0x95d   : > { %3726 = vmatpush3.msra.mxu0 %v1968_v52 }
 0x95e   : > { %3727 = vmatprep.subr.mxu0 %v3903_v1 }
 0x95f   : > { %3728 = vmatpush3.msra.mxu0 %v1967_v53 }
 0x960   : > { %3743 = vmatprep.subr.mxu0 %v3903_v1 }
 0xa18   : > { %v1846_v8 = vpop.f32.mrf.mxu0 }
 0xa19   : > { %3719 = vmatmul.mubr.msk.f32.vlgmr.msra.gmra.mxu1 %vm957_vm2, %v1846_v8 }
 0xa1a   : > { %v3715_v34 = vpop.f32.mrf.mxu0  ;;  %3740 = vmatprep.mubr.msk.f32.mxu1 %vm3904_vm0, %v3903_v1  ;;  %3733 = vmatpush3.msra.mxu1 %v2054_v45 }
 0xa1b   : > { %3734 = vmatprep.subr.mxu1 %v3903_v1 }
 0xad9   : > { %v1919_v35 = vpop.f32.mrf.mxu1 }
 0xada   : > { %v1923_v36 = vadd.f32 %v1919_v35, %v1682_v13 }
 0xadb   : > { %v3720_v37 = vpop.f32.mrf.mxu1 }
 0xadc   : > { %v1924_v38 = vadd.f32 %v1923_v36, %v4088_v5  ;;  %v2053_v5 = vld [vmem:[%s4513_s12 + $0x10] sm:$0xff] }
 0xadd   : > { %3735 = vmatpush3.msra.mxu1 %v2053_v5 }
 0xade   : > { %v1925_v39 = vsel %vm872_vm1, %v1924_v38, 0.0  ;;  %3736 = vmatprep.subr.mxu1 %v3903_v1 }
 0xadf   : > { %1926 = vadd.xlane.f32.xlu0 %v1925_v39  ;;  %3737 = vmatpush3.msra.mxu1 %v2052_v46 }
 0xae0   : > { %3738 = vmatprep.subr.mxu1 %v3903_v1 }
 0xae1   : > { %3739 = vmatpush3.msra.mxu1 %v2051_v49 }
 0xae2   : > { %3741 = vmatmul.mubr.msk.f32.vlgmr.msra.gmra.mxu1 %vm872_vm1, %v860_v51  ;;  %3748 = vmatprep.subr.mxu1 %v3903_v1 }
 0xae3   : > { %3750 = vmatprep.mubr.msk.f32.mxu1 %vm3904_vm0, %v3903_v1 }
 0xb68   : > { %v1927_v40 = vpop.xlane.xlu0 %1926 }
 0xb69   : > { %v1929_v41 = vmul.f32 0.03125, %v1927_v40 }
 0xb6b   : > { %v1930_v42 = vsub.f32 %v1924_v38, %v1929_v41 }
 0xb6d   : > { %v1931_v43 = vmul.f32 %v1930_v42, %v1930_v42 }
 0xb6f   : > { %v1932_v44 = vsel %vm872_vm1, %v1931_v43, 0.0 }
 0xb70   : > { %1933 = vadd.xlane.f32.xlu1 %v1932_v44 }
 0xba2   : > { %v2131_v0 = vpop.f32.mrf.mxu1 }
 0xba3   : > { %v4274_v2 = vadd.f32 %v3544_v63, %v2131_v0 }
 0xba4   : > { %v3742_v3 = vpop.f32.mrf.mxu1 }
 0xba5   : > { %2390 = vrot.lane.b32.xlu0 %v4274_v2, %s4562_s28  ;;  %v3550_v3 = vld [vmem:[%s4516_s15] ss:$0 sm:$0xff] }
 0xbf9   : > { %v1934_v54 = vpop.xlane.xlu1 %1933 }
 0xbfa   : > { %v1935_v55 = vmul.f32 0.03125, %v1934_v54 }
 0xbfc   : > { %v1936_v56 = vadd.f32 1e-05, %v1935_v55 }
 0xbfe   : > { %3873 = vrsqrt.f32 %v1936_v56 }
 0xc0b   : > { %v3874_v57 = vpop.eup %3873 }
 0xc0c   : > { %v1938_v59 = vmul.f32 %v3874_v57, %v1930_v42 }
 0xc0e   : > { %v1945_v61 = vmul.f32 %v3540_v58, %v1938_v59 }
 0xc10   : > { %v4265_v62 = vadd.f32 %v3541_v60, %v1945_v61 }
 0xc12   : > { %3730 = vmatmul.mubr.msk.f32.vlgmr.msra.gmra.mxu0 %vm872_vm1, %v4265_v62 }
 0xc13   : > { %3745 = vmatprep.mubr.msk.f32.mxu0 %vm3904_vm0, %v3903_v1  ;;  %3744 = vmatpush3.xpose.msk.msra.mxu0 %vm957_vm2, %v4274_v2 }
 0xc14   : > { %3753 = vmatprep.subr.mxu0 %v3903_v1 }
 0xc17   : > { %v2391_v28 = vpop.permute.xlu0 %2390 }
 0xcd2   : > { %v2047_v6 = vpop.f32.mrf.mxu0 }
 0xcd3   : > { %v4284_v7 = vadd.f32 %v3542_v4, %v2047_v6 }
 0xcd4   : > { %v3731_v9 = vpop.f32.mrf.mxu0 }
 0xcd5   : > { %3746 = vmatmul.mubr.msk.f32.vlgmr.msra.gmra.mxu0 %vm957_vm2, %v4284_v7 }
 0xcd6   : > { %3755 = vmatprep.mubr.msk.f32.mxu0 %vm3904_vm0, %v3903_v1  ;;  %3754 = vmatpush3.msra.mxu0 %v2136_v29 }
 0xcd7   : > { %3763 = vmatprep.subr.mxu0 %v3903_v1 }
 0xd95   : > { %v2215_v11 = vpop.f32.mrf.mxu0 }
 0xd96   : > { %v2219_v14 = vmul.f32 0.35355338, %v2215_v11 }
 0xd97   : > { %v3747_v15 = vpop.f32.mrf.mxu0 }
 0xd98   : > { %v2220_v16 = vadd.f32 %v2219_v14, %v4294_v12 }
 0xd9a   : > { %v2221_v17 = vsel %vm957_vm2, %v2220_v16, -inf }
 0xd9b   : > { %2222 = vmax.xlane.f32.xlu1 %v2221_v17 }
 0xdac   : > { %2232 = vrot.lane.b32.xlu1 %v4274_v2, %s4564_s3  ;;  %s858_s3 = scalar_lea.vmem %s4527_s26, %s4078_s30 }
 0xe24   : > { %v2223_v18 = vpop.xlane.xlu1 %2222 }
 0xe25   : > { %v2224_v19 = vsub.f32 %v2220_v16, %v2223_v18  ;;  %v2138_v18 = vld [vmem:[%s4515_s14 + $0x10] sm:$0xff] }
 0xe27   : > { %v2225_v20 = vmul.f32 1.442695, %v2224_v19 }
 0xe28   : > { %v2233_v21 = vpop.permute.xlu1 %2232 }
 0xe29   : > { %3875 = vpow2.f32 %v2225_v20  ;;  %3749 = vmatpush3.msra.mxu1 %v2233_v21 }
 0xe2a   : > { %3758 = vmatprep.subr.mxu1 %v3903_v1 }
 0xe36   : > { %v3876_v22 = vpop.eup %3875 }
 0xe37   : > { %v2227_v23 = vsel %vm957_vm2, %v3876_v22, 0.0 }
 0xe38   : > { %2228 = vadd.xlane.f32.xlu1 %v2227_v23 }
 0xe49   : > { %2388 = vrot.lane.b32.xlu1 %v4284_v7, %s4562_s28  ;;  %s4565_s28 = smov 88  }
 0xec1   : > { %v2229_v24 = vpop.xlane.xlu1 %2228 }
 0xec2   : > { %3877 = vrcp.f32 %v2229_v24 }
 0xec5   : > { %v2389_v13 = vpop.permute.xlu1 %2388 }
 0xecf   : > { %v3878_v25 = vpop.eup %3877 }
 0xed0   : > { %v4304_v26 = vmul.f32 %v3878_v25, %v3876_v22 }
 0xed2   : > { %3751 = vmatmul.mubr.msk.f32.vlgmr.msra.gmra.mxu1 %vm957_vm2, %v4304_v26 }
 0xed3   : > { %3759 = vmatpush3.xpose.msk.msra.mxu1 %vm957_vm2, %v2391_v28  ;;  %3760 = vmatprep.mubr.msk.f32.mxu1 %vm3904_vm0, %v3903_v1 }
 0xed4   : > { %3768 = vmatprep.subr.mxu1 %v3903_v1 }
 0xed6   : > { %3761 = vmatmul.mubr.msk.f32.vlgmr.msra.gmra.mxu1 %vm957_vm2, %v2389_v13 }
 0xed7   : > { %3770 = vmatprep.mubr.msk.f32.mxu1 %vm3904_vm0, %v3903_v1  ;;  %3769 = vmatpush3.msra.mxu1 %v2137_v50 }
 0xed8   : > { %3778 = vmatprep.subr.mxu1 %v3903_v1 }
 0xf92   : > { %v2304_v30 = vpop.f32.mrf.mxu1 }
 0xf93   : > { %3756 = vmatmul.mubr.msk.f32.vlgmr.msra.gmra.mxu0 %vm957_vm2, %v2304_v30 }
 0xf94   : > { %v3752_v31 = vpop.f32.mrf.mxu1  ;;  %3765 = vmatprep.mubr.msk.f32.mxu0 %vm3904_vm0, %v3903_v1 }
 0xf96   : > { %v2462_v32 = vpop.f32.mrf.mxu1 }
 0xf97   : > { %v2466_v8 = vmul.f32 0.35355338, %v2462_v32 }
 0xf98   : > { %v3762_v34 = vpop.f32.mrf.mxu1 }
 0xf99   : > { %v2467_v35 = vadd.f32 %v2466_v8, %v4294_v12 }
 0xf9b   : > { %v2468_v36 = vsel %vm957_vm2, %v2467_v35, -inf }
 0xf9c   : > { %2469 = vmax.xlane.f32.xlu1 %v2468_v36 }
 0xfad   : > { %2479 = vrot.lane.b32.xlu1 %v4274_v2, %s4565_s28  ;;  %s4569_s28 = smov 72  }
 0xfb1   : > { %2629 = vrot.lane.b32.xlu1 %v4284_v7, %s4566_s5 }
0x1025   : > { %v2470_v37 = vpop.xlane.xlu1 %2469 }
0x1026   : > { %v2471_v38 = vsub.f32 %v2467_v35, %v2470_v37 }
0x1028   : > { %v2472_v39 = vmul.f32 1.442695, %v2471_v38 }
0x1029   : > { %v2480_v40 = vpop.permute.xlu1 %2479 }
0x102a   : > { %3879 = vpow2.f32 %v2472_v39  ;;  %3764 = vmatpush3.msra.mxu0 %v2480_v40 }
0x102b   : > { %3773 = vmatprep.subr.mxu0 %v3903_v1 }
0x102d   : > { %v2630_v49 = vpop.permute.xlu1 %2629 }
0x1037   : > { %v3880_v41 = vpop.eup %3879 }
0x1038   : > { %v2474_v42 = vsel %vm957_vm2, %v3880_v41, 0.0 }
0x1039   : > { %2475 = vadd.xlane.f32.xlu0 %v2474_v42 }
0x104f   : > { %2631 = vrot.lane.b32.xlu0 %v4274_v2, %s4566_s5  ;;  %s3916_s5 = smov 8  }
0x1053   : > { %v2377_v43 = vpop.f32.mrf.mxu0 }
0x1054   : > { %v2387_v4 = vadd.f32 %v3550_v3, %v2377_v43 }
0x1055   : > { %v3757_v44 = vpop.f32.mrf.mxu0 }
0x10c2   : > { %v2476_v45 = vpop.xlane.xlu0 %2475 }
0x10c3   : > { %3881 = vrcp.f32 %v2476_v45 }
0x10c6   : > { %v2632_v48 = vpop.permute.xlu0 %2631 }
0x10d0   : > { %v3882_v5 = vpop.eup %3881 }
0x10d1   : > { %v4332_v46 = vmul.f32 %v3882_v5, %v3880_v41 }
0x10d3   : > { %3766 = vmatmul.mubr.msk.f32.vlgmr.msra.gmra.mxu0 %vm957_vm2, %v4332_v46 }
0x10d4   : > { %3774 = vmatpush3.xpose.msk.msra.mxu0 %vm957_vm2, %v2632_v48  ;;  %3775 = vmatprep.mubr.msk.f32.mxu0 %vm3904_vm0, %v3903_v1 }
0x10d5   : > { %3783 = vmatprep.subr.mxu0 %v3903_v1 }
0x10d7   : > { %3776 = vmatmul.mubr.msk.f32.vlgmr.msra.gmra.mxu0 %vm957_vm2, %v2630_v49 }
0x10d8   : > { %3785 = vmatprep.mubr.msk.f32.mxu0 %vm3904_vm0, %v3903_v1  ;;  %3784 = vmatpush3.msra.mxu0 %v2138_v18  ;;  %v3565_v18 = vld [vmem:[%s4520_s19] ss:$0 sm:$0xff] }
0x10d9   : > { %3793 = vmatprep.subr.mxu0 %v3903_v1 }
0x1193   : > { %v2551_v51 = vpop.f32.mrf.mxu0 }
0x1194   : > { %3771 = vmatmul.mubr.msk.f32.vlgmr.msra.gmra.mxu1 %vm957_vm2, %v2551_v51 }
0x1195   : > { %v3767_v52 = vpop.f32.mrf.mxu0  ;;  %3780 = vmatprep.mubr.msk.f32.mxu1 %vm3904_vm0, %v3903_v1 }
0x1197   : > { %v2703_v53 = vpop.f32.mrf.mxu0 }
0x1198   : > { %v2707_v54 = vmul.f32 0.35355338, %v2703_v53 }
0x1199   : > { %v3777_v55 = vpop.f32.mrf.mxu0 }
0x119a   : > { %v2708_v56 = vadd.f32 %v2707_v54, %v4294_v12  ;;  %v3154_v54 = vld [vmem:[%s4519_s18 + $0x18] sm:$0xff]  ;;  %v3153_v55 = vld [vmem:[%s4519_s18 + $0x10] sm:$0xff] }
0x119c   : > { %v2709_v57 = vsel %vm957_vm2, %v2708_v56, -inf }
0x119d   : > { %2710 = vmax.xlane.f32.xlu1 %v2709_v57  ;;  %v3163_v57 = vld [vmem:[%s4521_s20 + $0x38] sm:$0xff] }
0x11ae   : > { %2720 = vrot.lane.b32.xlu1 %v4274_v2, %s4567_s10  ;;  %s850_s10 = scalar_lea.vmem %s4525_s24, %s4078_s30 }
0x11b2   : > { %2870 = vrot.lane.b32.xlu1 %v4284_v7, %s4568_s6 }
0x1226   : > { %v2711_v58 = vpop.xlane.xlu1 %2710 }
0x1227   : > { %v2712_v59 = vsub.f32 %v2708_v56, %v2711_v58  ;;  %v3151_v56 = vld [vmem:[%s4519_s18] sm:$0xff]  ;;  %v3162_v58 = vld [vmem:[%s4521_s20 + $0x30] sm:$0xff] }
0x1229   : > { %v2713_v60 = vmul.f32 1.442695, %v2712_v59  ;;  %v3161_v59 = vld [vmem:[%s4521_s20 + $0x28] sm:$0xff] }
0x122a   : > { %v2721_v61 = vpop.permute.xlu1 %2720 }
0x122b   : > { %3883 = vpow2.f32 %v2713_v60  ;;  %3779 = vmatpush3.msra.mxu1 %v2721_v61  ;;  %v3160_v60 = vld [vmem:[%s4521_s20 + $0x20] sm:$0xff]  ;;  %v3159_v61 = vld [vmem:[%s4521_s20 + $0x18] sm:$0xff] }
0x122c   : > { %3788 = vmatprep.subr.mxu1 %v3903_v1 }
0x122e   : > { %v2871_v17 = vpop.permute.xlu1 %2870 }
0x1238   : > { %v3884_v63 = vpop.eup %3883 }
0x1239   : > { %v2715_v0 = vsel %vm957_vm2, %v3884_v63, 0.0 }
0x123a   : > { %2716 = vadd.xlane.f32.xlu0 %v2715_v0 }
0x1250   : > { %2872 = vrot.lane.b32.xlu0 %v4274_v2, %s4568_s6 }
0x1254   : > { %v2624_v6 = vpop.f32.mrf.mxu1 }
0x1255   : > { %v2628_v7 = vadd.f32 %v2624_v6, %v2387_v4  ;;  %v3563_v6 = vld [vmem:[%s4517_s16] ss:$0 sm:$0xff] }
0x1256   : > { %v3772_v9 = vpop.f32.mrf.mxu1 }
0x1257   : > { %v3564_v9 = vld [vmem:[%s4518_s17] ss:$0 sm:$0xff] }
0x12c3   : > { %v2717_v11 = vpop.xlane.xlu0 %2716 }
0x12c4   : > { %3885 = vrcp.f32 %v2717_v11 }
0x12c7   : > { %v2873_v16 = vpop.permute.xlu0 %2872 }
0x12d1   : > { %v3886_v14 = vpop.eup %3885 }
0x12d2   : > { %v2719_v15 = vmul.f32 %v3886_v14, %v3884_v63 }
0x12d4   : > { %3781 = vmatmul.mubr.msk.f32.vlgmr.msra.gmra.mxu1 %vm957_vm2, %v2719_v15 }
0x12d5   : > { %3789 = vmatpush3.xpose.msk.msra.mxu1 %vm957_vm2, %v2873_v16  ;;  %3790 = vmatprep.mubr.msk.f32.mxu1 %vm3904_vm0, %v3903_v1  ;;  %v3157_v16 = vld [vmem:[%s4521_s20 + $0x8] sm:$0xff] }
0x12d6   : > { %3798 = vmatprep.subr.mxu1 %v3903_v1 }
0x12d8   : > { %3791 = vmatmul.mubr.msk.f32.vlgmr.msra.gmra.mxu1 %vm957_vm2, %v2871_v17  ;;  %v3156_v17 = vld [vmem:[%s4521_s20] sm:$0xff] }
0x12d9   : > { %3800 = vmatprep.mubr.msk.f32.mxu1 %vm3904_vm0, %v3903_v1 }
0x1394   : > { %v2792_v19 = vpop.f32.mrf.mxu1 }
0x1395   : > { %3786 = vmatmul.mubr.msk.f32.vlgmr.msra.gmra.mxu0 %vm957_vm2, %v2792_v19 }
0x1396   : > { %v3782_v20 = vpop.f32.mrf.mxu1  ;;  %3795 = vmatprep.mubr.msk.f32.mxu0 %vm3904_vm0, %v3903_v1 }
0x1398   : > { %v2944_v21 = vpop.f32.mrf.mxu1 }
0x1399   : > { %v2948_v22 = vmul.f32 0.35355338, %v2944_v21 }
0x139a   : > { %v3792_v23 = vpop.f32.mrf.mxu1 }
0x139b   : > { %v2949_v24 = vadd.f32 %v2948_v22, %v4294_v12  ;;  %v3567_v23 = vld [vmem:[%s4522_s21] ss:$0 sm:$0xff] }
0x139d   : > { %v2950_v25 = vsel %vm957_vm2, %v2949_v24, -inf }
0x139e   : > { %2951 = vmax.xlane.f32.xlu1 %v2950_v25 }
0x13af   : > { %2961 = vrot.lane.b32.xlu1 %v4274_v2, %s4569_s28 }
0x13b3   : > { %1953 = vrot.lane.b32.xlu1 %v4151_v47, %s3916_s5 }
0x13b7   : > { %1956 = vrot.lane.b32.xlu1 %v4181_v10, %s3917_s0 }
0x13bb   : > { %3142 = vrot.lane.b32.xlu1 %v2719_v15, %s3917_s0  ;;  %v3158_v15 = vld [vmem:[%s4521_s20 + $0x10] sm:$0xff] }
0x13bf   : > { %1959 = vrot.lane.b32.xlu1 %v4208_v33, %s3918_s7 }
0x1427   : > { %v2952_v12 = vpop.xlane.xlu1 %2951 }
0x1428   : > { %v2953_v28 = vsub.f32 %v2949_v24, %v2952_v12 }
0x142a   : > { %v2954_v13 = vmul.f32 1.442695, %v2953_v28 }
0x142b   : > { %v2962_v29 = vpop.permute.xlu1 %2961 }
0x142c   : > { %3887 = vpow2.f32 %v2954_v13  ;;  %3794 = vmatpush3.msra.mxu0 %v2962_v29 }
0x142d   : > { %3803 = vmatprep.subr.mxu0 %v3903_v1 }
0x142f   : > { %v1954_v2 = vpop.permute.xlu1 %1953 }
0x1430   : > { %v1962_v31 = vsel %vm957_vm2, %v4129_v27, %v1954_v2  ;;  %v2139_v27 = vld [vmem:[%s4515_s14 + $0x18] sm:$0xff] }
0x1431   : > { %3799 = vmatpush3.msra.mxu1 %v2139_v27 }
0x1432   : > { %3814 = vmatprep.subr.mxu1 %v3903_v1 }
0x1433   : > { %v1957_v30 = vpop.permute.xlu1 %1956 }
0x1434   : > { %v1964_v32 = vsel %vm1963_vm3, %v1962_v31, %v1957_v30 }
0x1437   : > { %v4388_v47 = vpop.permute.xlu1 %3142 }
0x1439   : > { %v3888_v10 = vpop.eup %3887 }
0x143a   : > { %v2956_v33 = vsel %vm957_vm2, %v3888_v10, 0.0 }
0x143b   : > { %2957 = vadd.xlane.f32.xlu0 %v2956_v33  ;;  %v1960_v8 = vpop.permute.xlu1 %1959 }
0x143c   : > { %v1966_v34 = vsel %vm1965_vm4, %v1964_v32, %v1960_v8 }
0x143d   : > { %3356 = vst.msk [vmem:[%s854_s1] sm:$0xff] %vm872_vm1, %v1966_v34 }
0x1455   : > { %v2865_v35 = vpop.f32.mrf.mxu0 }
0x1456   : > { %v2869_v36 = vadd.f32 %v2865_v35, %v2628_v7 }
0x1457   : > { %v3787_v37 = vpop.f32.mrf.mxu0 }
0x14c4   : > { %v2958_v38 = vpop.xlane.xlu0 %2957 }
0x14c5   : > { %3889 = vrcp.f32 %v2958_v38  ;;  %v3569_v38 = vld [vmem:[%s4523_s22] ss:$0 sm:$0xff] }
0x14d2   : > { %v3890_v39 = vpop.eup %3889 }
0x14d3   : > { %v2960_v40 = vmul.f32 %v3890_v39, %v3888_v10  ;;  %v3570_v39 = vld [vmem:[%s4524_s23] ss:$0 sm:$0xff] }
0x14d5   : > { %3145 = vrot.lane.b32.xlu1 %v2960_v40, %s3918_s7  ;;  %3796 = vmatmul.mubr.msk.f32.vlgmr.msra.gmra.mxu0 %vm957_vm2, %v2960_v40 }
0x14d6   : > { %3811 = vmatprep.mubr.msk.f32.mxu0 %vm3904_vm0, %v3903_v1  ;;  %3804 = vmatpush3.msra.mxu0 %v3154_v54 }
0x14d7   : > { %3805 = vmatprep.subr.mxu0 %v3903_v1 }
0x14d8   : > { %3806 = vmatpush3.msra.mxu0 %v3153_v55 }
0x14d9   : > { %3807 = vmatprep.subr.mxu0 %v3903_v1 }
0x1547   : > { %v3146_v35 = vpop.permute.xlu1 %3145 }
0x1595   : > { %v3033_v41 = vpop.f32.mrf.mxu0 }
0x1596   : > { %3801 = vmatmul.mubr.msk.f32.vlgmr.msra.gmra.mxu1 %vm957_vm2, %v3033_v41 }
0x1597   : > { %v3797_v42 = vpop.f32.mrf.mxu0  ;;  %3830 = vmatprep.mubr.msk.f32.mxu1 %vm3904_vm0, %v3903_v1  ;;  %3815 = vmatpush3.msra.mxu1 %v3163_v57 }
0x1598   : > { %3816 = vmatprep.subr.mxu1 %v3903_v1 }
0x1599   : > { %3817 = vmatpush3.msra.mxu1 %v3162_v58 }
0x159a   : > { %3818 = vmatprep.subr.mxu1 %v3903_v1 }
0x159b   : > { %3819 = vmatpush3.msra.mxu1 %v3161_v59 }
0x159c   : > { %3820 = vmatprep.subr.mxu1 %v3903_v1 }
0x159d   : > { %3821 = vmatpush3.msra.mxu1 %v3160_v60 }
0x159e   : > { %3822 = vmatprep.subr.mxu1 %v3903_v1 }
0x159f   : > { %3823 = vmatpush3.msra.mxu1 %v3159_v61 }
0x15a0   : > { %3824 = vmatprep.subr.mxu1 %v3903_v1 }
0x15a1   : > { %3825 = vmatpush3.msra.mxu1 %v3158_v15 }
0x15a2   : > { %3826 = vmatprep.subr.mxu1 %v3903_v1 }
0x15a3   : > { %3827 = vmatpush3.msra.mxu1 %v3157_v16 }
0x15a4   : > { %3828 = vmatprep.subr.mxu1 %v3903_v1 }
0x15a5   : > { %3829 = vmatpush3.msra.mxu1 %v3156_v17 }
0x1656   : > { %v3106_v43 = vpop.f32.mrf.mxu1 }
0x1657   : > { %v3110_v44 = vadd.f32 %v3106_v43, %v2869_v36 }
0x1658   : > { %v3802_v45 = vpop.f32.mrf.mxu1 }
0x1659   : > { %v3111_v5 = vadd.f32 %v3110_v44, %v4265_v62  ;;  %v3152_v62 = vld [vmem:[%s4519_s18 + $0x8] sm:$0xff] }
0x165a   : > { %3808 = vmatpush3.msra.mxu0 %v3152_v62 }
0x165b   : > { %v3112_v48 = vsel %vm872_vm1, %v3111_v5, 0.0  ;;  %3809 = vmatprep.subr.mxu0 %v3903_v1 }
0x165c   : > { %3113 = vadd.xlane.f32.xlu0 %v3112_v48  ;;  %3810 = vmatpush3.msra.mxu0 %v3151_v56 }
0x16e5   : > { %v3114_v49 = vpop.xlane.xlu0 %3113 }
0x16e6   : > { %v3115_v50 = vmul.f32 0.03125, %v3114_v49 }
0x16e8   : > { %v3116_v51 = vsub.f32 %v3111_v5, %v3115_v50 }
0x16ea   : > { %v3117_v52 = vmul.f32 %v3116_v51, %v3116_v51 }
0x16ec   : > { %v3118_v53 = vsel %vm872_vm1, %v3117_v52, 0.0 }
0x16ed   : > { %3119 = vadd.xlane.f32.xlu0 %v3118_v53 }
0x1776   : > { %v3120_v63 = vpop.xlane.xlu0 %3119 }
0x1777   : > { %v3121_v0 = vmul.f32 0.03125, %v3120_v63 }
0x1779   : > { %v3122_v3 = vadd.f32 1e-05, %v3121_v0 }
0x177b   : > { %3891 = vrsqrt.f32 %v3122_v3 }
0x1788   : > { %v3892_v4 = vpop.eup %3891 }
0x1789   : > { %v3124_v7 = vmul.f32 %v3892_v4, %v3116_v51 }
0x178b   : > { %v3131_v11 = vmul.f32 %v3563_v6, %v3124_v7 }
0x178d   : > { %v3138_v14 = vadd.f32 %v3564_v9, %v3131_v11 }
0x178f   : > { %3812 = vmatmul.mubr.msk.f32.vlgmr.msra.gmra.mxu0 %vm872_vm1, %v3138_v14 }
0x184f   : > { %v3242_v19 = vpop.f32.mrf.mxu0 }
0x1850   : > { %v3243_v20 = vadd.f32 %v3565_v18, %v3242_v19 }
0x1851   : > { %v3813_v21 = vpop.f32.mrf.mxu0 }
0x1852   : > { %v3246_v22 = vmax.f32 %v3243_v20, 0.0 }
0x1854   : > { %3831 = vmatmul.mubr.msk.f32.vlgmr.msra.gmra.mxu1 %vm3253_vm5, %v3246_v22 }
0x1914   : > { %v3323_v24 = vpop.f32.mrf.mxu1 }
0x1915   : > { %v3324_v25 = vadd.f32 %v3567_v23, %v3323_v24 }
0x1916   : > { %v3832_v12 = vpop.f32.mrf.mxu1 }
0x1917   : > { %v3327_v1 = vadd.f32 %v3324_v25, %v3138_v14 }
0x1919   : > { %v3328_v28 = vsel %vm872_vm1, %v3327_v1, 0.0 }
0x191a   : > { %3329 = vadd.xlane.f32.xlu0 %v3328_v28 }
0x19a3   : > { %v3330_v13 = vpop.xlane.xlu0 %3329 }
0x19a4   : > { %v3331_v29 = vmul.f32 0.03125, %v3330_v13 }
0x19a6   : > { %v3332_v2 = vsub.f32 %v3327_v1, %v3331_v29 }
0x19a8   : > { %v3333_v30 = vmul.f32 %v3332_v2, %v3332_v2 }
0x19aa   : > { %v3334_v10 = vsel %vm872_vm1, %v3333_v30, 0.0 }
0x19ab   : > { %3335 = vadd.xlane.f32.xlu0 %v3334_v10 }
0x19c1   : > { %3139 = vrot.lane.b32.xlu0 %v4332_v46, %s3916_s5 }
0x1a34   : > { %v3336_v31 = vpop.xlane.xlu0 %3335 }
0x1a35   : > { %v3337_v33 = vmul.f32 0.03125, %v3336_v31 }
0x1a37   : > { %v3338_v32 = vadd.f32 1e-05, %v3337_v33 }
0x1a38   : > { %v3140_v8 = vpop.permute.xlu0 %3139 }
0x1a39   : > { %3893 = vrsqrt.f32 %v3338_v32  ;;  %v3148_v34 = vsel %vm957_vm2, %v4304_v26, %v3140_v8 }
0x1a3a   : > { %v3149_v36 = vsel %vm1963_vm3, %v3148_v34, %v4388_v47 }
0x1a3b   : > { %v3150_v37 = vsel %vm1965_vm4, %v3149_v36, %v3146_v35 }
0x1a3c   : > { %3357 = vst.msk [vmem:[%s858_s3] sm:$0xff] %vm872_vm1, %v3150_v37 }
0x1a46   : > { %v3894_v46 = vpop.eup %3893 }
0x1a47   : > { %v3340_v27 = vmul.f32 %v3894_v46, %v3332_v2 }
0x1a49   : > { %v3347_v40 = vmul.f32 %v3569_v38, %v3340_v27 }
0x1a4b   : > { %v3354_v26 = vadd.f32 %v3570_v39, %v3347_v40 }
0x1a4d   : > { %3355 = vst.msk [vmem:[%s850_s10] sm:$0xff] %vm872_vm1, %v3354_v26 }
0x1a4e PF: > { %s37_s27 = sadd.s32 1, %s3901_s27  }
0x1a4f   : > { %p34_p4 = scmp.ge.s32.totalorder %s37_s27, 4  }
0x1a51   :  { %36 = sbr.rel (!%p34_p4) target bundleno = 12 (0xc), region = 179 }

</bundles_post_ra>
